<compile_context>
chip_gen: v7x
topology: tpu7x:2x2x1
jax: 0.10.0
libtpu: 0.0.40
codegen_flags: <defaults>
</compile_context>

<pallas_src>
import functools

import jax
import jax.numpy as jnp
import numpy as np
from jax import lax
from jax.experimental import pallas as pl
from jax.experimental.pallas import tpu as pltpu

K = 4                      # all ConvTranspose2d kernels are 4x4
STRIDES = (1, 2, 2, 2, 2)
PADS = (0, 1, 1, 1, 1)
EPS = 1e-5


# ----------------------------------------------------------------------------
# Host-side (init-time) weight repacking
# ----------------------------------------------------------------------------
def _col_block(w, ky, width):
    """Column taps of one kernel row of a stride-2/pad-1 ConvT as a dense
    (width*Cin, width*2*Cout) matrix on row-form lanes (ix, ci) producing
    row-form lanes (n, px, co) with ox = 2n + px."""
    cin, cout = w.shape[0], w.shape[1]
    m = np.zeros((width, cin, width, 2, cout), np.float32)
    for n in range(width):
        m[n, :, n, 0, :] = w[:, :, ky, 1]              # ox=2n   <- ix=n,   kx=1
        if n >= 1:
            m[n - 1, :, n, 0, :] = w[:, :, ky, 3]      # ox=2n   <- ix=n-1, kx=3
        m[n, :, n, 1, :] = w[:, :, ky, 2]              # ox=2n+1 <- ix=n,   kx=2
        if n + 1 < width:
            m[n + 1, :, n, 1, :] = w[:, :, ky, 0]      # ox=2n+1 <- ix=n+1, kx=0
    return m.reshape(width * cin, width * 2 * cout)


def _vs_cat(w, width, n_pad):
    """Four parity blocks [ky=3 (q0), ky=1 (q1a), ky=2 (q1b), ky=0 (q2)],
    each lane-padded to n_pad, concatenated along lanes -> one wide RHS."""
    blocks = []
    for ky in (3, 1, 2, 0):
        b = _col_block(w, ky, width)
        if b.shape[1] < n_pad:
            b = np.pad(b, ((0, 0), (0, n_pad - b.shape[1])))
        blocks.append(b)
    return np.concatenate(blocks, axis=1)


def _interleave_shift_mat(batch, h):
    """(2*B*h, 4*B*h) 0/1 matrix acting on rows [q0; q1a; q1b; q2]:
       out[b*2h+2m]   = q1a[b*h+m] + q0[b*h+m-1]   (row m-1 term masked at m=0)
       out[b*2h+2m+1] = q1b[b*h+m] + q2[b*h+m+1]   (row m+1 term masked at m=h-1)
    i.e. the per-parity source-row shifts AND the even/odd row interleave."""
    bh = batch * h
    L = np.zeros((2 * bh, 4 * bh), np.float32)
    for b in range(batch):
        for m in range(h):
            re = b * 2 * h + 2 * m
            ro = re + 1
            L[re, 1 * bh + b * h + m] = 1.0
            if m >= 1:
                L[re, 0 * bh + b * h + m - 1] = 1.0
            L[ro, 2 * bh + b * h + m] = 1.0
            if m + 1 < h:
                L[ro, 3 * bh + b * h + m + 1] = 1.0
    return L


def _shift_mats(batch, h):
    """(B*h, B*h) 0/1 shift-down / shift-up matrices with per-image masking."""
    bh = batch * h
    sd = np.zeros((bh, bh), np.float32)
    su = np.zeros((bh, bh), np.float32)
    for b in range(batch):
        for m in range(h):
            if m >= 1:
                sd[b * h + m, b * h + m - 1] = 1.0
            if m + 1 < h:
                su[b * h + m, b * h + m + 1] = 1.0
    return sd, su


def _fold(width, c):
    """Per-channel fold matrix (width*c, c) and its transpose."""
    f = np.tile(np.eye(c, dtype=np.float32), (width, 1))
    return f, np.ascontiguousarray(f.T)


def _pool_gather(width, nc, rows_pad, cols_pad):
    """(n, px, c) lanes of the row-pair tanh sum -> 0.25 * channel-major
    (c, n) lanes; zero-padded to (rows_pad, cols_pad)."""
    g = np.zeros((width, 2, nc, nc, width), np.float32)
    for n in range(width):
        for px in range(2):
            for c in range(nc):
                g[n, px, c, c, n] = 0.25
    g = g.reshape(width * 2 * nc, nc * width)
    return np.pad(g, ((0, rows_pad - g.shape[0]), (0, cols_pad - g.shape[1])))


def prepare_params(weights, batch):
    """weights: 5 ConvTranspose2d weights in torch layout (Cin, Cout, 4, 4)."""
    w1, w2, w3, w4, w5 = [np.asarray(w, np.float32) for w in weights]
    c1 = w1.shape[1]
    # layer 1: single (nz, 4*4*C1) RHS; lane index = iy*(4*C1) + ix*C1 + c
    w1_flat = np.ascontiguousarray(w1.transpose(0, 2, 3, 1)).reshape(
        w1.shape[0], 16 * c1)
    f1, ft1 = _fold(4, c1)
    params = [jnp.asarray(w1_flat, jnp.bfloat16),
              jnp.asarray(f1), jnp.asarray(ft1)]
    spatial = 4
    for w in (w2, w3, w4):
        cout = w.shape[1]
        n_lanes = 2 * spatial * cout
        assert n_lanes % 128 == 0
        params.append(jnp.asarray(_vs_cat(w, spatial, n_lanes), jnp.bfloat16))
        params.append(jnp.asarray(_interleave_shift_mat(batch, spatial)))
        f, ft = _fold(2 * spatial, cout)
        params += [jnp.asarray(f), jnp.asarray(ft)]
        spatial *= 2
    nc = w5.shape[1]
    assert nc * spatial <= 128
    n5 = -(-2 * spatial * nc // 128) * 128            # 192 -> 256
    params.append(jnp.asarray(_vs_cat(w5, spatial, n5), jnp.bfloat16))
    sd5, su5 = _shift_mats(batch, spatial)
    params += [jnp.asarray(sd5), jnp.asarray(su5)]
    params.append(jnp.asarray(_pool_gather(spatial, nc, n5, 128)))
    return tuple(params)


# ----------------------------------------------------------------------------
# The single fused Pallas kernel
# ----------------------------------------------------------------------------
def _generator_kernel(z_ref, w1_ref, f1_ref, ft1_ref,
                      vs2_ref, l2_ref, f2_ref, ft2_ref,
                      vs3_ref, l3_ref, f3_ref, ft3_ref,
                      vs4_ref, l4_ref, f4_ref, ft4_ref,
                      vs5_ref, sd5_ref, su5_ref, g_ref,
                      o_ref, a1_ref):
    batch = z_ref.shape[0]
    row_lanes = a1_ref.shape[1]            # 4 * C1

    def mxu(a, w_ref):
        # big conv matmuls: bf16 x bf16 -> f32 accumulate (single MXU pass)
        return jnp.dot(a.astype(jnp.bfloat16), w_ref[...],
                       preferred_element_type=jnp.float32)

    def bn_relu(x, f_ref, ft_ref, count):
        # training-mode BatchNorm (batch stats, gamma=1, beta=0) + ReLU.
        # Per-channel stats folded out of row-form lanes with tiny matmuls;
        # var = E[x^2] - mean^2 so both reductions proceed concurrently.
        inv_n = 1.0 / float(count)
        s1 = jnp.sum(x, axis=0, keepdims=True)
        s2 = jnp.sum(x * x, axis=0, keepdims=True)
        f = f_ref[...]
        mean_c = jnp.dot(s1, f) * inv_n
        ex2_c = jnp.dot(s2, f) * inv_n
        scale_c = lax.rsqrt(ex2_c - mean_c * mean_c + EPS)
        ft = ft_ref[...]
        scale = jnp.dot(scale_c, ft)
        shift = jnp.dot(mean_c * scale_c, ft)
        return jnp.maximum(x * scale - shift, 0.0)

    def split4(r, n):
        return r[:, :n], r[:, n:2 * n], r[:, 2 * n:3 * n], r[:, 3 * n:]

    # ---- layer 1: ConvT(nz, C1, 4,1,0) on 1x1 input: one matmul + row scatter
    full = mxu(z_ref[...], w1_ref)                     # (B, 16*C1)
    for b in range(batch):
        for iy in range(4):
            a1_ref[pl.ds(b * 4 + iy, 1), :] = (
                full[b:b + 1, iy * row_lanes:(iy + 1) * row_lanes])
    a = bn_relu(a1_ref[...], f1_ref, ft1_ref, batch * 16)

    # ---- layers 2..4: stride-2 ConvT + BN + ReLU on row-form activations ----
    for vs_ref, l_ref, f_ref, ft_ref, cnt in (
            (vs2_ref, l2_ref, f2_ref, ft2_ref, batch * 64),
            (vs3_ref, l3_ref, f3_ref, ft3_ref, batch * 256),
            (vs4_ref, l4_ref, f4_ref, ft4_ref, batch * 1024)):
        r = mxu(a, vs_ref)                             # one wide parity matmul
        n = vs_ref.shape[1] // 4
        q0, q1a, q1b, q2 = split4(r, n)
        qcat = jnp.concatenate([q0, q1a, q1b, q2], axis=0)
        # single 0/1 matmul does both the +-1 source-row shifts and the
        # even/odd output-row interleave (was 4 separate MXU launches).
        x = jnp.dot(l_ref[...], qcat)
        a = bn_relu(x, f_ref, ft_ref, cnt)

    # ---- layer 5: ConvT -> tanh -> exact 2x2 mean pool -> channel-major ----
    r = mxu(a, vs5_ref)
    n = vs5_ref.shape[1] // 4
    q0, q1a, q1b, q2 = split4(r, n)
    r_even = q1a + jnp.dot(sd5_ref[...], q0)           # output rows 2m
    r_odd = q1b + jnp.dot(su5_ref[...], q2)            # output rows 2m+1
    t = jnp.tanh(r_even) + jnp.tanh(r_odd)             # vertical pool pair
    # horizontal pool pair + 0.25 scaling + channel-major gather, lane-dense
    o_ref[...] = jnp.dot(t, g_ref[...])                # (B*32, 128)


@functools.partial(jax.jit, static_argnames=("nc",))
def generator_pallas(z, params, nc=3):
    batch = z.shape[0]
    row_lanes = params[0].shape[1] // 4                # 4 * C1
    out2d = pl.pallas_call(
        _generator_kernel,
        out_shape=jax.ShapeDtypeStruct((batch * 32, 128), jnp.float32),
        scratch_shapes=[pltpu.VMEM((batch * 4, row_lanes), jnp.float32)],
        compiler_params=pltpu.CompilerParams(
            vmem_limit_bytes=32 * 1024 * 1024),
    )(z.astype(jnp.float32), *params)
    # tiny relayout of the lane-dense kernel output to NCHW, done by XLA
    img = out2d[:, :nc * 32].reshape(batch, 32, nc, 32)
    return jnp.transpose(img, (0, 2, 1, 3))


# ----------------------------------------------------------------------------
# Pure-JAX/XLA reference (same math as the PyTorch module) for verification
# ----------------------------------------------------------------------------
def _prep_input(x_nhwc, stride, pad):
    edge = K - 1 - pad
    interior = stride - 1
    cfg = ((0, 0, 0), (edge, edge, interior), (edge, edge, interior), (0, 0, 0))
    return lax.pad(x_nhwc, jnp.float32(0.0), cfg)


def _prep_weight(w_torch):
    return jnp.transpose(jnp.flip(w_torch, (2, 3)), (2, 3, 0, 1))


def generator_reference(z, weights):
    B, nz = z.shape
    x = z.reshape(B, 1, 1, nz).astype(jnp.float32)
    for i, (w_t, s, p) in enumerate(zip(weights, STRIDES, PADS)):
        xpad = _prep_input(x, s, p)
        x = lax.conv_general_dilated(
            xpad, _prep_weight(w_t), (1, 1), "VALID",
            dimension_numbers=("NHWC", "HWIO", "NHWC"),
            precision=lax.Precision.HIGHEST)
        if i < 4:
            mean = jnp.mean(x, axis=(0, 1, 2), keepdims=True)
            var = jnp.mean((x - mean) ** 2, axis=(0, 1, 2), keepdims=True)
            x = jnp.maximum((x - mean) * lax.rsqrt(var + EPS), 0.0)
    t = jnp.tanh(x)
    B_, H_, W_, C_ = t.shape
    pooled = t.reshape(B_, H_ // 2, 2, W_ // 2, 2, C_).mean(axis=(2, 4))
    return jnp.transpose(pooled, (0, 3, 1, 2))


# ----------------------------------------------------------------------------
# Main
# ----------------------------------------------------------------------------
if __name__ == "__main__":
    # Small, architecture-consistent sizes: nz=16, ngf=8, nc=3, batch=2.
    nz, ngf, nc, batch = 16, 8, 3, 2
    chans = [nz, ngf * 8, ngf * 4, ngf * 2, ngf, nc]

    key = jax.random.PRNGKey(0)
    keys = jax.random.split(key, 6)
    # PyTorch ConvTranspose2d weight layout: (Cin, Cout, K, K).
    weights = tuple(
        0.05 * jax.random.normal(keys[i], (chans[i], chans[i + 1], K, K),
                                 dtype=jnp.float32)
        for i in range(5)
    )
    z = jax.random.normal(keys[5], (batch, nz), dtype=jnp.float32)

    params = prepare_params(weights, batch)          # one-time weight repack
    out = jax.block_until_ready(generator_pallas(z, params, nc=nc))
    assert out.shape == (batch, nc, 32, 32), out.shape

    ref = jax.block_until_ready(generator_reference(z, weights))
    np.testing.assert_allclose(np.asarray(out), np.asarray(ref),
                               rtol=3e-2, atol=3e-2)
    print("KERNEL_OK")
</pallas_src>

<mosaic_0001>
module attributes {stable_mosaic.version = 11 : i64} {
  func.func @_generator_kernel(%arg0: memref<2x16xf32, #tpu.memory_space<vmem>>, %arg1: memref<16x1024xbf16, #tpu.memory_space<vmem>>, %arg2: memref<256x64xf32, #tpu.memory_space<vmem>>, %arg3: memref<64x256xf32, #tpu.memory_space<vmem>>, %arg4: memref<256x1024xbf16, #tpu.memory_space<vmem>>, %arg5: memref<16x32xf32, #tpu.memory_space<vmem>>, %arg6: memref<256x32xf32, #tpu.memory_space<vmem>>, %arg7: memref<32x256xf32, #tpu.memory_space<vmem>>, %arg8: memref<256x1024xbf16, #tpu.memory_space<vmem>>, %arg9: memref<32x64xf32, #tpu.memory_space<vmem>>, %arg10: memref<256x16xf32, #tpu.memory_space<vmem>>, %arg11: memref<16x256xf32, #tpu.memory_space<vmem>>, %arg12: memref<256x1024xbf16, #tpu.memory_space<vmem>>, %arg13: memref<64x128xf32, #tpu.memory_space<vmem>>, %arg14: memref<256x8xf32, #tpu.memory_space<vmem>>, %arg15: memref<8x256xf32, #tpu.memory_space<vmem>>, %arg16: memref<256x1024xbf16, #tpu.memory_space<vmem>>, %arg17: memref<64x64xf32, #tpu.memory_space<vmem>>, %arg18: memref<64x64xf32, #tpu.memory_space<vmem>>, %arg19: memref<256x128xf32, #tpu.memory_space<vmem>>, %arg20: memref<64x128xf32, #tpu.memory_space<vmem>>, %arg21: memref<8x256xf32, #tpu.memory_space<vmem>>) attributes {dimension_semantics = [], scalar_prefetch = 0 : i64, scratch_operands = 1 : i64, tpu.core_type = #tpu.core_type<tc>} {
    %c0 = arith.constant 0 : index
    %c0_0 = arith.constant 0 : index
    %0 = vector.load %arg0[%c0, %c0_0] : memref<2x16xf32, #tpu.memory_space<vmem>>, vector<2x16xf32>
    %1 = arith.truncf %0 : vector<2x16xf32> to vector<2x16xbf16>
    %c0_1 = arith.constant 0 : index
    %c0_2 = arith.constant 0 : index
    %2 = vector.load %arg1[%c0_1, %c0_2] : memref<16x1024xbf16, #tpu.memory_space<vmem>>, vector<16x1024xbf16>
    %cst = arith.constant dense<0.000000e+00> : vector<2x1024xf32>
    %3 = tpu.matmul %1, %2, %cst {dimension_numbers = #tpu.dot_dimension_numbers<[1], [0], [0], [1], [0, 0, 1, 1], [], []>} : vector<2x16xbf16>, vector<16x1024xbf16>, vector<2x1024xf32> -> vector<2x1024xf32>
    %4 = vector.extract_strided_slice %3 {offsets = [0, 0], sizes = [1, 256], strides = [1, 1]} : vector<2x1024xf32> to vector<1x256xf32>
    %c0_3 = arith.constant 0 : index
    %c0_4 = arith.constant 0 : index
    %5 = vector.load %arg21[%c0_3, %c0_4] : memref<8x256xf32, #tpu.memory_space<vmem>>, vector<1x256xf32>
    tpu.vector_store %arg21[%c0_3, %c0_4], %4 {strides = array<i32>} : memref<8x256xf32, #tpu.memory_space<vmem>>, vector<1x256xf32>,
    %6 = vector.extract_strided_slice %3 {offsets = [0, 256], sizes = [1, 256], strides = [1, 1]} : vector<2x1024xf32> to vector<1x256xf32>
    %c1 = arith.constant 1 : index
    %c0_5 = arith.constant 0 : index
    %7 = vector.load %arg21[%c1, %c0_5] : memref<8x256xf32, #tpu.memory_space<vmem>>, vector<1x256xf32>
    tpu.vector_store %arg21[%c1, %c0_5], %6 {strides = array<i32>} : memref<8x256xf32, #tpu.memory_space<vmem>>, vector<1x256xf32>,
    %8 = vector.extract_strided_slice %3 {offsets = [0, 512], sizes = [1, 256], strides = [1, 1]} : vector<2x1024xf32> to vector<1x256xf32>
    %c2 = arith.constant 2 : index
    %c0_6 = arith.constant 0 : index
    %9 = vector.load %arg21[%c2, %c0_6] : memref<8x256xf32, #tpu.memory_space<vmem>>, vector<1x256xf32>
    tpu.vector_store %arg21[%c2, %c0_6], %8 {strides = array<i32>} : memref<8x256xf32, #tpu.memory_space<vmem>>, vector<1x256xf32>,
    %10 = vector.extract_strided_slice %3 {offsets = [0, 768], sizes = [1, 256], strides = [1, 1]} : vector<2x1024xf32> to vector<1x256xf32>
    %c3 = arith.constant 3 : index
    %c0_7 = arith.constant 0 : index
    %11 = vector.load %arg21[%c3, %c0_7] : memref<8x256xf32, #tpu.memory_space<vmem>>, vector<1x256xf32>
    tpu.vector_store %arg21[%c3, %c0_7], %10 {strides = array<i32>} : memref<8x256xf32, #tpu.memory_space<vmem>>, vector<1x256xf32>,
    %12 = vector.extract_strided_slice %3 {offsets = [1, 0], sizes = [1, 256], strides = [1, 1]} : vector<2x1024xf32> to vector<1x256xf32>
    %c4 = arith.constant 4 : index
    %c0_8 = arith.constant 0 : index
    %13 = vector.load %arg21[%c4, %c0_8] : memref<8x256xf32, #tpu.memory_space<vmem>>, vector<1x256xf32>
    tpu.vector_store %arg21[%c4, %c0_8], %12 {strides = array<i32>} : memref<8x256xf32, #tpu.memory_space<vmem>>, vector<1x256xf32>,
    %14 = vector.extract_strided_slice %3 {offsets = [1, 256], sizes = [1, 256], strides = [1, 1]} : vector<2x1024xf32> to vector<1x256xf32>
    %c5 = arith.constant 5 : index
    %c0_9 = arith.constant 0 : index
    %15 = vector.load %arg21[%c5, %c0_9] : memref<8x256xf32, #tpu.memory_space<vmem>>, vector<1x256xf32>
    tpu.vector_store %arg21[%c5, %c0_9], %14 {strides = array<i32>} : memref<8x256xf32, #tpu.memory_space<vmem>>, vector<1x256xf32>,
    %16 = vector.extract_strided_slice %3 {offsets = [1, 512], sizes = [1, 256], strides = [1, 1]} : vector<2x1024xf32> to vector<1x256xf32>
    %c6 = arith.constant 6 : index
    %c0_10 = arith.constant 0 : index
    %17 = vector.load %arg21[%c6, %c0_10] : memref<8x256xf32, #tpu.memory_space<vmem>>, vector<1x256xf32>
    tpu.vector_store %arg21[%c6, %c0_10], %16 {strides = array<i32>} : memref<8x256xf32, #tpu.memory_space<vmem>>, vector<1x256xf32>,
    %18 = vector.extract_strided_slice %3 {offsets = [1, 768], sizes = [1, 256], strides = [1, 1]} : vector<2x1024xf32> to vector<1x256xf32>
    %c7 = arith.constant 7 : index
    %c0_11 = arith.constant 0 : index
    %19 = vector.load %arg21[%c7, %c0_11] : memref<8x256xf32, #tpu.memory_space<vmem>>, vector<1x256xf32>
    tpu.vector_store %arg21[%c7, %c0_11], %18 {strides = array<i32>} : memref<8x256xf32, #tpu.memory_space<vmem>>, vector<1x256xf32>,
    %c0_12 = arith.constant 0 : index
    %c0_13 = arith.constant 0 : index
    %20 = vector.load %arg21[%c0_12, %c0_13] : memref<8x256xf32, #tpu.memory_space<vmem>>, vector<8x256xf32>
    %cst_14 = arith.constant dense<0.000000e+00> : vector<256xf32>
    %21 = vector.multi_reduction <add>, %20, %cst_14 [0] : vector<8x256xf32> to vector<256xf32>
    %22 = vector.shape_cast %21 : vector<256xf32> to vector<1x256xf32>
    %23 = arith.mulf %20, %20 : vector<8x256xf32>
    %cst_15 = arith.constant dense<0.000000e+00> : vector<256xf32>
    %24 = vector.multi_reduction <add>, %23, %cst_15 [0] : vector<8x256xf32> to vector<256xf32>
    %25 = vector.shape_cast %24 : vector<256xf32> to vector<1x256xf32>
    %c0_16 = arith.constant 0 : index
    %c0_17 = arith.constant 0 : index
    %26 = vector.load %arg2[%c0_16, %c0_17] : memref<256x64xf32, #tpu.memory_space<vmem>>, vector<256x64xf32>
    %cst_18 = arith.constant dense<0.000000e+00> : vector<1x64xf32>
    %27 = tpu.matmul %22, %26, %cst_18 {dimension_numbers = #tpu.dot_dimension_numbers<[1], [0], [0], [1], [0, 0, 1, 1], [], []>} : vector<1x256xf32>, vector<256x64xf32>, vector<1x64xf32> -> vector<1x64xf32>
    %cst_19 = arith.constant 3.125000e-02 : f32
    %28 = vector.broadcast %cst_19 : f32 to vector<1x64xf32>
    %29 = arith.mulf %27, %28 : vector<1x64xf32>
    %cst_20 = arith.constant dense<0.000000e+00> : vector<1x64xf32>
    %30 = tpu.matmul %25, %26, %cst_20 {dimension_numbers = #tpu.dot_dimension_numbers<[1], [0], [0], [1], [0, 0, 1, 1], [], []>} : vector<1x256xf32>, vector<256x64xf32>, vector<1x64xf32> -> vector<1x64xf32>
    %cst_21 = arith.constant 3.125000e-02 : f32
    %31 = vector.broadcast %cst_21 : f32 to vector<1x64xf32>
    %32 = arith.mulf %30, %31 : vector<1x64xf32>
    %33 = arith.mulf %29, %29 : vector<1x64xf32>
    %34 = arith.subf %32, %33 : vector<1x64xf32>
    %cst_22 = arith.constant 9.99999974E-6 : f32
    %35 = vector.broadcast %cst_22 : f32 to vector<1x64xf32>
    %36 = arith.addf %34, %35 : vector<1x64xf32>
    %37 = math.rsqrt %36 : vector<1x64xf32>
    %c0_23 = arith.constant 0 : index
    %c0_24 = arith.constant 0 : index
    %38 = vector.load %arg3[%c0_23, %c0_24] : memref<64x256xf32, #tpu.memory_space<vmem>>, vector<64x256xf32>
    %cst_25 = arith.constant dense<0.000000e+00> : vector<1x256xf32>
    %39 = tpu.matmul %37, %38, %cst_25 {dimension_numbers = #tpu.dot_dimension_numbers<[1], [0], [0], [1], [0, 0, 1, 1], [], []>} : vector<1x64xf32>, vector<64x256xf32>, vector<1x256xf32> -> vector<1x256xf32>
    %40 = arith.mulf %29, %37 : vector<1x64xf32>
    %cst_26 = arith.constant dense<0.000000e+00> : vector<1x256xf32>
    %41 = tpu.matmul %40, %38, %cst_26 {dimension_numbers = #tpu.dot_dimension_numbers<[1], [0], [0], [1], [0, 0, 1, 1], [], []>} : vector<1x64xf32>, vector<64x256xf32>, vector<1x256xf32> -> vector<1x256xf32>
    %42 = vector.broadcast %39 : vector<1x256xf32> to vector<8x256xf32>
    %43 = arith.mulf %20, %42 : vector<8x256xf32>
    %44 = vector.broadcast %41 : vector<1x256xf32> to vector<8x256xf32>
    %45 = arith.subf %43, %44 : vector<8x256xf32>
    %cst_27 = arith.constant 0.000000e+00 : f32
    %46 = vector.broadcast %cst_27 : f32 to vector<8x256xf32>
    %47 = arith.maximumf %45, %46 : vector<8x256xf32>
    %48 = arith.truncf %47 : vector<8x256xf32> to vector<8x256xbf16>
    %c0_28 = arith.constant 0 : index
    %c0_29 = arith.constant 0 : index
    %49 = vector.load %arg4[%c0_28, %c0_29] : memref<256x1024xbf16, #tpu.memory_space<vmem>>, vector<256x1024xbf16>
    %cst_30 = arith.constant dense<0.000000e+00> : vector<8x1024xf32>
    %50 = tpu.matmul %48, %49, %cst_30 {dimension_numbers = #tpu.dot_dimension_numbers<[1], [0], [0], [1], [0, 0, 1, 1], [], []>} : vector<8x256xbf16>, vector<256x1024xbf16>, vector<8x1024xf32> -> vector<8x1024xf32>
    %51 = vector.extract_strided_slice %50 {offsets = [0, 0], sizes = [8, 256], strides = [1, 1]} : vector<8x1024xf32> to vector<8x256xf32>
    %52 = vector.extract_strided_slice %50 {offsets = [0, 256], sizes = [8, 256], strides = [1, 1]} : vector<8x1024xf32> to vector<8x256xf32>
    %53 = vector.extract_strided_slice %50 {offsets = [0, 512], sizes = [8, 256], strides = [1, 1]} : vector<8x1024xf32> to vector<8x256xf32>
    %54 = vector.extract_strided_slice %50 {offsets = [0, 768], sizes = [8, 256], strides = [1, 1]} : vector<8x1024xf32> to vector<8x256xf32>
    %55 = tpu.concatenate %51, %52, %53, %54 in 0 : vector<8x256xf32>, vector<8x256xf32>, vector<8x256xf32>, vector<8x256xf32> -> vector<32x256xf32>
    %c0_31 = arith.constant 0 : index
    %c0_32 = arith.constant 0 : index
    %56 = vector.load %arg5[%c0_31, %c0_32] : memref<16x32xf32, #tpu.memory_space<vmem>>, vector<16x32xf32>
    %cst_33 = arith.constant dense<0.000000e+00> : vector<16x256xf32>
    %57 = tpu.matmul %56, %55, %cst_33 {dimension_numbers = #tpu.dot_dimension_numbers<[1], [0], [0], [1], [0, 0, 1, 1], [], []>} : vector<16x32xf32>, vector<32x256xf32>, vector<16x256xf32> -> vector<16x256xf32>
    %cst_34 = arith.constant dense<0.000000e+00> : vector<256xf32>
    %58 = vector.multi_reduction <add>, %57, %cst_34 [0] : vector<16x256xf32> to vector<256xf32>
    %59 = vector.shape_cast %58 : vector<256xf32> to vector<1x256xf32>
    %60 = arith.mulf %57, %57 : vector<16x256xf32>
    %cst_35 = arith.constant dense<0.000000e+00> : vector<256xf32>
    %61 = vector.multi_reduction <add>, %60, %cst_35 [0] : vector<16x256xf32> to vector<256xf32>
    %62 = vector.shape_cast %61 : vector<256xf32> to vector<1x256xf32>
    %c0_36 = arith.constant 0 : index
    %c0_37 = arith.constant 0 : index
    %63 = vector.load %arg6[%c0_36, %c0_37] : memref<256x32xf32, #tpu.memory_space<vmem>>, vector<256x32xf32>
    %cst_38 = arith.constant dense<0.000000e+00> : vector<1x32xf32>
    %64 = tpu.matmul %59, %63, %cst_38 {dimension_numbers = #tpu.dot_dimension_numbers<[1], [0], [0], [1], [0, 0, 1, 1], [], []>} : vector<1x256xf32>, vector<256x32xf32>, vector<1x32xf32> -> vector<1x32xf32>
    %cst_39 = arith.constant 7.812500e-03 : f32
    %65 = vector.broadcast %cst_39 : f32 to vector<1x32xf32>
    %66 = arith.mulf %64, %65 : vector<1x32xf32>
    %cst_40 = arith.constant dense<0.000000e+00> : vector<1x32xf32>
    %67 = tpu.matmul %62, %63, %cst_40 {dimension_numbers = #tpu.dot_dimension_numbers<[1], [0], [0], [1], [0, 0, 1, 1], [], []>} : vector<1x256xf32>, vector<256x32xf32>, vector<1x32xf32> -> vector<1x32xf32>
    %cst_41 = arith.constant 7.812500e-03 : f32
    %68 = vector.broadcast %cst_41 : f32 to vector<1x32xf32>
    %69 = arith.mulf %67, %68 : vector<1x32xf32>
    %70 = arith.mulf %66, %66 : vector<1x32xf32>
    %71 = arith.subf %69, %70 : vector<1x32xf32>
    %cst_42 = arith.constant 9.99999974E-6 : f32
    %72 = vector.broadcast %cst_42 : f32 to vector<1x32xf32>
    %73 = arith.addf %71, %72 : vector<1x32xf32>
    %74 = math.rsqrt %73 : vector<1x32xf32>
    %c0_43 = arith.constant 0 : index
    %c0_44 = arith.constant 0 : index
    %75 = vector.load %arg7[%c0_43, %c0_44] : memref<32x256xf32, #tpu.memory_space<vmem>>, vector<32x256xf32>
    %cst_45 = arith.constant dense<0.000000e+00> : vector<1x256xf32>
    %76 = tpu.matmul %74, %75, %cst_45 {dimension_numbers = #tpu.dot_dimension_numbers<[1], [0], [0], [1], [0, 0, 1, 1], [], []>} : vector<1x32xf32>, vector<32x256xf32>, vector<1x256xf32> -> vector<1x256xf32>
    %77 = arith.mulf %66, %74 : vector<1x32xf32>
    %cst_46 = arith.constant dense<0.000000e+00> : vector<1x256xf32>
    %78 = tpu.matmul %77, %75, %cst_46 {dimension_numbers = #tpu.dot_dimension_numbers<[1], [0], [0], [1], [0, 0, 1, 1], [], []>} : vector<1x32xf32>, vector<32x256xf32>, vector<1x256xf32> -> vector<1x256xf32>
    %79 = vector.broadcast %76 : vector<1x256xf32> to vector<16x256xf32>
    %80 = arith.mulf %57, %79 : vector<16x256xf32>
    %81 = vector.broadcast %78 : vector<1x256xf32> to vector<16x256xf32>
    %82 = arith.subf %80, %81 : vector<16x256xf32>
    %cst_47 = arith.constant 0.000000e+00 : f32
    %83 = vector.broadcast %cst_47 : f32 to vector<16x256xf32>
    %84 = arith.maximumf %82, %83 : vector<16x256xf32>
    %85 = arith.truncf %84 : vector<16x256xf32> to vector<16x256xbf16>
    %c0_48 = arith.constant 0 : index
    %c0_49 = arith.constant 0 : index
    %86 = vector.load %arg8[%c0_48, %c0_49] : memref<256x1024xbf16, #tpu.memory_space<vmem>>, vector<256x1024xbf16>
    %cst_50 = arith.constant dense<0.000000e+00> : vector<16x1024xf32>
    %87 = tpu.matmul %85, %86, %cst_50 {dimension_numbers = #tpu.dot_dimension_numbers<[1], [0], [0], [1], [0, 0, 1, 1], [], []>} : vector<16x256xbf16>, vector<256x1024xbf16>, vector<16x1024xf32> -> vector<16x1024xf32>
    %88 = vector.extract_strided_slice %87 {offsets = [0, 0], sizes = [16, 256], strides = [1, 1]} : vector<16x1024xf32> to vector<16x256xf32>
    %89 = vector.extract_strided_slice %87 {offsets = [0, 256], sizes = [16, 256], strides = [1, 1]} : vector<16x1024xf32> to vector<16x256xf32>
    %90 = vector.extract_strided_slice %87 {offsets = [0, 512], sizes = [16, 256], strides = [1, 1]} : vector<16x1024xf32> to vector<16x256xf32>
    %91 = vector.extract_strided_slice %87 {offsets = [0, 768], sizes = [16, 256], strides = [1, 1]} : vector<16x1024xf32> to vector<16x256xf32>
    %92 = tpu.concatenate %88, %89, %90, %91 in 0 : vector<16x256xf32>, vector<16x256xf32>, vector<16x256xf32>, vector<16x256xf32> -> vector<64x256xf32>
    %c0_51 = arith.constant 0 : index
    %c0_52 = arith.constant 0 : index
    %93 = vector.load %arg9[%c0_51, %c0_52] : memref<32x64xf32, #tpu.memory_space<vmem>>, vector<32x64xf32>
    %cst_53 = arith.constant dense<0.000000e+00> : vector<32x256xf32>
    %94 = tpu.matmul %93, %92, %cst_53 {dimension_numbers = #tpu.dot_dimension_numbers<[1], [0], [0], [1], [0, 0, 1, 1], [], []>} : vector<32x64xf32>, vector<64x256xf32>, vector<32x256xf32> -> vector<32x256xf32>
    %cst_54 = arith.constant dense<0.000000e+00> : vector<256xf32>
    %95 = vector.multi_reduction <add>, %94, %cst_54 [0] : vector<32x256xf32> to vector<256xf32>
    %96 = vector.shape_cast %95 : vector<256xf32> to vector<1x256xf32>
    %97 = arith.mulf %94, %94 : vector<32x256xf32>
    %cst_55 = arith.constant dense<0.000000e+00> : vector<256xf32>
    %98 = vector.multi_reduction <add>, %97, %cst_55 [0] : vector<32x256xf32> to vector<256xf32>
    %99 = vector.shape_cast %98 : vector<256xf32> to vector<1x256xf32>
    %c0_56 = arith.constant 0 : index
    %c0_57 = arith.constant 0 : index
    %100 = vector.load %arg10[%c0_56, %c0_57] : memref<256x16xf32, #tpu.memory_space<vmem>>, vector<256x16xf32>
    %cst_58 = arith.constant dense<0.000000e+00> : vector<1x16xf32>
    %101 = tpu.matmul %96, %100, %cst_58 {dimension_numbers = #tpu.dot_dimension_numbers<[1], [0], [0], [1], [0, 0, 1, 1], [], []>} : vector<1x256xf32>, vector<256x16xf32>, vector<1x16xf32> -> vector<1x16xf32>
    %cst_59 = arith.constant 0.001953125 : f32
    %102 = vector.broadcast %cst_59 : f32 to vector<1x16xf32>
    %103 = arith.mulf %101, %102 : vector<1x16xf32>
    %cst_60 = arith.constant dense<0.000000e+00> : vector<1x16xf32>
    %104 = tpu.matmul %99, %100, %cst_60 {dimension_numbers = #tpu.dot_dimension_numbers<[1], [0], [0], [1], [0, 0, 1, 1], [], []>} : vector<1x256xf32>, vector<256x16xf32>, vector<1x16xf32> -> vector<1x16xf32>
    %cst_61 = arith.constant 0.001953125 : f32
    %105 = vector.broadcast %cst_61 : f32 to vector<1x16xf32>
    %106 = arith.mulf %104, %105 : vector<1x16xf32>
    %107 = arith.mulf %103, %103 : vector<1x16xf32>
    %108 = arith.subf %106, %107 : vector<1x16xf32>
    %cst_62 = arith.constant 9.99999974E-6 : f32
    %109 = vector.broadcast %cst_62 : f32 to vector<1x16xf32>
    %110 = arith.addf %108, %109 : vector<1x16xf32>
    %111 = math.rsqrt %110 : vector<1x16xf32>
    %c0_63 = arith.constant 0 : index
    %c0_64 = arith.constant 0 : index
    %112 = vector.load %arg11[%c0_63, %c0_64] : memref<16x256xf32, #tpu.memory_space<vmem>>, vector<16x256xf32>
    %cst_65 = arith.constant dense<0.000000e+00> : vector<1x256xf32>
    %113 = tpu.matmul %111, %112, %cst_65 {dimension_numbers = #tpu.dot_dimension_numbers<[1], [0], [0], [1], [0, 0, 1, 1], [], []>} : vector<1x16xf32>, vector<16x256xf32>, vector<1x256xf32> -> vector<1x256xf32>
    %114 = arith.mulf %103, %111 : vector<1x16xf32>
    %cst_66 = arith.constant dense<0.000000e+00> : vector<1x256xf32>
    %115 = tpu.matmul %114, %112, %cst_66 {dimension_numbers = #tpu.dot_dimension_numbers<[1], [0], [0], [1], [0, 0, 1, 1], [], []>} : vector<1x16xf32>, vector<16x256xf32>, vector<1x256xf32> -> vector<1x256xf32>
    %116 = vector.broadcast %113 : vector<1x256xf32> to vector<32x256xf32>
    %117 = arith.mulf %94, %116 : vector<32x256xf32>
    %118 = vector.broadcast %115 : vector<1x256xf32> to vector<32x256xf32>
    %119 = arith.subf %117, %118 : vector<32x256xf32>
    %cst_67 = arith.constant 0.000000e+00 : f32
    %120 = vector.broadcast %cst_67 : f32 to vector<32x256xf32>
    %121 = arith.maximumf %119, %120 : vector<32x256xf32>
    %122 = arith.truncf %121 : vector<32x256xf32> to vector<32x256xbf16>
    %c0_68 = arith.constant 0 : index
    %c0_69 = arith.constant 0 : index
    %123 = vector.load %arg12[%c0_68, %c0_69] : memref<256x1024xbf16, #tpu.memory_space<vmem>>, vector<256x1024xbf16>
    %cst_70 = arith.constant dense<0.000000e+00> : vector<32x1024xf32>
    %124 = tpu.matmul %122, %123, %cst_70 {dimension_numbers = #tpu.dot_dimension_numbers<[1], [0], [0], [1], [0, 0, 1, 1], [], []>} : vector<32x256xbf16>, vector<256x1024xbf16>, vector<32x1024xf32> -> vector<32x1024xf32>
    %125 = vector.extract_strided_slice %124 {offsets = [0, 0], sizes = [32, 256], strides = [1, 1]} : vector<32x1024xf32> to vector<32x256xf32>
    %126 = vector.extract_strided_slice %124 {offsets = [0, 256], sizes = [32, 256], strides = [1, 1]} : vector<32x1024xf32> to vector<32x256xf32>
    %127 = vector.extract_strided_slice %124 {offsets = [0, 512], sizes = [32, 256], strides = [1, 1]} : vector<32x1024xf32> to vector<32x256xf32>
    %128 = vector.extract_strided_slice %124 {offsets = [0, 768], sizes = [32, 256], strides = [1, 1]} : vector<32x1024xf32> to vector<32x256xf32>
    %129 = tpu.concatenate %125, %126, %127, %128 in 0 : vector<32x256xf32>, vector<32x256xf32>, vector<32x256xf32>, vector<32x256xf32> -> vector<128x256xf32>
    %c0_71 = arith.constant 0 : index
    %c0_72 = arith.constant 0 : index
    %130 = vector.load %arg13[%c0_71, %c0_72] : memref<64x128xf32, #tpu.memory_space<vmem>>, vector<64x128xf32>
    %cst_73 = arith.constant dense<0.000000e+00> : vector<64x256xf32>
    %131 = tpu.matmul %130, %129, %cst_73 {dimension_numbers = #tpu.dot_dimension_numbers<[1], [0], [0], [1], [0, 0, 1, 1], [], []>} : vector<64x128xf32>, vector<128x256xf32>, vector<64x256xf32> -> vector<64x256xf32>
    %cst_74 = arith.constant dense<0.000000e+00> : vector<256xf32>
    %132 = vector.multi_reduction <add>, %131, %cst_74 [0] : vector<64x256xf32> to vector<256xf32>
    %133 = vector.shape_cast %132 : vector<256xf32> to vector<1x256xf32>
    %134 = arith.mulf %131, %131 : vector<64x256xf32>
    %cst_75 = arith.constant dense<0.000000e+00> : vector<256xf32>
    %135 = vector.multi_reduction <add>, %134, %cst_75 [0] : vector<64x256xf32> to vector<256xf32>
    %136 = vector.shape_cast %135 : vector<256xf32> to vector<1x256xf32>
    %c0_76 = arith.constant 0 : index
    %c0_77 = arith.constant 0 : index
    %137 = vector.load %arg14[%c0_76, %c0_77] : memref<256x8xf32, #tpu.memory_space<vmem>>, vector<256x8xf32>
    %cst_78 = arith.constant dense<0.000000e+00> : vector<1x8xf32>
    %138 = tpu.matmul %133, %137, %cst_78 {dimension_numbers = #tpu.dot_dimension_numbers<[1], [0], [0], [1], [0, 0, 1, 1], [], []>} : vector<1x256xf32>, vector<256x8xf32>, vector<1x8xf32> -> vector<1x8xf32>
    %cst_79 = arith.constant 4.8828125E-4 : f32
    %139 = vector.broadcast %cst_79 : f32 to vector<1x8xf32>
    %140 = arith.mulf %138, %139 : vector<1x8xf32>
    %cst_80 = arith.constant dense<0.000000e+00> : vector<1x8xf32>
    %141 = tpu.matmul %136, %137, %cst_80 {dimension_numbers = #tpu.dot_dimension_numbers<[1], [0], [0], [1], [0, 0, 1, 1], [], []>} : vector<1x256xf32>, vector<256x8xf32>, vector<1x8xf32> -> vector<1x8xf32>
    %cst_81 = arith.constant 4.8828125E-4 : f32
    %142 = vector.broadcast %cst_81 : f32 to vector<1x8xf32>
    %143 = arith.mulf %141, %142 : vector<1x8xf32>
    %144 = arith.mulf %140, %140 : vector<1x8xf32>
    %145 = arith.subf %143, %144 : vector<1x8xf32>
    %cst_82 = arith.constant 9.99999974E-6 : f32
    %146 = vector.broadcast %cst_82 : f32 to vector<1x8xf32>
    %147 = arith.addf %145, %146 : vector<1x8xf32>
    %148 = math.rsqrt %147 : vector<1x8xf32>
    %c0_83 = arith.constant 0 : index
    %c0_84 = arith.constant 0 : index
    %149 = vector.load %arg15[%c0_83, %c0_84] : memref<8x256xf32, #tpu.memory_space<vmem>>, vector<8x256xf32>
    %cst_85 = arith.constant dense<0.000000e+00> : vector<1x256xf32>
    %150 = tpu.matmul %148, %149, %cst_85 {dimension_numbers = #tpu.dot_dimension_numbers<[1], [0], [0], [1], [0, 0, 1, 1], [], []>} : vector<1x8xf32>, vector<8x256xf32>, vector<1x256xf32> -> vector<1x256xf32>
    %151 = arith.mulf %140, %148 : vector<1x8xf32>
    %cst_86 = arith.constant dense<0.000000e+00> : vector<1x256xf32>
    %152 = tpu.matmul %151, %149, %cst_86 {dimension_numbers = #tpu.dot_dimension_numbers<[1], [0], [0], [1], [0, 0, 1, 1], [], []>} : vector<1x8xf32>, vector<8x256xf32>, vector<1x256xf32> -> vector<1x256xf32>
    %153 = vector.broadcast %150 : vector<1x256xf32> to vector<64x256xf32>
    %154 = arith.mulf %131, %153 : vector<64x256xf32>
    %155 = vector.broadcast %152 : vector<1x256xf32> to vector<64x256xf32>
    %156 = arith.subf %154, %155 : vector<64x256xf32>
    %cst_87 = arith.constant 0.000000e+00 : f32
    %157 = vector.broadcast %cst_87 : f32 to vector<64x256xf32>
    %158 = arith.maximumf %156, %157 : vector<64x256xf32>
    %159 = arith.truncf %158 : vector<64x256xf32> to vector<64x256xbf16>
    %c0_88 = arith.constant 0 : index
    %c0_89 = arith.constant 0 : index
    %160 = vector.load %arg16[%c0_88, %c0_89] : memref<256x1024xbf16, #tpu.memory_space<vmem>>, vector<256x1024xbf16>
    %cst_90 = arith.constant dense<0.000000e+00> : vector<64x1024xf32>
    %161 = tpu.matmul %159, %160, %cst_90 {dimension_numbers = #tpu.dot_dimension_numbers<[1], [0], [0], [1], [0, 0, 1, 1], [], []>} : vector<64x256xbf16>, vector<256x1024xbf16>, vector<64x1024xf32> -> vector<64x1024xf32>
    %162 = vector.extract_strided_slice %161 {offsets = [0, 0], sizes = [64, 256], strides = [1, 1]} : vector<64x1024xf32> to vector<64x256xf32>
    %163 = vector.extract_strided_slice %161 {offsets = [0, 256], sizes = [64, 256], strides = [1, 1]} : vector<64x1024xf32> to vector<64x256xf32>
    %164 = vector.extract_strided_slice %161 {offsets = [0, 512], sizes = [64, 256], strides = [1, 1]} : vector<64x1024xf32> to vector<64x256xf32>
    %165 = vector.extract_strided_slice %161 {offsets = [0, 768], sizes = [64, 256], strides = [1, 1]} : vector<64x1024xf32> to vector<64x256xf32>
    %c0_91 = arith.constant 0 : index
    %c0_92 = arith.constant 0 : index
    %166 = vector.load %arg17[%c0_91, %c0_92] : memref<64x64xf32, #tpu.memory_space<vmem>>, vector<64x64xf32>
    %cst_93 = arith.constant dense<0.000000e+00> : vector<64x256xf32>
    %167 = tpu.matmul %166, %162, %cst_93 {dimension_numbers = #tpu.dot_dimension_numbers<[1], [0], [0], [1], [0, 0, 1, 1], [], []>} : vector<64x64xf32>, vector<64x256xf32>, vector<64x256xf32> -> vector<64x256xf32>
    %168 = arith.addf %163, %167 : vector<64x256xf32>
    %c0_94 = arith.constant 0 : index
    %c0_95 = arith.constant 0 : index
    %169 = vector.load %arg18[%c0_94, %c0_95] : memref<64x64xf32, #tpu.memory_space<vmem>>, vector<64x64xf32>
    %cst_96 = arith.constant dense<0.000000e+00> : vector<64x256xf32>
    %170 = tpu.matmul %169, %165, %cst_96 {dimension_numbers = #tpu.dot_dimension_numbers<[1], [0], [0], [1], [0, 0, 1, 1], [], []>} : vector<64x64xf32>, vector<64x256xf32>, vector<64x256xf32> -> vector<64x256xf32>
    %171 = arith.addf %164, %170 : vector<64x256xf32>
    %172 = math.tanh %168 : vector<64x256xf32>
    %173 = math.tanh %171 : vector<64x256xf32>
    %174 = arith.addf %172, %173 : vector<64x256xf32>
    %c0_97 = arith.constant 0 : index
    %c0_98 = arith.constant 0 : index
    %175 = vector.load %arg19[%c0_97, %c0_98] : memref<256x128xf32, #tpu.memory_space<vmem>>, vector<256x128xf32>
    %cst_99 = arith.constant dense<0.000000e+00> : vector<64x128xf32>
    %176 = tpu.matmul %174, %175, %cst_99 {dimension_numbers = #tpu.dot_dimension_numbers<[1], [0], [0], [1], [0, 0, 1, 1], [], []>} : vector<64x256xf32>, vector<256x128xf32>, vector<64x128xf32> -> vector<64x128xf32>
    %c0_100 = arith.constant 0 : index
    %c0_101 = arith.constant 0 : index
    %177 = vector.load %arg20[%c0_100, %c0_101] : memref<64x128xf32, #tpu.memory_space<vmem>>, vector<64x128xf32>
    tpu.vector_store %arg20[%c0_100, %c0_101], %176 {strides = array<i32>} : memref<64x128xf32, #tpu.memory_space<vmem>>, vector<64x128xf32>,
    return
  }
}

</mosaic_0001>

<bundles_post_ra>
// kernel: generator_pallas.1
= control target key start
LH: loop header
LB: loop body
LE: loop exit
PB: predicated region body
PF: predicated region fallthrough
CT: control target
= control target key end

     0   :  { %s10491_s0 = inlined_call_operand.vmem [shape: f32[2,16], index: 0, kind: input, shape index: {}]   ;;  %s10492_s1 = inlined_call_operand.hbm [shape: bf16[16,1024], index: 1, kind: input, shape index: {}]   ;;  %s10493_s2 = inlined_call_operand.vmem [shape: f32[256,64], index: 2, kind: input, shape index: {}]   ;;  %s10494_s3 = inlined_call_operand.hbm [shape: f32[64,256], index: 3, kind: input, shape index: {}]   ;;  %s10495_s4 = inlined_call_operand.vmem [shape: bf16[256,1024], index: 4, kind: input, shape index: {}]   ;;  %s10496_s5 = inlined_call_operand.hbm [shape: f32[16,32], index: 5, kind: input, shape index: {}]   ;;  %s10497_s6 = inlined_call_operand.vmem [shape: f32[256,32], index: 6, kind: input, shape index: {}]   ;;  %s10498_s7 = inlined_call_operand.hbm [shape: f32[32,256], index: 7, kind: input, shape index: {}]   ;;  %s10499_s8 = inlined_call_operand.hbm [shape: bf16[256,1024], index: 8, kind: input, shape index: {}]   ;;  %s10500_s9 = inlined_call_operand.hbm [shape: f32[32,64], index: 9, kind: input, shape index: {}]   ;;  %s10501_s10 = inlined_call_operand.vmem [shape: f32[256,16], index: 10, kind: input, shape index: {}]   ;;  %s10502_s11 = inlined_call_operand.hbm [shape: f32[16,256], index: 11, kind: input, shape index: {}]   ;;  %s10503_s12 = inlined_call_operand.hbm [shape: bf16[256,1024], index: 12, kind: input, shape index: {}]   ;;  %s10504_s13 = inlined_call_operand.hbm [shape: f32[64,128], index: 13, kind: input, shape index: {}]   ;;  %s10505_s14 = inlined_call_operand.vmem [shape: f32[256,8], index: 14, kind: input, shape index: {}]   ;;  %s10506_s15 = inlined_call_operand.vmem [shape: f32[8,256], index: 15, kind: input, shape index: {}]   ;;  %s10507_s16 = inlined_call_operand.hbm [shape: bf16[256,1024], index: 16, kind: input, shape index: {}]   ;;  %s10508_s17 = inlined_call_operand.hbm [shape: f32[64,64], index: 17, kind: input, shape index: {}]   ;;  %s10509_s18 = inlined_call_operand.hbm [shape: f32[64,64], index: 18, kind: input, shape index: {}]   ;;  %s10510_s19 = inlined_call_operand.vmem [shape: f32[256,128], index: 19, kind: input, shape index: {}]   ;;  %s10511_s20 = inlined_call_operand.vmem [shape: f32[64,128], index: 20, kind: output, shape index: {}]  }
   0x1   :  { %10519 = sst [smem:[#allocation29_spill]] %s10491_s0 }
   0x2   :  { %10520 = sst [smem:[#allocation30_spill]] %s10492_s1 }
   0x3   :  { %10521 = sst [smem:[#allocation31_spill]] %s10493_s2 }
   0x4   :  { %10522 = sst [smem:[#allocation32_spill]] %s10494_s3 }
   0x5   :  { %10523 = sst [smem:[#allocation33_spill]] %s10495_s4 }
   0x6   :  { %10524 = sst [smem:[#allocation34_spill]] %s10511_s20 }
   0x7   :  { %25 = vsyncpa [#allocation4], 0 }
   0x8   :  { %26 = vsyncpa [#allocation6], 0 }
   0x9   :  { %27 = vsyncpa [#allocation9], 0 }
   0xa   :  { %28 = vsyncpa [#allocation12], 0 }
   0xb   :  { %29 = vsyncpa [#allocation15], 0 }
   0xc   :  { %30 = vsyncpa [#allocation18], 0 }
   0xd   :  { %31 = vsyncpa [#allocation21], 0  ;;  %s8707_s1 = smov [#allocation5]   ;;  %s10525_s2 = sld [smem:[#allocation32_spill]] }
   0xe   :  { %s53_s22 = sshll.u32 %s8707_s1, 4  ;;  %s54_s22 = int_to_ptr.vmem [resolvable:$true] %s53_s22 }
  0x13   :  { %s8429_s25 = scalar_lea.hbm %s10525_s2, 2048 }
  0x14   :  { %p8430_p0 = scmp.ne.s32.totalorder %s10525_s2, %s8429_s25  ;;  %p8433_p1 = scmp.lt.u32.totalorder %s8429_s25, %s10525_s2 }
  0x16   :  { %p8435_p2 = pnand %p8433_p1, %p8430_p0 }
  0x18   :  { %8438 = shalt.err (!%p8435_p2)
}
  0x19   :  { %s8439_s4 = scalar_lea.vmem %s54_s22, 2048  ;;  %p8444_p4 = scmp.lt.s32.totalorder %s54_s22, %s54_s22 }
  0x1a   :  { %p8440_p3 = scmp.ne.s32.totalorder %s54_s22, %s8439_s4  ;;  %p8445_p5 = scmp.lt.s32.totalorder %s8439_s4, %s8439_s4 }
  0x1c   :  { %p8446_p6 = por %p8445_p5, %p8444_p4 }
  0x1e   :  { %p8447_p7 = pnand %p8446_p6, %p8440_p3 }
  0x20   :  { %8450 = shalt.err (!%p8447_p7)
}
  0x21   :  { %s10517_s29 = smov 256   ;;  %s10518_s30 = smov 16  }
  0x22   :  { %59 = dma.hbm_to_vmem [thread:$0]  %s10525_s2, 2048, %s54_s22, [#allocation6], %s10517_s29, %s10517_s29, %s10518_s30  }
  0x23   :  { %s8710_s1 = smov [#allocation8]   ;;  %s8451_s3 = scalar_lea.hbm %s10498_s7, 1024 }
  0x24   :  { %s81_s23 = sshll.u32 %s8710_s1, 4  ;;  %p8452_p8 = scmp.ne.s32.totalorder %s10498_s7, %s8451_s3  ;;  %s82_s23 = int_to_ptr.vmem [resolvable:$true] %s81_s23 }
  0x25   :  { %p8455_p9 = scmp.lt.u32.totalorder %s8451_s3, %s10498_s7 }
  0x27   :  { %p8457_p10 = pnand %p8455_p9, %p8452_p8 }
  0x29   :  { %8460 = shalt.err (!%p8457_p10)
}
  0x2a   :  { %s8461_s20 = scalar_lea.vmem %s82_s23, 1024  ;;  %p8466_p12 = scmp.lt.s32.totalorder %s82_s23, %s82_s23 }
  0x2b   :  { %p8462_p11 = scmp.ne.s32.totalorder %s82_s23, %s8461_s20  ;;  %p8467_p13 = scmp.lt.s32.totalorder %s8461_s20, %s8461_s20 }
  0x2d   :  { %p8468_p0 = por %p8467_p13, %p8466_p12 }
  0x2f   :  { %p8469_p1 = pnand %p8468_p0, %p8462_p11 }
  0x31   :  { %8472 = shalt.err (!%p8469_p1)
}
  0x32   :  { %87 = dma.hbm_to_vmem [thread:$0]  %s10498_s7, 1024, %s82_s23, [#allocation9], %s10517_s29, %s10517_s29, %s10518_s30  }
  0x33   :  { %s8711_s0 = smov [#allocation11]   ;;  %s8473_s25 = scalar_lea.hbm %s10500_s9, 512 }
  0x34   :  { %s105_s21 = sshll.u32 %s8711_s0, 4  ;;  %p8474_p2 = scmp.ne.s32.totalorder %s10500_s9, %s8473_s25  ;;  %s106_s21 = int_to_ptr.vmem [resolvable:$true] %s105_s21 }
  0x35   :  { %p8477_p3 = scmp.lt.u32.totalorder %s8473_s25, %s10500_s9 }
  0x37   :  { %p8479_p4 = pnand %p8477_p3, %p8474_p2 }
  0x39   :  { %8482 = shalt.err (!%p8479_p4)
}
  0x3a   :  { %s8483_s28 = scalar_lea.vmem %s106_s21, 512  ;;  %p8488_p6 = scmp.lt.s32.totalorder %s106_s21, %s106_s21 }
  0x3b   :  { %p8484_p5 = scmp.ne.s32.totalorder %s106_s21, %s8483_s28  ;;  %p8489_p7 = scmp.lt.s32.totalorder %s8483_s28, %s8483_s28 }
  0x3d   :  { %p8490_p8 = por %p8489_p7, %p8488_p6 }
  0x3f   :  { %p8491_p9 = pnand %p8490_p8, %p8484_p5 }
  0x41   :  { %8494 = shalt.err (!%p8491_p9)
}
  0x42   :  { %s8712_s7 = smov 128   ;;  %s8713_s23 = smov 8  }
  0x43   :  { %111 = dma.hbm_to_vmem [thread:$0]  %s10500_s9, 512, %s106_s21, [#allocation12], %s8712_s7, %s8712_s7, %s8713_s23  }
  0x44   :  { %s8714_s2 = smov [#allocation14]   ;;  %s8715_s1 = smov [#allocation17]  }
  0x45   :  { %s131_s0 = sshll.u32 %s8714_s2, 4  ;;  %s159_s24 = sshll.u32 %s8715_s1, 4  ;;  %s132_s0 = int_to_ptr.vmem [resolvable:$true] %s131_s0  ;;  %s160_s24 = int_to_ptr.vmem [resolvable:$true] %s159_s24 }
  0x46   :  { %s8495_s26 = scalar_lea.hbm %s10503_s12, 16384 }
  0x47   :  { %p8496_p10 = scmp.ne.s32.totalorder %s10503_s12, %s8495_s26  ;;  %p8499_p11 = scmp.lt.u32.totalorder %s8495_s26, %s10503_s12 }
  0x49   :  { %p8501_p12 = pnand %p8499_p11, %p8496_p10 }
  0x4b   :  { %8504 = shalt.err (!%p8501_p12)
}
  0x4c   :  { %s8505_s9 = scalar_lea.vmem %s132_s0, 16384  ;;  %p8510_p0 = scmp.lt.s32.totalorder %s132_s0, %s132_s0 }
  0x4d   :  { %p8506_p13 = scmp.ne.s32.totalorder %s132_s0, %s8505_s9  ;;  %p8511_p1 = scmp.lt.s32.totalorder %s8505_s9, %s8505_s9 }
  0x4f   :  { %p8512_p2 = por %p8511_p1, %p8510_p0 }
  0x51   :  { %p8513_p3 = pnand %p8512_p2, %p8506_p13 }
  0x53   :  { %8516 = shalt.err (!%p8513_p3)
}
  0x54   :  { %s8716_s21 = smov 512   ;;  %s8717_s4 = smov 32  }
  0x55   :  { %137 = dma.hbm_to_vmem [thread:$0]  %s10503_s12, 16384, %s132_s0, [#allocation15], %s8716_s21, %s8716_s21, %s8717_s4  }
  0x56   :  { %s8517_s25 = scalar_lea.hbm %s10507_s16, 16384 }
  0x57   :  { %p8518_p4 = scmp.ne.s32.totalorder %s10507_s16, %s8517_s25  ;;  %p8521_p5 = scmp.lt.u32.totalorder %s8517_s25, %s10507_s16 }
  0x59   :  { %p8523_p6 = pnand %p8521_p5, %p8518_p4 }
  0x5b   :  { %8526 = shalt.err (!%p8523_p6)
}
  0x5c   :  { %s8527_s28 = scalar_lea.vmem %s160_s24, 16384  ;;  %p8532_p8 = scmp.lt.s32.totalorder %s160_s24, %s160_s24 }
  0x5d   :  { %p8528_p7 = scmp.ne.s32.totalorder %s160_s24, %s8527_s28  ;;  %p8533_p9 = scmp.lt.s32.totalorder %s8527_s28, %s8527_s28 }
  0x5f   :  { %p8534_p10 = por %p8533_p9, %p8532_p8 }
  0x61   :  { %p8535_p11 = pnand %p8534_p10, %p8528_p7 }
  0x63   :  { %8538 = shalt.err (!%p8535_p11)
}
  0x64   :  { %165 = dma.hbm_to_vmem [thread:$0]  %s10507_s16, 16384, %s160_s24, [#allocation18], %s8716_s21, %s8716_s21, %s8717_s4  }
  0x65   :  { %s8718_s9 = smov [#allocation3]   ;;  %s8719_s2 = smov [#allocation7]  }
  0x66   :  { %s39_s22 = sshll.u32 %s8718_s9, 4  ;;  %s67_s29 = sshll.u32 %s8719_s2, 4  ;;  %s40_s22 = int_to_ptr.vmem [resolvable:$true] %s39_s22  ;;  %s68_s29 = int_to_ptr.vmem [resolvable:$true] %s67_s29 }
  0x67   :  { %s10526_s3 = sld [smem:[#allocation30_spill]] }
  0x6d   :  { %s8539_s26 = scalar_lea.hbm %s10526_s3, 1024 }
  0x6e   :  { %p8540_p12 = scmp.ne.s32.totalorder %s10526_s3, %s8539_s26  ;;  %p8543_p13 = scmp.lt.u32.totalorder %s8539_s26, %s10526_s3 }
  0x70   :  { %p8545_p0 = pnand %p8543_p13, %p8540_p12 }
  0x72   :  { %8548 = shalt.err (!%p8545_p0)
}
  0x73   :  { %s8549_s16 = scalar_lea.vmem %s40_s22, 1024  ;;  %p8554_p2 = scmp.lt.s32.totalorder %s40_s22, %s40_s22 }
  0x74   :  { %p8550_p1 = scmp.ne.s32.totalorder %s40_s22, %s8549_s16  ;;  %p8555_p3 = scmp.lt.s32.totalorder %s8549_s16, %s8549_s16 }
  0x76   :  { %p8556_p4 = por %p8555_p3, %p8554_p2 }
  0x78   :  { %p8557_p5 = pnand %p8556_p4, %p8550_p1 }
  0x7a   :  { %8560 = shalt.err (!%p8557_p5)
}
  0x7b   :  { %45 = dma.hbm_to_vmem [thread:$0]  %s10526_s3, 1024, %s40_s22, [#allocation4], %s8716_s21, %s8716_s21, %s8717_s4  }
  0x7c   :  { %s8561_s9 = scalar_lea.hbm %s10496_s5, 256 }
  0x7d   :  { %p8562_p6 = scmp.ne.s32.totalorder %s10496_s5, %s8561_s9  ;;  %p8565_p7 = scmp.lt.u32.totalorder %s8561_s9, %s10496_s5 }
  0x7f   :  { %p8567_p8 = pnand %p8565_p7, %p8562_p6 }
  0x81   :  { %8570 = shalt.err (!%p8567_p8)
}
  0x82   :  { %s8571_s20 = scalar_lea.vmem %s68_s29, 256  ;;  %p8576_p10 = scmp.lt.s32.totalorder %s68_s29, %s68_s29 }
  0x83   :  { %p8572_p9 = scmp.ne.s32.totalorder %s68_s29, %s8571_s20  ;;  %p8577_p11 = scmp.lt.s32.totalorder %s8571_s20, %s8571_s20 }
  0x85   :  { %p8578_p12 = por %p8577_p11, %p8576_p10 }
  0x87   :  { %p8579_p13 = pnand %p8578_p12, %p8572_p9 }
  0x89   :  { %8582 = shalt.err (!%p8579_p13)
}
  0x8a   :  { %73 = dma.hbm_to_vmem [thread:$0]  %s10496_s5, 256, %s68_s29, [#allocation6], %s8712_s7, %s8712_s7, %s8713_s23  }
  0x8b   :  { %s8720_s27 = smov [#allocation10]   ;;  %s8721_s16 = smov [#allocation13]  }
  0x8c   :  { %s93_s28 = sshll.u32 %s8720_s27, 4  ;;  %s119_s24 = sshll.u32 %s8721_s16, 4  ;;  %s94_s28 = int_to_ptr.vmem [resolvable:$true] %s93_s28  ;;  %s120_s24 = int_to_ptr.vmem [resolvable:$true] %s119_s24 }
  0x8d   :  { %s8583_s30 = scalar_lea.hbm %s10499_s8, 16384 }
  0x8e   :  { %p8584_p0 = scmp.ne.s32.totalorder %s10499_s8, %s8583_s30  ;;  %p8587_p1 = scmp.lt.u32.totalorder %s8583_s30, %s10499_s8 }
  0x90   :  { %p8589_p2 = pnand %p8587_p1, %p8584_p0 }
  0x92   :  { %8592 = shalt.err (!%p8589_p2)
}
  0x93   :  { %s8593_s5 = scalar_lea.vmem %s94_s28, 16384  ;;  %p8598_p4 = scmp.lt.s32.totalorder %s94_s28, %s94_s28 }
  0x94   :  { %p8594_p3 = scmp.ne.s32.totalorder %s94_s28, %s8593_s5  ;;  %p8599_p5 = scmp.lt.s32.totalorder %s8593_s5, %s8593_s5 }
  0x96   :  { %p8600_p6 = por %p8599_p5, %p8598_p4 }
  0x98   :  { %p8601_p7 = pnand %p8600_p6, %p8594_p3 }
  0x9a   :  { %8604 = shalt.err (!%p8601_p7)
}
  0x9b   :  { %99 = dma.hbm_to_vmem [thread:$0]  %s10499_s8, 16384, %s94_s28, [#allocation9], %s8716_s21, %s8716_s21, %s8717_s4  }
  0x9c   :  { %s8605_s3 = scalar_lea.hbm %s10502_s11, 512 }
  0x9d   :  { %p8606_p8 = scmp.ne.s32.totalorder %s10502_s11, %s8605_s3  ;;  %p8609_p9 = scmp.lt.u32.totalorder %s8605_s3, %s10502_s11 }
  0x9f   :  { %p8611_p10 = pnand %p8609_p9, %p8606_p8 }
  0xa1   :  { %8614 = shalt.err (!%p8611_p10)
}
  0xa2   :  { %s8615_s30 = scalar_lea.vmem %s120_s24, 512  ;;  %p8620_p12 = scmp.lt.s32.totalorder %s120_s24, %s120_s24 }
  0xa3   :  { %p8616_p11 = scmp.ne.s32.totalorder %s120_s24, %s8615_s30  ;;  %p8621_p13 = scmp.lt.s32.totalorder %s8615_s30, %s8615_s30 }
  0xa5   :  { %p8622_p0 = por %p8621_p13, %p8620_p12 }
  0xa7   :  { %p8623_p1 = pnand %p8622_p0, %p8616_p11 }
  0xa9   :  { %8626 = shalt.err (!%p8623_p1)
}
  0xaa   :  { %s10527_s8 = smov 16   ;;  %s10528_s21 = smov 256  }
  0xab   :  { %125 = dma.hbm_to_vmem [thread:$0]  %s10502_s11, 512, %s120_s24, [#allocation12], %s10528_s21, %s10528_s21, %s10527_s8  }
  0xac   :  { %s8722_s9 = smov [#allocation16]   ;;  %s8723_s1 = smov [#allocation19]  }
  0xad   :  { %s143_s2 = sshll.u32 %s8722_s9, 4  ;;  %s171_s25 = sshll.u32 %s8723_s1, 4  ;;  %s144_s2 = int_to_ptr.vmem [resolvable:$true] %s143_s2  ;;  %s172_s25 = int_to_ptr.vmem [resolvable:$true] %s171_s25 }
  0xae   :  { %s8627_s26 = scalar_lea.hbm %s10504_s13, 1024 }
  0xaf   :  { %p8628_p2 = scmp.ne.s32.totalorder %s10504_s13, %s8627_s26  ;;  %p8631_p3 = scmp.lt.u32.totalorder %s8627_s26, %s10504_s13 }
  0xb1   :  { %p8633_p4 = pnand %p8631_p3, %p8628_p2 }
  0xb3   :  { %8636 = shalt.err (!%p8633_p4)
}
  0xb4   :  { %s8637_s11 = scalar_lea.vmem %s144_s2, 1024  ;;  %p8642_p6 = scmp.lt.s32.totalorder %s144_s2, %s144_s2 }
  0xb5   :  { %p8638_p5 = scmp.ne.s32.totalorder %s144_s2, %s8637_s11  ;;  %p8643_p7 = scmp.lt.s32.totalorder %s8637_s11, %s8637_s11 }
  0xb7   :  { %p8644_p8 = por %p8643_p7, %p8642_p6 }
  0xb9   :  { %p8645_p9 = pnand %p8644_p8, %p8638_p5 }
  0xbb   :  { %8648 = shalt.err (!%p8645_p9)
}
  0xbc   :  { %149 = dma.hbm_to_vmem [thread:$0]  %s10504_s13, 1024, %s144_s2, [#allocation15], %s8712_s7, %s8712_s7, %s8713_s23  }
  0xbd   :  { %s8649_s30 = scalar_lea.hbm %s10508_s17, 1024 }
  0xbe   :  { %p8650_p10 = scmp.ne.s32.totalorder %s10508_s17, %s8649_s30  ;;  %p8653_p11 = scmp.lt.u32.totalorder %s8649_s30, %s10508_s17 }
  0xc0   :  { %p8655_p12 = pnand %p8653_p11, %p8650_p10 }
  0xc2   :  { %8658 = shalt.err (!%p8655_p12)
}
  0xc3   :  { %s8659_s9 = scalar_lea.vmem %s172_s25, 1024  ;;  %p8664_p0 = scmp.lt.s32.totalorder %s172_s25, %s172_s25 }
  0xc4   :  { %p8660_p13 = scmp.ne.s32.totalorder %s172_s25, %s8659_s9  ;;  %p8665_p1 = scmp.lt.s32.totalorder %s8659_s9, %s8659_s9 }
  0xc6   :  { %p8666_p2 = por %p8665_p1, %p8664_p0 }
  0xc8   :  { %p8667_p3 = pnand %p8666_p2, %p8660_p13 }
  0xca   :  { %8670 = shalt.err (!%p8667_p3)
}
  0xcb   :  { %177 = dma.hbm_to_vmem [thread:$0]  %s10508_s17, 1024, %s172_s25, [#allocation18], %s8712_s7, %s8712_s7, %s8713_s23  }
  0xcc   :  { %s8724_s1 = smov [#allocation20]   ;;  %s8671_s20 = scalar_lea.hbm %s10509_s18, 1024 }
  0xcd   :  { %s183_s5 = sshll.u32 %s8724_s1, 4  ;;  %p8672_p4 = scmp.ne.s32.totalorder %s10509_s18, %s8671_s20  ;;  %s184_s5 = int_to_ptr.vmem [resolvable:$true] %s183_s5 }
  0xce   :  { %p8675_p5 = scmp.lt.u32.totalorder %s8671_s20, %s10509_s18 }
  0xd0   :  { %p8677_p6 = pnand %p8675_p5, %p8672_p4 }
  0xd2   :  { %8680 = shalt.err (!%p8677_p6)
}
  0xd3   :  { %s8681_s24 = scalar_lea.vmem %s184_s5, 1024  ;;  %p8686_p8 = scmp.lt.s32.totalorder %s184_s5, %s184_s5 }
  0xd4   :  { %p8682_p7 = scmp.ne.s32.totalorder %s184_s5, %s8681_s24  ;;  %p8687_p9 = scmp.lt.s32.totalorder %s8681_s24, %s8681_s24 }
  0xd6   :  { %p8688_p10 = por %p8687_p9, %p8686_p8 }
  0xd8   :  { %p8689_p11 = pnand %p8688_p10, %p8682_p7 }
  0xda   :  { %8692 = shalt.err (!%p8689_p11)
}
  0xdb   :  { %189 = dma.hbm_to_vmem [thread:$0]  %s10509_s18, 1024, %s184_s5, [#allocation21], %s8712_s7, %s8712_s7, %s8713_s23  }
  0xdc   :  { %8693 = dma.done.wait [#allocation4], 1024  }
  0xdd   :  { %8694 = vsyncadd [#allocation4], 4294966272 }
  0xde   :  { %8695 = dma.done.wait [#allocation6], 2304  }
  0xdf   :  { %8696 = vsyncadd [#allocation6], 4294964992 }
  0xe0   :  { %8697 = dma.done.wait [#allocation9], 17408  }
  0xe1   :  { %8698 = vsyncadd [#allocation9], 4294949888 }
  0xe2   :  { %8699 = dma.done.wait [#allocation12], 1024  }
  0xe3   :  { %8700 = vsyncadd [#allocation12], 4294966272 }
  0xe4   :  { %8701 = dma.done.wait [#allocation15], 17408  }
  0xe5   :  { %8702 = vsyncadd [#allocation15], 4294949888 }
  0xe6   :  { %8703 = dma.done.wait [#allocation18], 17408  }
  0xe7   :  { %8704 = vsyncadd [#allocation18], 4294949888 }
  0xe8   :  { %8705 = dma.done.wait [#allocation21], 1024  }
  0xe9   :  { %8706 = vsyncadd [#allocation21], 4294966272  ;;  %v8725_v0 = vmov 0   ;;  %v231_v1 = vld [vmem:[#allocation3] sm:$0xff]  ;;  %v232_v3 = vld [vmem:[#allocation3 + $0x8] sm:$0xff]  ;;  %s10529_s23 = sld [smem:[#allocation29_spill]] }
  0xea   :  { %315 = vmatprep.mubr.bf16.mxu0 %v8725_v0  ;;  %356 = vmatprep.mubr.bf16.mxu1 %v8725_v0  ;;  %v235_v2 = vld [vmem:[#allocation3 + $0x20] sm:$0xff]  ;;  %v236_v5 = vld [vmem:[#allocation3 + $0x28] sm:$0xff]  ;;  %v233_v8 = vld [vmem:[#allocation3 + $0x10] sm:$0xff]  ;;  %vm279_vm0 = vcmask 130048   ;;  %s10530_s0 = sld [smem:[#allocation31_spill]]  ;;  %s10533_s22 = sld [smem:[#allocation33_spill]] }
  0xeb   :  { %v7015_v4 = vcombine.high %v231_v1, %v235_v2  ;;  %v7014_v6 = vcombine.low %v231_v1, %v235_v2  ;;  %v7017_v9 = vcombine.high %v232_v3, %v236_v5  ;;  %v7016_v10 = vcombine.low %v232_v3, %v236_v5  ;;  %v237_v11 = vld [vmem:[#allocation3 + $0x30] sm:$0xff]  ;;  %v234_v12 = vld [vmem:[#allocation3 + $0x18] sm:$0xff]  ;;  %s10534_s8 = sld [smem:[#allocation34_spill]] }
  0xec   :  { %v238_v13 = vld [vmem:[#allocation3 + $0x38] sm:$0xff]  ;;  %v7019_v15 = vcombine.high %v233_v8, %v237_v11  ;;  %v7018_v17 = vcombine.low %v233_v8, %v237_v11  ;;  %v8726_v3 = vmov 1966171168   ;;  %v453_v5 = vlaneseq }
  0xed   :  { %283 = vmatprep.subr.bf16.mxu0 %v7015_v4  ;;  %v7021_v16 = vcombine.high %v234_v12, %v238_v13  ;;  %324 = vmatprep.subr.bf16.mxu1 %v7017_v9  ;;  %v7020_v18 = vcombine.low %v234_v12, %v238_v13  ;;  %v451_v4 = vunpack.c.l.s4 %v8726_v3  ;;  %vm804_vm2 = vcmask 523264  }
  0xee   :  { %284 = vmatpush1.bf16.msra.mxu0 %v7014_v6  ;;  %325 = vmatpush1.bf16.msra.mxu1 %v7016_v10  ;;  %vm9119_vm1 = vcmp.lt.s32.totalorder %v453_v5, 256  ;;  %vm1912_vm3 = vcmask 261120   ;;  %vm5206_vm4 = vcmask 64512  }
  0xef   :  { %v229_v7 = vld [vmem:[%s10529_s23] sm:$0x3]  ;;  %365 = vmatprep.subr.bf16.mxu0 %v7019_v15  ;;  %406 = vmatprep.subr.bf16.mxu1 %v7021_v16  ;;  %v452_v6 = vunpack.c.0.s8 %v451_v4 }
  0xf0   :  { %v230_v14 = vpack.c.bf16 %v229_v7, %v229_v7  ;;  %v626_v19 = vld [vmem:[%s10530_s0 + $0x80] sm:$0xff]  ;;  %v627_v20 = vld [vmem:[%s10530_s0 + $0x88] sm:$0xff]  ;;  %v628_v25 = vld [vmem:[%s10530_s0 + $0x90] sm:$0xff]  ;;  %v9116_v7 = vshrl.u32 %v453_v5, 7 }
  0xf1   :  { %v7904_v21 = vpack.c.bf16 %v627_v20, %v626_v19  ;;  %v610_v22 = vld [vmem:[%s10530_s0] sm:$0xff]  ;;  %v611_v23 = vld [vmem:[%s10530_s0 + $0x8] sm:$0xff]  ;;  %v629_v26 = vld [vmem:[%s10530_s0 + $0x98] sm:$0xff] }
  0xf2   :  { %7022 = vmatmul.mubr.msk.bf16.vlgmr.msra.gmra.mrb[0].mxu0 %vm279_vm0, %v230_v14  ;;  %7023 = vmatmul.mubr.msk.bf16.vlgmr.msra.gmra.mrb[0].mxu1 %vm279_vm0, %v230_v14  ;;  %v7906_v24 = vpack.c.bf16 %v611_v23, %v610_v22  ;;  %v7908_v27 = vpack.c.bf16 %v629_v26, %v628_v25  ;;  %v612_v28 = vld [vmem:[%s10530_s0 + $0x10] sm:$0xff]  ;;  %v613_v29 = vld [vmem:[%s10530_s0 + $0x18] sm:$0xff]  ;;  %v630_v31 = vld [vmem:[%s10530_s0 + $0xa0] sm:$0xff]  ;;  %v455_v9 = vsub.s32 %v452_v6, %v9116_v7 }
  0xf3   :  { %366 = vmatpush1.bf16.msra.mxu0 %v7018_v17  ;;  %407 = vmatpush1.bf16.msra.mxu1 %v7020_v18  ;;  %v7910_v30 = vpack.c.bf16 %v613_v29, %v612_v28  ;;  %v631_v32 = vld [vmem:[%s10530_s0 + $0xa8] sm:$0xff]  ;;  %v614_v34 = vld [vmem:[%s10530_s0 + $0x20] sm:$0xff]  ;;  %v632_v37 = vld [vmem:[%s10530_s0 + $0xb0] sm:$0xff] }
  0xf4   :  { %397 = vmatprep.mubr.bf16.mxu0 %v8725_v0  ;;  %438 = vmatprep.mubr.bf16.mxu1 %v8725_v0  ;;  %v7912_v33 = vpack.c.bf16 %v631_v32, %v630_v31  ;;  %v615_v35 = vld [vmem:[%s10530_s0 + $0x28] sm:$0xff]  ;;  %v633_v38 = vld [vmem:[%s10530_s0 + $0xb8] sm:$0xff]  ;;  %v616_v40 = vld [vmem:[%s10530_s0 + $0x30] sm:$0xff] }
  0xf5   :  { %7905 = vmatprep.subr.bf16.mxu0 %v7904_v21  ;;  %7937 = vmatprep.subr.bf16.mxu1 %v7904_v21  ;;  %v7914_v36 = vpack.c.bf16 %v615_v35, %v614_v34  ;;  %v7916_v39 = vpack.c.bf16 %v633_v38, %v632_v37  ;;  %v617_v41 = vld [vmem:[%s10530_s0 + $0x38] sm:$0xff]  ;;  %v634_v43 = vld [vmem:[%s10530_s0 + $0xc0] sm:$0xff]  ;;  %v635_v44 = vld [vmem:[%s10530_s0 + $0xc8] sm:$0xff] }
  0xf6   :  { %v7918_v42 = vpack.c.bf16 %v617_v41, %v616_v40  ;;  %v618_v45 = vld [vmem:[%s10530_s0 + $0x40] sm:$0xff]  ;;  %v7920_v46 = vpack.c.bf16 %v635_v44, %v634_v43  ;;  %v619_v47 = vld [vmem:[%s10530_s0 + $0x48] sm:$0xff]  ;;  %v636_v48 = vld [vmem:[%s10530_s0 + $0xd0] sm:$0xff] }
  0xf7   :  { %v637_v49 = vld [vmem:[%s10530_s0 + $0xd8] sm:$0xff]  ;;  %v7922_v50 = vpack.c.bf16 %v619_v47, %v618_v45  ;;  %v620_v52 = vld [vmem:[%s10530_s0 + $0x50] sm:$0xff]  ;;  %v638_v54 = vld [vmem:[%s10530_s0 + $0xe0] sm:$0xff] }
  0xf8   :  { %v7924_v51 = vpack.c.bf16 %v637_v49, %v636_v48  ;;  %v621_v53 = vld [vmem:[%s10530_s0 + $0x58] sm:$0xff]  ;;  %v639_v55 = vld [vmem:[%s10530_s0 + $0xe8] sm:$0xff]  ;;  %v622_v58 = vld [vmem:[%s10530_s0 + $0x60] sm:$0xff] }
  0xf9   :  { %v7926_v56 = vpack.c.bf16 %v621_v53, %v620_v52  ;;  %v7928_v57 = vpack.c.bf16 %v639_v55, %v638_v54  ;;  %v623_v59 = vld [vmem:[%s10530_s0 + $0x68] sm:$0xff]  ;;  %v640_v60 = vld [vmem:[%s10530_s0 + $0xf0] sm:$0xff]  ;;  %v641_v61 = vld [vmem:[%s10530_s0 + $0xf8] sm:$0xff] }
  0xfa   :  { %7024 = vmatmul.mubr.msk.bf16.vlgmr.msra.gmra.mrb[4].mxu0 %vm279_vm0, %v230_v14  ;;  %7025 = vmatmul.mubr.msk.bf16.vlgmr.msra.gmra.mrb[4].mxu1 %vm279_vm0, %v230_v14  ;;  %v7930_v62 = vpack.c.bf16 %v623_v59, %v622_v58  ;;  %v7932_v63 = vpack.c.bf16 %v641_v61, %v640_v60  ;;  %v624_v0 = vld [vmem:[%s10530_s0 + $0x70] sm:$0xff]  ;;  %v625_v1 = vld [vmem:[%s10530_s0 + $0x78] sm:$0xff] }
  0xfb   :  { %7907 = vmatpush3.bf16.msra.mxu0 %v7906_v24  ;;  %7939 = vmatpush3.bf16.msra.mxu1 %v7906_v24  ;;  %v7934_v2 = vpack.c.bf16 %v625_v1, %v624_v0  ;;  %v792_v20 = vld [vmem:[#allocation5 + $0x20] sm:$0xff] }
  0xfc   :  { %7909 = vmatprep.subr.bf16.mxu0 %v7908_v27  ;;  %7941 = vmatprep.subr.bf16.mxu1 %v7908_v27 }
  0xff   :  { %7911 = vmatpush3.bf16.msra.mxu0 %v7910_v30  ;;  %7943 = vmatpush3.bf16.msra.mxu1 %v7910_v30 }
 0x100   :  { %7913 = vmatprep.subr.bf16.mxu0 %v7912_v33  ;;  %7945 = vmatprep.subr.bf16.mxu1 %v7912_v33 }
 0x103   :  { %7915 = vmatpush3.bf16.msra.mxu0 %v7914_v36  ;;  %7947 = vmatpush3.bf16.msra.mxu1 %v7914_v36 }
 0x104   :  { %7917 = vmatprep.subr.bf16.mxu0 %v7916_v39  ;;  %7949 = vmatprep.subr.bf16.mxu1 %v7916_v39 }
 0x107   :  { %7919 = vmatpush3.bf16.msra.mxu0 %v7918_v42  ;;  %7951 = vmatpush3.bf16.msra.mxu1 %v7918_v42 }
 0x108   :  { %7921 = vmatprep.subr.bf16.mxu0 %v7920_v46  ;;  %7953 = vmatprep.subr.bf16.mxu1 %v7920_v46 }
 0x10b   :  { %7923 = vmatpush3.bf16.msra.mxu0 %v7922_v50  ;;  %7955 = vmatpush3.bf16.msra.mxu1 %v7922_v50 }
 0x10c   :  { %7925 = vmatprep.subr.bf16.mxu0 %v7924_v51  ;;  %7957 = vmatprep.subr.bf16.mxu1 %v7924_v51 }
 0x10f   :  { %7927 = vmatpush3.bf16.msra.mxu0 %v7926_v56  ;;  %7959 = vmatpush3.bf16.msra.mxu1 %v7926_v56 }
 0x110   :  { %7929 = vmatprep.subr.bf16.mxu0 %v7928_v57  ;;  %7961 = vmatprep.subr.bf16.mxu1 %v7928_v57 }
 0x113   :  { %7931 = vmatpush3.bf16.msra.mxu0 %v7930_v62  ;;  %7963 = vmatpush3.bf16.msra.mxu1 %v7930_v62 }
 0x114   :  { %7933 = vmatprep.subr.bf16.mxu0 %v7932_v63  ;;  %7965 = vmatprep.subr.bf16.mxu1 %v7932_v63 }
 0x117   :  { %7935 = vmatpush3.bf16.msra.mxu0 %v7934_v2  ;;  %7967 = vmatpush3.bf16.msra.mxu1 %v7934_v2 }
 0x1c5   :  { %v317_v8 = vpop.f32.mrb[0].mxu0  ;;  %v358_v10 = vpop.f32.mrb[0].mxu1 }
 0x1c6   :  { %v319_v11 = vpop.f32.mrb[1].mxu0  ;;  %v360_v13 = vpop.f32.mrb[1].mxu1 }
 0x1c7   :  { %v449_v12 = vcombine.low %v317_v8, %v319_v11  ;;  %v321_v14 = vpop.f32.mrb[2].mxu0  ;;  %v473_v15 = vcombine.low %v358_v10, %v360_v13  ;;  %v362_v16 = vpop.f32.mrb[2].mxu1  ;;  %v789_v11 = vld [vmem:[#allocation5 + $0x8] sm:$0xff] }
 0x1c8   :  { %v322_v17 = vpop.f32.mrb[3].mxu0  ;;  %v363_v19 = vpop.f32.mrb[3].mxu1  ;;  %v788_v14 = vld [vmem:[#allocation5] sm:$0xff] }
 0x1c9   :  { %v456_v18 = vrot.slane %v449_v12, %v455_v9  ;;  %v480_v21 = vrot.slane %v473_v15, %v455_v9  ;;  %v791_v12 = vld [vmem:[#allocation5 + $0x18] sm:$0xff]  ;;  %v790_v15 = vld [vmem:[#allocation5 + $0x10] sm:$0xff]  ;;  %v793_v17 = vld [vmem:[#allocation5 + $0x28] sm:$0xff] }
 0x1ca   :  { %v7968_v13 = vpack.c.bf16 %v791_v12, %v789_v11  ;;  %v7970_v16 = vpack.c.bf16 %v790_v15, %v788_v14  ;;  %v1007_v14 = vld [vmem:[%s10533_s22 + $0xe8] sm:$0xff] }
 0x1cb   :  { %v463_v22 = vrot.slane %v456_v18, %v455_v9  ;;  %v534_v23 = vcombine.high %v456_v18, %v456_v18  ;;  %v487_v24 = vrot.slane %v480_v21, %v455_v9  ;;  %v546_v25 = vcombine.high %v480_v21, %v480_v21  ;;  %v795_v18 = vld [vmem:[#allocation5 + $0x38] sm:$0xff]  ;;  %v794_v21 = vld [vmem:[#allocation5 + $0x30] sm:$0xff] }
 0x1cc   :  { %7969 = vmatprep.subr.bf16.mxu0 %v7968_v13  ;;  %7985 = vmatprep.subr.bf16.mxu1 %v7968_v13  ;;  %v7972_v19 = vpack.c.bf16 %v795_v18, %v793_v17  ;;  %v1003_v13 = vld [vmem:[%s10533_s22 + $0xc8] sm:$0xff]  ;;  %v1010_v17 = vld [vmem:[%s10533_s22 + $0x100] sm:$0xff] }
 0x1cd   :  { %469 = vst.msk [vmem:[#allocation2] ss:$8 sm:$0x3] %vm9119_vm1, %v463_v22  ;;  %v541_v26 = vrot.slane %v534_v23, %v455_v9  ;;  %v399_v27 = vpop.f32.mrb[4].mxu0  ;;  %v553_v28 = vrot.slane %v546_v25, %v455_v9  ;;  %v440_v29 = vpop.f32.mrb[4].mxu1  ;;  %v7974_v22 = vpack.c.bf16 %v794_v21, %v792_v20  ;;  %v797_v23 = vld [vmem:[#allocation5 + $0x48] sm:$0xff] }
 0x1ce   :  { %490 = vst.msk [vmem:[#allocation2 + $0x1] ss:$8 sm:$0x3] %vm9119_vm1, %v487_v24  ;;  %v401_v30 = vpop.f32.mrb[5].mxu0  ;;  %v442_v32 = vpop.f32.mrb[5].mxu1  ;;  %v799_v24 = vld [vmem:[#allocation5 + $0x58] sm:$0xff] }
 0x1cf   :  { %544 = vst.msk [vmem:[#allocation2 + $0x4] ss:$8 sm:$0x3] %vm9119_vm1, %v541_v26  ;;  %v494_v31 = vcombine.low %v399_v27, %v401_v30  ;;  %v403_v33 = vpop.f32.mrb[6].mxu0  ;;  %v515_v34 = vcombine.low %v440_v29, %v442_v32  ;;  %v444_v35 = vpop.f32.mrb[6].mxu1  ;;  %v796_v25 = vld [vmem:[#allocation5 + $0x40] sm:$0xff]  ;;  %v7976_v26 = vpack.c.bf16 %v799_v24, %v797_v23  ;;  %v7054_v24 = vcombine.low %v1003_v13, %v1007_v14 }
 0x1d0   :  { %556 = vst.msk [vmem:[#allocation2 + $0x5] ss:$8 sm:$0x3] %vm9119_vm1, %v553_v28  ;;  %v404_v36 = vpop.f32.mrb[7].mxu0  ;;  %v445_v38 = vpop.f32.mrb[7].mxu1  ;;  %v798_v27 = vld [vmem:[#allocation5 + $0x50] sm:$0xff] }
 0x1d1   :  { %v501_v37 = vrot.slane %v494_v31, %v455_v9  ;;  %v522_v39 = vrot.slane %v515_v34, %v455_v9  ;;  %v801_v28 = vld [vmem:[#allocation5 + $0x68] sm:$0xff]  ;;  %v803_v29 = vld [vmem:[#allocation5 + $0x78] sm:$0xff]  ;;  %v8727_v30 = vmov 0.0   ;;  %v7978_v31 = vpack.c.bf16 %v798_v27, %v796_v25  ;;  %v800_v33 = vld [vmem:[#allocation5 + $0x60] sm:$0xff] }
 0x1d2   :  { %v7980_v32 = vpack.c.bf16 %v803_v29, %v801_v28  ;;  %v802_v34 = vld [vmem:[#allocation5 + $0x70] sm:$0xff]  ;;  %v979_v38 = vld [vmem:[%s10533_s22 + $0x8] sm:$0xff] }
 0x1d3   :  { %v508_v40 = vrot.slane %v501_v37, %v455_v9  ;;  %v558_v41 = vcombine.high %v501_v37, %v501_v37  ;;  %v529_v42 = vrot.slane %v522_v39, %v455_v9  ;;  %v570_v43 = vcombine.high %v522_v39, %v522_v39  ;;  %v978_v36 = vld [vmem:[%s10533_s22] sm:$0xff]  ;;  %v1011_v21 = vld [vmem:[%s10533_s22 + $0x108] sm:$0xff] }
 0x1d4   :  { %v7982_v35 = vpack.c.bf16 %v802_v34, %v800_v33  ;;  %v982_v37 = vld [vmem:[%s10533_s22 + $0x20] sm:$0xff]  ;;  %v1019_v29 = vld [vmem:[%s10533_s22 + $0x148] sm:$0xff] }
 0x1d5   :  { %511 = vst.msk [vmem:[#allocation2 + $0x2] ss:$8 sm:$0x3] %vm9119_vm1, %v508_v40  ;;  %v565_v44 = vrot.slane %v558_v41, %v455_v9  ;;  %532 = vst.msk [vmem:[#allocation2 + $0x3] ss:$8 sm:$0x3] %vm9119_vm1, %v529_v42  ;;  %v577_v45 = vrot.slane %v570_v43, %v455_v9  ;;  %v7028_v39 = vcombine.low %v978_v36, %v982_v37 }
 0x1d6   :  { %v7029_v40 = vcombine.high %v978_v36, %v982_v37  ;;  %v983_v41 = vld [vmem:[%s10533_s22 + $0x28] sm:$0xff]  ;;  %v1014_v18 = vld [vmem:[%s10533_s22 + $0x120] sm:$0xff] }
 0x1d7   :  { %568 = vst.msk [vmem:[#allocation2 + $0x6] ss:$8 sm:$0x3] %vm9119_vm1, %v565_v44  ;;  %580 = vst.msk [vmem:[#allocation2 + $0x7] ss:$8 sm:$0x3] %vm9119_vm1, %v577_v45  ;;  %v7030_v42 = vcombine.low %v979_v38, %v983_v41  ;;  %v7031_v43 = vcombine.high %v979_v38, %v983_v41  ;;  %v7061_v23 = vcombine.high %v1010_v17, %v1014_v18 }
 0x1d8   :  { %v1018_v25 = vld [vmem:[%s10533_s22 + $0x140] sm:$0xff]  ;;  %v7060_v28 = vcombine.low %v1010_v17, %v1014_v18  ;;  %v1027_v38 = vld [vmem:[%s10533_s22 + $0x188] sm:$0xff] }
 0x1d9   :  { %v1026_v34 = vld [vmem:[%s10533_s22 + $0x180] sm:$0xff]  ;;  %v1067_v17 = vld [vmem:[%s10533_s22 + $0x2c8] sm:$0xff] }
 0x1da   :  { %v1071_v18 = vld [vmem:[%s10533_s22 + $0x2e8] sm:$0xff] }
 0x1de   :  { %v9139_v46 = vld [vmem:[#allocation2 + $0x8] sm:$0xff]  ;;  %v9141_v47 = vld [vmem:[#allocation2] sm:$0xff] }
 0x1df   :  { %v590_v48 = vrot.slane %v9139_v46, 4  ;;  %v584_v49 = vrot.slane %v9141_v47, 4  ;;  %v597_v50 = vmul.f32 %v9139_v46, %v9139_v46  ;;  %v596_v51 = vmul.f32 %v9141_v47, %v9141_v47 }
 0x1e1   :  { %v591_v52 = vadd.f32 %v590_v48, %v9139_v46  ;;  %v585_v53 = vadd.f32 %v584_v49, %v9141_v47  ;;  %v604_v54 = vrot.slane %v597_v50, 4  ;;  %v598_v55 = vrot.slane %v596_v51, 4 }
 0x1e3   :  { %v592_v56 = vrot.slane %v591_v52, 2  ;;  %v586_v57 = vrot.slane %v585_v53, 2  ;;  %v605_v58 = vadd.f32 %v604_v54, %v597_v50  ;;  %v599_v59 = vadd.f32 %v598_v55, %v596_v51 }
 0x1e5   :  { %v593_v60 = vadd.f32 %v592_v56, %v591_v52  ;;  %v587_v61 = vadd.f32 %v586_v57, %v585_v53  ;;  %v606_v62 = vrot.slane %v605_v58, 2  ;;  %v600_v63 = vrot.slane %v599_v59, 2  ;;  %v986_v57 = vld [vmem:[%s10533_s22 + $0x40] sm:$0xff] }
 0x1e7   :  { %v594_v0 = vrot.slane %v593_v60, 1  ;;  %v588_v1 = vrot.slane %v587_v61, 1  ;;  %v607_v2 = vadd.f32 %v606_v62, %v605_v58  ;;  %v601_v3 = vadd.f32 %v600_v63, %v599_v59  ;;  %v990_v58 = vld [vmem:[%s10533_s22 + $0x60] sm:$0xff]  ;;  %v987_v59 = vld [vmem:[%s10533_s22 + $0x48] sm:$0xff] }
 0x1e8   :  { %v994_v63 = vld [vmem:[%s10533_s22 + $0x80] sm:$0xff] }
 0x1e9   :  { %v595_v4 = vadd.f32 %v594_v0, %v593_v60  ;;  %v589_v5 = vadd.f32 %v588_v1, %v587_v61  ;;  %v608_v6 = vrot.slane %v607_v2, 1  ;;  %v602_v8 = vrot.slane %v601_v3, 1  ;;  %v991_v60 = vld [vmem:[%s10533_s22 + $0x68] sm:$0xff]  ;;  %v998_v0 = vld [vmem:[%s10533_s22 + $0xa0] sm:$0xff] }
 0x1ea   :  { %v7037_v61 = vcombine.high %v986_v57, %v990_v58  ;;  %v7044_v12 = vcombine.low %v994_v63, %v998_v0 }
 0x1eb   :  { %706 = vmatprep.mubr.f32.mxu0 %v595_v4  ;;  %v609_v9 = vadd.f32 %v608_v6, %v607_v2  ;;  %v603_v10 = vadd.f32 %v602_v8, %v601_v3  ;;  %v7039_v2 = vcombine.high %v987_v59, %v991_v60  ;;  %v7036_v3 = vcombine.low %v986_v57, %v990_v58  ;;  %v995_v4 = vld [vmem:[%s10533_s22 + $0x88] sm:$0xff] }
 0x1ec   :  { %707 = vmatmul.mubr.f32.vlgmr.msra.gmra.mrb[8].mxu0 %v589_v5  ;;  %v999_v5 = vld [vmem:[%s10533_s22 + $0xa8] sm:$0xff]  ;;  %v7045_v6 = vcombine.high %v994_v63, %v998_v0  ;;  %v7038_v8 = vcombine.low %v987_v59, %v991_v60  ;;  %v1050_v60 = vld [vmem:[%s10533_s22 + $0x240] sm:$0xff] }
 0x1ed   :  { %777 = vmatprep.mubr.f32.mxu1 %v609_v9  ;;  %7971 = vmatpush1.bf16.msra.mxu0 %v7970_v16  ;;  %v1002_v9 = vld [vmem:[%s10533_s22 + $0xc0] sm:$0xff]  ;;  %v7047_v11 = vcombine.high %v995_v4, %v999_v5  ;;  %v1047_v57 = vld [vmem:[%s10533_s22 + $0x228] sm:$0xff] }
 0x1ee   :  { %778 = vmatmul.mubr.f32.vlgmr.msra.gmra.mrb[8].mxu1 %v603_v10  ;;  %7973 = vmatprep.subr.bf16.mxu0 %v7972_v19  ;;  %v1006_v10 = vld [vmem:[%s10533_s22 + $0xe0] sm:$0xff]  ;;  %v1051_v0 = vld [vmem:[%s10533_s22 + $0x248] sm:$0xff] }
 0x1ef   :  { %7987 = vmatpush1.bf16.msra.mxu1 %v7970_v16  ;;  %872 = vmatprep.mubr.f32.mxu0 %v8727_v30  ;;  %v7053_v15 = vcombine.high %v1002_v9, %v1006_v10  ;;  %v7046_v16 = vcombine.low %v995_v4, %v999_v5  ;;  %v7052_v20 = vcombine.low %v1002_v9, %v1006_v10  ;;  %v1058_v4 = vld [vmem:[%s10533_s22 + $0x280] sm:$0xff]  ;;  %v1059_v9 = vld [vmem:[%s10533_s22 + $0x288] sm:$0xff] }
 0x1f0   :  { %7989 = vmatprep.subr.bf16.mxu1 %v7972_v19  ;;  %947 = vmatprep.mubr.f32.mxu1 %v8727_v30  ;;  %v7055_v19 = vcombine.high %v1003_v13, %v1007_v14  ;;  %v1062_v5 = vld [vmem:[%s10533_s22 + $0x2a0] sm:$0xff]  ;;  %v1063_v10 = vld [vmem:[%s10533_s22 + $0x2a8] sm:$0xff] }
 0x1f1   :  { %7975 = vmatpush1.bf16.msra.mxu0 %v7974_v22  ;;  %v1066_v13 = vld [vmem:[%s10533_s22 + $0x2c0] sm:$0xff] }
 0x1f2   :  { %7977 = vmatprep.subr.bf16.mxu0 %v7976_v26  ;;  %v1070_v14 = vld [vmem:[%s10533_s22 + $0x2e0] sm:$0xff] }
 0x1f3   :  { %7991 = vmatpush1.bf16.msra.mxu1 %v7974_v22  ;;  %v1015_v22 = vld [vmem:[%s10533_s22 + $0x128] sm:$0xff] }
 0x1f4   :  { %7993 = vmatprep.subr.bf16.mxu1 %v7976_v26  ;;  %v1022_v26 = vld [vmem:[%s10533_s22 + $0x160] sm:$0xff]  ;;  %v7063_v27 = vcombine.high %v1011_v21, %v1015_v22  ;;  %v7062_v33 = vcombine.low %v1011_v21, %v1015_v22 }
 0x1f5   :  { %7979 = vmatpush1.bf16.msra.mxu0 %v7978_v31  ;;  %v7068_v37 = vcombine.low %v1018_v25, %v1022_v26  ;;  %v1074_v21 = vld [vmem:[%s10533_s22 + $0x300] sm:$0xff] }
 0x1f6   :  { %7981 = vmatprep.subr.bf16.mxu0 %v7980_v32  ;;  %v1078_v22 = vld [vmem:[%s10533_s22 + $0x320] sm:$0xff] }
 0x1f7   :  { %7995 = vmatpush1.bf16.msra.mxu1 %v7978_v31  ;;  %v1023_v31 = vld [vmem:[%s10533_s22 + $0x168] sm:$0xff] }
 0x1f8   :  { %7997 = vmatprep.subr.bf16.mxu1 %v7980_v32  ;;  %v7069_v32 = vcombine.high %v1018_v25, %v1022_v26  ;;  %v7071_v36 = vcombine.high %v1019_v29, %v1023_v31  ;;  %v7070_v41 = vcombine.low %v1019_v29, %v1023_v31  ;;  %v1075_v25 = vld [vmem:[%s10533_s22 + $0x308] sm:$0xff]  ;;  %v7124_v31 = vcombine.low %v1074_v21, %v1078_v22 }
 0x1f9   :  { %7983 = vmatpush1.bf16.msra.mxu0 %v7982_v35  ;;  %v1079_v26 = vld [vmem:[%s10533_s22 + $0x328] sm:$0xff] }
 0x1fa   :  { %1746 = vmatprep.subr.bf16.mxu0 %v7029_v40  ;;  %v7127_v29 = vcombine.high %v1075_v25, %v1079_v26 }
 0x1fb   :  { %7999 = vmatpush1.bf16.msra.mxu1 %v7982_v35  ;;  %v1030_v35 = vld [vmem:[%s10533_s22 + $0x1a0] sm:$0xff] }
 0x1fc   :  { %1787 = vmatprep.subr.bf16.mxu1 %v7031_v43  ;;  %v7077_v40 = vcombine.high %v1026_v34, %v1030_v35  ;;  %v1038_v43 = vld [vmem:[%s10533_s22 + $0x1e0] sm:$0xff] }
 0x2bf   :  { %v7600_v44 = vpop.f32.mrb[8].mxu0 }
 0x2c0   :  { %v7601_v45 = vpop.f32.mrb[9].mxu0 }
 0x2c1   :  { %v7602_v48 = vadd.f32 %v7601_v45, %v7600_v44  ;;  %v7635_v49 = vpop.f32.mrb[8].mxu1  ;;  %v7076_v45 = vcombine.low %v1026_v34, %v1030_v35  ;;  %v1086_v34 = vld [vmem:[%s10533_s22 + $0x360] sm:$0xff]  ;;  %v1083_v35 = vld [vmem:[%s10533_s22 + $0x348] sm:$0xff] }
 0x2c2   :  { %v7636_v50 = vpop.f32.mrb[9].mxu1 }
 0x2c3   :  { %v712_v51 = vmul.f32 0.03125, %v7602_v48  ;;  %v7637_v52 = vadd.f32 %v7636_v50, %v7635_v49  ;;  %v1035_v48 = vld [vmem:[%s10533_s22 + $0x1c8] sm:$0xff] }
 0x2c4   :  { %v1039_v49 = vld [vmem:[%s10533_s22 + $0x1e8] sm:$0xff] }
 0x2c5   :  { %v784_v53 = vmul.f32 %v712_v51, %v712_v51  ;;  %v783_v54 = vmul.f32 0.03125, %v7637_v52  ;;  %v1042_v52 = vld [vmem:[%s10533_s22 + $0x200] sm:$0xff]  ;;  %v7086_v59 = vcombine.low %v1035_v48, %v1039_v49 }
 0x2c7   :  { %v785_v55 = vsub.f32 %v783_v54, %v784_v53  ;;  %v1046_v53 = vld [vmem:[%s10533_s22 + $0x220] sm:$0xff]  ;;  %v7087_v54 = vcombine.high %v1035_v48, %v1039_v49 }
 0x2c8   :  { %v7093_v58 = vcombine.high %v1042_v52, %v1046_v53  ;;  %v7092_v63 = vcombine.low %v1042_v52, %v1046_v53  ;;  %v1102_v52 = vld [vmem:[%s10533_s22 + $0x3e0] sm:$0xff]  ;;  %v1099_v53 = vld [vmem:[%s10533_s22 + $0x3c8] sm:$0xff] }
 0x2c9   :  { %v786_v56 = vadd.f32 1e-05, %v785_v55 }
 0x2cb   :  { %8357 = vrsqrt.f32 %v786_v56  ;;  %v1043_v56 = vld [vmem:[%s10533_s22 + $0x208] sm:$0xff] }
 0x2d5   :  { %v8358_v62 = vpop.eup %8357 }
 0x2d6   :  { %7026 = vmatmul.mubr.msk.f32.vlgmr.msra.gmra.mrb[10].mxu0 %vm804_vm2, %v8358_v62  ;;  %v879_v1 = vmul.f32 %v8358_v62, %v712_v51  ;;  %v7095_v62 = vcombine.high %v1043_v56, %v1047_v57 }
 0x2d7   :  { %1747 = vmatpush1.bf16.msra.mxu0 %v7028_v39  ;;  %v1031_v39 = vld [vmem:[%s10533_s22 + $0x1a8] sm:$0xff] }
 0x2d8   :  { %7027 = vmatmul.mubr.msk.f32.vlgmr.msra.gmra.mrb[10].mxu1 %vm804_vm2, %v879_v1  ;;  %1748 = vmatprep.subr.bf16.mxu0 %v7037_v61  ;;  %v7079_v44 = vcombine.high %v1027_v38, %v1031_v39  ;;  %v7078_v51 = vcombine.low %v1027_v38, %v1031_v39  ;;  %v1054_v61 = vld [vmem:[%s10533_s22 + $0x260] sm:$0xff]  ;;  %v1055_v1 = vld [vmem:[%s10533_s22 + $0x268] sm:$0xff] }
 0x2d9   :  { %1788 = vmatpush1.bf16.msra.mxu1 %v7030_v42  ;;  %v1034_v42 = vld [vmem:[%s10533_s22 + $0x1c0] sm:$0xff] }
 0x2da   :  { %1789 = vmatprep.subr.bf16.mxu1 %v7039_v2  ;;  %v7085_v50 = vcombine.high %v1034_v42, %v1038_v43  ;;  %v7084_v55 = vcombine.low %v1034_v42, %v1038_v43  ;;  %v7101_v2 = vcombine.high %v1050_v60, %v1054_v61  ;;  %v1094_v42 = vld [vmem:[%s10533_s22 + $0x3a0] sm:$0xff]  ;;  %v1091_v43 = vld [vmem:[%s10533_s22 + $0x388] sm:$0xff] }
 0x2db   :  { %1749 = vmatpush1.bf16.msra.mxu0 %v7036_v3  ;;  %v7094_v3 = vcombine.low %v1043_v56, %v1047_v57 }
 0x2dc   :  { %1750 = vmatprep.subr.bf16.mxu0 %v7045_v6  ;;  %v7103_v6 = vcombine.high %v1051_v0, %v1055_v1 }
 0x2dd   :  { %1790 = vmatpush1.bf16.msra.mxu1 %v7038_v8  ;;  %v7100_v8 = vcombine.low %v1050_v60, %v1054_v61  ;;  %v984_v60 = vld [vmem:[%s10533_s22 + $0x30] sm:$0xff]  ;;  %v981_v61 = vld [vmem:[%s10533_s22 + $0x18] sm:$0xff] }
 0x2de   :  { %1791 = vmatprep.subr.bf16.mxu1 %v7047_v11  ;;  %v7109_v11 = vcombine.high %v1058_v4, %v1062_v5 }
 0x2df   :  { %1751 = vmatpush1.bf16.msra.mxu0 %v7044_v12  ;;  %v7102_v12 = vcombine.low %v1051_v0, %v1055_v1 }
 0x2e0   :  { %1752 = vmatprep.subr.bf16.mxu0 %v7053_v15  ;;  %v7111_v15 = vcombine.high %v1059_v9, %v1063_v10 }
 0x2e1   :  { %1792 = vmatpush1.bf16.msra.mxu1 %v7046_v16  ;;  %v7108_v16 = vcombine.low %v1058_v4, %v1062_v5 }
 0x2e2   :  { %1793 = vmatprep.subr.bf16.mxu1 %v7055_v19  ;;  %v7117_v19 = vcombine.high %v1066_v13, %v1070_v14 }
 0x2e3   :  { %1753 = vmatpush1.bf16.msra.mxu0 %v7052_v20  ;;  %v7110_v20 = vcombine.low %v1059_v9, %v1063_v10 }
 0x2e4   :  { %1754 = vmatprep.subr.bf16.mxu0 %v7061_v23  ;;  %v7119_v23 = vcombine.high %v1067_v17, %v1071_v18 }
 0x2e5   :  { %1794 = vmatpush1.bf16.msra.mxu1 %v7054_v24  ;;  %v7116_v24 = vcombine.low %v1066_v13, %v1070_v14 }
 0x2e6   :  { %1795 = vmatprep.subr.bf16.mxu1 %v7063_v27  ;;  %v7125_v27 = vcombine.high %v1074_v21, %v1078_v22  ;;  %v996_v22 = vld [vmem:[%s10533_s22 + $0x90] sm:$0xff] }
 0x2e7   :  { %1755 = vmatpush1.bf16.msra.mxu0 %v7060_v28  ;;  %v7118_v28 = vcombine.low %v1067_v17, %v1071_v18  ;;  %v988_v18 = vld [vmem:[%s10533_s22 + $0x50] sm:$0xff] }
 0x2e8   :  { %1756 = vmatprep.subr.bf16.mxu0 %v7069_v32  ;;  %v7126_v32 = vcombine.low %v1075_v25, %v1079_v26  ;;  %v1000_v25 = vld [vmem:[%s10533_s22 + $0xb0] sm:$0xff]  ;;  %v997_v26 = vld [vmem:[%s10533_s22 + $0x98] sm:$0xff] }
 0x2e9   :  { %1796 = vmatpush1.bf16.msra.mxu1 %v7062_v33  ;;  %v1082_v33 = vld [vmem:[%s10533_s22 + $0x340] sm:$0xff] }
 0x2ea   :  { %1797 = vmatprep.subr.bf16.mxu1 %v7071_v36  ;;  %v7133_v36 = vcombine.high %v1082_v33, %v1086_v34  ;;  %v7132_v38 = vcombine.low %v1082_v33, %v1086_v34  ;;  %v1004_v33 = vld [vmem:[%s10533_s22 + $0xd0] sm:$0xff] }
 0x2eb   :  { %1757 = vmatpush1.bf16.msra.mxu0 %v7068_v37  ;;  %v1087_v37 = vld [vmem:[%s10533_s22 + $0x368] sm:$0xff]  ;;  %v1008_v34 = vld [vmem:[%s10533_s22 + $0xf0] sm:$0xff] }
 0x2ec   :  { %1758 = vmatprep.subr.bf16.mxu0 %v7077_v40  ;;  %v7134_v39 = vcombine.low %v1083_v35, %v1087_v37  ;;  %v7135_v40 = vcombine.high %v1083_v35, %v1087_v37  ;;  %v1005_v35 = vld [vmem:[%s10533_s22 + $0xd8] sm:$0xff]  ;;  %v7048_v37 = vcombine.low %v996_v22, %v1000_v25 }
 0x2ed   :  { %1798 = vmatpush1.bf16.msra.mxu1 %v7070_v41  ;;  %v1090_v41 = vld [vmem:[%s10533_s22 + $0x380] sm:$0xff] }
 0x2ee   :  { %1799 = vmatprep.subr.bf16.mxu1 %v7079_v44  ;;  %v7141_v44 = vcombine.high %v1090_v41, %v1094_v42  ;;  %v7140_v48 = vcombine.low %v1090_v41, %v1094_v42  ;;  %v1012_v41 = vld [vmem:[%s10533_s22 + $0x110] sm:$0xff] }
 0x2ef   :  { %1759 = vmatpush1.bf16.msra.mxu0 %v7076_v45  ;;  %v1095_v45 = vld [vmem:[%s10533_s22 + $0x3a8] sm:$0xff]  ;;  %v1016_v42 = vld [vmem:[%s10533_s22 + $0x130] sm:$0xff] }
 0x2f0   :  { %1760 = vmatprep.subr.bf16.mxu0 %v7085_v50  ;;  %v7142_v49 = vcombine.low %v1091_v43, %v1095_v45  ;;  %v7143_v50 = vcombine.high %v1091_v43, %v1095_v45  ;;  %v1013_v43 = vld [vmem:[%s10533_s22 + $0x118] sm:$0xff]  ;;  %v7056_v45 = vcombine.low %v1004_v33, %v1008_v34 }
 0x2f1   :  { %1800 = vmatpush1.bf16.msra.mxu1 %v7078_v51  ;;  %v1098_v51 = vld [vmem:[%s10533_s22 + $0x3c0] sm:$0xff] }
 0x2f2   :  { %1801 = vmatprep.subr.bf16.mxu1 %v7087_v54  ;;  %v7149_v54 = vcombine.high %v1098_v51, %v1102_v52  ;;  %v7148_v56 = vcombine.low %v1098_v51, %v1102_v52  ;;  %v1020_v51 = vld [vmem:[%s10533_s22 + $0x150] sm:$0xff] }
 0x2f3   :  { %1761 = vmatpush1.bf16.msra.mxu0 %v7084_v55  ;;  %v1103_v55 = vld [vmem:[%s10533_s22 + $0x3e8] sm:$0xff]  ;;  %v1024_v52 = vld [vmem:[%s10533_s22 + $0x170] sm:$0xff] }
 0x2f4   :  { %1762 = vmatprep.subr.bf16.mxu0 %v7093_v58  ;;  %v7150_v57 = vcombine.low %v1099_v53, %v1103_v55  ;;  %v7151_v58 = vcombine.high %v1099_v53, %v1103_v55  ;;  %v1021_v53 = vld [vmem:[%s10533_s22 + $0x158] sm:$0xff]  ;;  %v7064_v55 = vcombine.low %v1012_v41, %v1016_v42 }
 0x2f5   :  { %1802 = vmatpush1.bf16.msra.mxu1 %v7086_v59  ;;  %v980_v59 = vld [vmem:[%s10533_s22 + $0x10] sm:$0xff] }
 0x2f6   :  { %1803 = vmatprep.subr.bf16.mxu1 %v7095_v62  ;;  %v7033_v62 = vcombine.high %v980_v59, %v984_v60  ;;  %v7032_v0 = vcombine.low %v980_v59, %v984_v60  ;;  %v1028_v59 = vld [vmem:[%s10533_s22 + $0x190] sm:$0xff] }
 0x2f7   :  { %1763 = vmatpush1.bf16.msra.mxu0 %v7092_v63  ;;  %v985_v63 = vld [vmem:[%s10533_s22 + $0x38] sm:$0xff]  ;;  %v1032_v60 = vld [vmem:[%s10533_s22 + $0x1b0] sm:$0xff] }
 0x2f8   :  { %1764 = vmatprep.subr.bf16.mxu0 %v7101_v2  ;;  %v7034_v1 = vcombine.low %v981_v61, %v985_v63  ;;  %v7035_v2 = vcombine.high %v981_v61, %v985_v63  ;;  %v1029_v61 = vld [vmem:[%s10533_s22 + $0x198] sm:$0xff]  ;;  %v7072_v63 = vcombine.low %v1020_v51, %v1024_v52 }
 0x2f9   :  { %1804 = vmatpush1.bf16.msra.mxu1 %v7094_v3  ;;  %v9360_v3 = vsub.s32 0, %v9116_v7 }
 0x2fa   :  { %1805 = vmatprep.subr.bf16.mxu1 %v7103_v6 }
 0x2fb   :  { %1765 = vmatpush1.bf16.msra.mxu0 %v7100_v8 }
 0x2fc   :  { %1766 = vmatprep.subr.bf16.mxu0 %v7109_v11 }
 0x2fd   :  { %1806 = vmatpush1.bf16.msra.mxu1 %v7102_v12 }
 0x2fe   :  { %1807 = vmatprep.subr.bf16.mxu1 %v7111_v15 }
 0x2ff   :  { %1767 = vmatpush1.bf16.msra.mxu0 %v7108_v16 }
 0x300   :  { %1768 = vmatprep.subr.bf16.mxu0 %v7117_v19  ;;  %v992_v19 = vld [vmem:[%s10533_s22 + $0x70] sm:$0xff] }
 0x301   :  { %1808 = vmatpush1.bf16.msra.mxu1 %v7110_v20 }
 0x302   :  { %1809 = vmatprep.subr.bf16.mxu1 %v7119_v23  ;;  %v7041_v23 = vcombine.high %v988_v18, %v992_v19 }
 0x303   :  { %1769 = vmatpush1.bf16.msra.mxu0 %v7116_v24 }
 0x304   :  { %1770 = vmatprep.subr.bf16.mxu0 %v7125_v27  ;;  %v1001_v27 = vld [vmem:[%s10533_s22 + $0xb8] sm:$0xff] }
 0x305   :  { %1810 = vmatpush1.bf16.msra.mxu1 %v7118_v28  ;;  %v7040_v28 = vcombine.low %v988_v18, %v992_v19 }
 0x306   :  { %1811 = vmatprep.subr.bf16.mxu1 %v7127_v29 }
 0x307   :  { %1771 = vmatpush1.bf16.msra.mxu0 %v7124_v31  ;;  %v7049_v31 = vcombine.high %v996_v22, %v1000_v25  ;;  %v1057_v22 = vld [vmem:[%s10533_s22 + $0x278] sm:$0xff] }
 0x308   :  { %1772 = vmatprep.subr.bf16.mxu0 %v7133_v36  ;;  %v1009_v36 = vld [vmem:[%s10533_s22 + $0xf8] sm:$0xff] }
 0x309   :  { %1812 = vmatpush1.bf16.msra.mxu1 %v7126_v32  ;;  %v7051_v32 = vcombine.high %v997_v26, %v1001_v27 }
 0x30a   :  { %1813 = vmatprep.subr.bf16.mxu1 %v7135_v40  ;;  %v7059_v40 = vcombine.high %v1005_v35, %v1009_v36 }
 0x30b   :  { %1773 = vmatpush1.bf16.msra.mxu0 %v7132_v38  ;;  %v7050_v38 = vcombine.low %v997_v26, %v1001_v27  ;;  %v1060_v27 = vld [vmem:[%s10533_s22 + $0x290] sm:$0xff] }
 0x30c   :  { %1774 = vmatprep.subr.bf16.mxu0 %v7141_v44  ;;  %v1017_v44 = vld [vmem:[%s10533_s22 + $0x138] sm:$0xff] }
 0x30d   :  { %1814 = vmatpush1.bf16.msra.mxu1 %v7134_v39  ;;  %v7057_v39 = vcombine.high %v1004_v33, %v1008_v34 }
 0x30e   :  { %1815 = vmatprep.subr.bf16.mxu1 %v7143_v50  ;;  %v7067_v50 = vcombine.high %v1013_v43, %v1017_v44 }
 0x30f   :  { %1775 = vmatpush1.bf16.msra.mxu0 %v7140_v48  ;;  %v7058_v48 = vcombine.low %v1005_v35, %v1009_v36  ;;  %v1068_v36 = vld [vmem:[%s10533_s22 + $0x2d0] sm:$0xff] }
 0x310   :  { %1776 = vmatprep.subr.bf16.mxu0 %v7149_v54  ;;  %v1025_v54 = vld [vmem:[%s10533_s22 + $0x178] sm:$0xff] }
 0x311   :  { %1816 = vmatpush1.bf16.msra.mxu1 %v7142_v49  ;;  %v7065_v49 = vcombine.high %v1012_v41, %v1016_v42 }
 0x312   :  { %1817 = vmatprep.subr.bf16.mxu1 %v7151_v58  ;;  %v7075_v58 = vcombine.high %v1021_v53, %v1025_v54 }
 0x313   :  { %1777 = vmatpush1.bf16.msra.mxu0 %v7148_v56  ;;  %v7066_v56 = vcombine.low %v1013_v43, %v1017_v44  ;;  %v1076_v44 = vld [vmem:[%s10533_s22 + $0x310] sm:$0xff] }
 0x314   :  { %1828 = vmatprep.subr.bf16.mxu0 %v7033_v62  ;;  %v1033_v62 = vld [vmem:[%s10533_s22 + $0x1b8] sm:$0xff] }
 0x315   :  { %1818 = vmatpush1.bf16.msra.mxu1 %v7150_v57  ;;  %v7073_v57 = vcombine.high %v1020_v51, %v1024_v52 }
 0x316   :  { %1869 = vmatprep.subr.bf16.mxu1 %v7035_v2  ;;  %v7083_v2 = vcombine.high %v1029_v61, %v1033_v62 }
 0x3a9   :  { %v874_v4 = vpop.f32.mrb[10].mxu0 }
 0x3aa   :  { %v957_v5 = vrot.slane %v874_v4, %v9360_v3  ;;  %v876_v6 = vpop.f32.mrb[11].mxu0  ;;  %v1036_v4 = vld [vmem:[%s10533_s22 + $0x1d0] sm:$0xff] }
 0x3ab   :  { %v961_v8 = vrot.slane %v876_v6, %v9360_v3  ;;  %v949_v9 = vpop.f32.mrb[10].mxu1  ;;  %v1037_v6 = vld [vmem:[%s10533_s22 + $0x1d8] sm:$0xff] }
 0x3ac   :  { %v962_v10 = vmul.f32 %v957_v5, %v9141_v47  ;;  %v967_v11 = vrot.slane %v949_v9, %v9360_v3  ;;  %v951_v12 = vpop.f32.mrb[11].mxu1  ;;  %v989_v47 = vld [vmem:[%s10533_s22 + $0x58] sm:$0xff]  ;;  %v1040_v5 = vld [vmem:[%s10533_s22 + $0x1f0] sm:$0xff]  ;;  %v7080_v9 = vcombine.low %v1028_v59, %v1032_v60 }
 0x3ad   :  { %v963_v13 = vmul.f32 %v961_v8, %v9139_v46  ;;  %v971_v14 = vrot.slane %v951_v12, %v9360_v3  ;;  %v993_v46 = vld [vmem:[%s10533_s22 + $0x78] sm:$0xff] }
 0x3ae   :  { %v972_v15 = vsub.f32 %v962_v10, %v967_v11  ;;  %v7043_v24 = vcombine.high %v989_v47, %v993_v46  ;;  %v7042_v29 = vcombine.low %v989_v47, %v993_v46  ;;  %v1041_v8 = vld [vmem:[%s10533_s22 + $0x1f8] sm:$0xff]  ;;  %v7082_v10 = vcombine.low %v1029_v61, %v1033_v62  ;;  %v1052_v47 = vld [vmem:[%s10533_s22 + $0x250] sm:$0xff] }
 0x3af   :  { %v973_v16 = vsub.f32 %v963_v13, %v971_v14  ;;  %v7089_v11 = vcombine.high %v1036_v4, %v1040_v5  ;;  %v7091_v12 = vcombine.high %v1037_v6, %v1041_v8  ;;  %v1044_v13 = vld [vmem:[%s10533_s22 + $0x210] sm:$0xff] }
 0x3b0   :  { %v974_v7 = vmax.f32 %v972_v15, 0.0  ;;  %v1048_v14 = vld [vmem:[%s10533_s22 + $0x230] sm:$0xff]  ;;  %v1045_v15 = vld [vmem:[%s10533_s22 + $0x218] sm:$0xff] }
 0x3b1   :  { %v975_v17 = vmax.f32 %v973_v16, 0.0  ;;  %v1049_v16 = vld [vmem:[%s10533_s22 + $0x238] sm:$0xff]  ;;  %v7097_v18 = vcombine.high %v1044_v13, %v1048_v14  ;;  %v1056_v46 = vld [vmem:[%s10533_s22 + $0x270] sm:$0xff] }
 0x3b2   :  { %v9380_v21 = vpack.c.bf16 %v974_v7, %v974_v7  ;;  %v7088_v7 = vcombine.low %v1036_v4, %v1040_v5  ;;  %v7099_v19 = vcombine.high %v1045_v15, %v1049_v16  ;;  %v7105_v25 = vcombine.high %v1052_v47, %v1056_v46  ;;  %v1092_v62 = vld [vmem:[%s10533_s22 + $0x390] sm:$0xff] }
 0x3b3   :  { %v977_v20 = vpack.c.bf16 %v975_v17, %v975_v17  ;;  %v7090_v17 = vcombine.low %v1037_v6, %v1041_v8  ;;  %v1100_v8 = vld [vmem:[%s10533_s22 + $0x3d0] sm:$0xff] }
 0x3b5   :  { %1778 = vmatprep.mubr.bf16.mxu0 %v977_v20  ;;  %1819 = vmatprep.mubr.bf16.mxu1 %v977_v20 }
 0x3b6   :  { %1779 = vmatmul.mubr.bf16.vlgmr.msra.gmra.mrb[12].mxu0 %v9380_v21  ;;  %1820 = vmatmul.mubr.bf16.vlgmr.msra.gmra.mrb[12].mxu1 %v9380_v21 }
 0x3b7   :  { %1829 = vmatpush1.bf16.msra.mxu0 %v7032_v0  ;;  %1870 = vmatpush1.bf16.msra.mxu1 %v7034_v1  ;;  %v7074_v0 = vcombine.low %v1021_v53, %v1025_v54  ;;  %v7081_v1 = vcombine.high %v1028_v59, %v1032_v60  ;;  %v1084_v54 = vld [vmem:[%s10533_s22 + $0x350] sm:$0xff] }
 0x3b8   :  { %1860 = vmatprep.mubr.bf16.mxu0 %v977_v20  ;;  %1901 = vmatprep.mubr.bf16.mxu1 %v977_v20  ;;  %v1053_v20 = vld [vmem:[%s10533_s22 + $0x258] sm:$0xff] }
 0x3b9   :  { %1830 = vmatprep.subr.bf16.mxu0 %v7041_v23  ;;  %1871 = vmatprep.subr.bf16.mxu1 %v7043_v24  ;;  %v7096_v23 = vcombine.low %v1044_v13, %v1048_v14  ;;  %v7098_v24 = vcombine.low %v1045_v15, %v1049_v16  ;;  %v7107_v26 = vcombine.high %v1053_v20, %v1057_v22 }
 0x3ba   :  { %v7106_v33 = vcombine.low %v1053_v20, %v1057_v22  ;;  %v2047_v20 = vld [vmem:[%s10497_s6 + $0x98] sm:$0xff] }
 0x3bb   :  { %1831 = vmatpush1.bf16.msra.mxu0 %v7040_v28  ;;  %1872 = vmatpush1.bf16.msra.mxu1 %v7042_v29  ;;  %v1064_v28 = vld [vmem:[%s10533_s22 + $0x2b0] sm:$0xff]  ;;  %v1061_v29 = vld [vmem:[%s10533_s22 + $0x298] sm:$0xff] }
 0x3bc   :  { %1832 = vmatprep.subr.bf16.mxu0 %v7049_v31  ;;  %1873 = vmatprep.subr.bf16.mxu1 %v7051_v32  ;;  %v1065_v31 = vld [vmem:[%s10533_s22 + $0x2b8] sm:$0xff]  ;;  %v7104_v32 = vcombine.low %v1052_v47, %v1056_v46  ;;  %v7113_v34 = vcombine.high %v1060_v27, %v1064_v28  ;;  %v2029_v46 = vld [vmem:[%s10497_s6 + $0x8] sm:$0xff] }
 0x3bd   :  { %v7115_v35 = vcombine.high %v1061_v29, %v1065_v31  ;;  %v7114_v41 = vcombine.low %v1061_v29, %v1065_v31  ;;  %v2032_v31 = vld [vmem:[%s10497_s6 + $0x20] sm:$0xff] }
 0x3bf   :  { %1833 = vmatpush1.bf16.msra.mxu0 %v7048_v37  ;;  %1874 = vmatpush1.bf16.msra.mxu1 %v7050_v38  ;;  %v1072_v37 = vld [vmem:[%s10533_s22 + $0x2f0] sm:$0xff]  ;;  %v1069_v38 = vld [vmem:[%s10533_s22 + $0x2d8] sm:$0xff] }
 0x3c0   :  { %1834 = vmatprep.subr.bf16.mxu0 %v7057_v39  ;;  %1875 = vmatprep.subr.bf16.mxu1 %v7059_v40  ;;  %v1073_v39 = vld [vmem:[%s10533_s22 + $0x2f8] sm:$0xff]  ;;  %v7112_v40 = vcombine.low %v1060_v27, %v1064_v28  ;;  %v7121_v42 = vcombine.high %v1068_v36, %v1072_v37  ;;  %v2049_v27 = vld [vmem:[%s10497_s6 + $0xa8] sm:$0xff] }
 0x3c1   :  { %v7123_v43 = vcombine.high %v1069_v38, %v1073_v39  ;;  %v7122_v51 = vcombine.low %v1069_v38, %v1073_v39 }
 0x3c3   :  { %1835 = vmatpush1.bf16.msra.mxu0 %v7056_v45  ;;  %1876 = vmatpush1.bf16.msra.mxu1 %v7058_v48  ;;  %v1080_v45 = vld [vmem:[%s10533_s22 + $0x330] sm:$0xff]  ;;  %v1077_v48 = vld [vmem:[%s10533_s22 + $0x318] sm:$0xff] }
 0x3c4   :  { %1836 = vmatprep.subr.bf16.mxu0 %v7065_v49  ;;  %1877 = vmatprep.subr.bf16.mxu1 %v7067_v50  ;;  %v1081_v49 = vld [vmem:[%s10533_s22 + $0x338] sm:$0xff]  ;;  %v7120_v50 = vcombine.low %v1068_v36, %v1072_v37  ;;  %v7129_v52 = vcombine.high %v1076_v44, %v1080_v45 }
 0x3c5   :  { %v7131_v53 = vcombine.high %v1077_v48, %v1081_v49  ;;  %v7130_v59 = vcombine.low %v1077_v48, %v1081_v49 }
 0x3c7   :  { %1837 = vmatpush1.bf16.msra.mxu0 %v7064_v55  ;;  %1878 = vmatpush1.bf16.msra.mxu1 %v7066_v56  ;;  %v1088_v55 = vld [vmem:[%s10533_s22 + $0x370] sm:$0xff]  ;;  %v1085_v56 = vld [vmem:[%s10533_s22 + $0x358] sm:$0xff] }
 0x3c8   :  { %1838 = vmatprep.subr.bf16.mxu0 %v7073_v57  ;;  %1879 = vmatprep.subr.bf16.mxu1 %v7075_v58  ;;  %v1089_v57 = vld [vmem:[%s10533_s22 + $0x378] sm:$0xff]  ;;  %v7128_v58 = vcombine.low %v1076_v44, %v1080_v45  ;;  %v7137_v60 = vcombine.high %v1084_v54, %v1088_v55 }
 0x3c9   :  { %v7139_v61 = vcombine.high %v1085_v56, %v1089_v57  ;;  %v7138_v4 = vcombine.low %v1085_v56, %v1089_v57  ;;  %v1910_v56 = vld [vmem:[#allocation7] sm:$0xff]  ;;  %v1911_v57 = vld [vmem:[#allocation7 + $0x8] sm:$0xff] }
 0x3cb   :  { %1839 = vmatpush1.bf16.msra.mxu0 %v7072_v63  ;;  %1880 = vmatpush1.bf16.msra.mxu1 %v7074_v0  ;;  %v1096_v63 = vld [vmem:[%s10533_s22 + $0x3b0] sm:$0xff]  ;;  %v1093_v0 = vld [vmem:[%s10533_s22 + $0x398] sm:$0xff] }
 0x3cc   :  { %1840 = vmatprep.subr.bf16.mxu0 %v7081_v1  ;;  %1881 = vmatprep.subr.bf16.mxu1 %v7083_v2  ;;  %v1097_v1 = vld [vmem:[%s10533_s22 + $0x3b8] sm:$0xff]  ;;  %v7136_v2 = vcombine.low %v1084_v54, %v1088_v55  ;;  %v7145_v5 = vcombine.high %v1092_v62, %v1096_v63 }
 0x3cd   :  { %v7147_v6 = vcombine.high %v1093_v0, %v1097_v1  ;;  %v7146_v13 = vcombine.low %v1093_v0, %v1097_v1  ;;  %v2052_v0 = vld [vmem:[%s10497_s6 + $0xc0] sm:$0xff]  ;;  %v2053_v1 = vld [vmem:[%s10497_s6 + $0xc8] sm:$0xff] }
 0x3cf   :  { %1841 = vmatpush1.bf16.msra.mxu0 %v7080_v9  ;;  %1882 = vmatpush1.bf16.msra.mxu1 %v7082_v10  ;;  %v1104_v9 = vld [vmem:[%s10533_s22 + $0x3f0] sm:$0xff]  ;;  %v1101_v10 = vld [vmem:[%s10533_s22 + $0x3d8] sm:$0xff] }
 0x3d0   :  { %1842 = vmatprep.subr.bf16.mxu0 %v7089_v11  ;;  %1883 = vmatprep.subr.bf16.mxu1 %v7091_v12  ;;  %v1105_v11 = vld [vmem:[%s10533_s22 + $0x3f8] sm:$0xff]  ;;  %v7144_v12 = vcombine.low %v1092_v62, %v1096_v63  ;;  %v7153_v14 = vcombine.high %v1100_v8, %v1104_v9  ;;  %v7152_v16 = vcombine.low %v1100_v8, %v1104_v9  ;;  %v2054_v8 = vld [vmem:[%s10497_s6 + $0xd0] sm:$0xff] }
 0x3d1   :  { %v7155_v15 = vcombine.high %v1101_v10, %v1105_v11  ;;  %v2035_v62 = vld [vmem:[%s10497_s6 + $0x38] sm:$0xff] }
 0x3d2   :  { %v2055_v9 = vld [vmem:[%s10497_s6 + $0xd8] sm:$0xff] }
 0x3d3   :  { %1843 = vmatpush1.bf16.msra.mxu0 %v7088_v7  ;;  %1884 = vmatpush1.bf16.msra.mxu1 %v7090_v17  ;;  %v7154_v7 = vcombine.low %v1101_v10, %v1105_v11  ;;  %v2044_v17 = vld [vmem:[%s10497_s6 + $0x80] sm:$0xff]  ;;  %v8028_v10 = vpack.c.bf16 %v2055_v9, %v2054_v8  ;;  %v2038_v11 = vld [vmem:[%s10497_s6 + $0x50] sm:$0xff] }
 0x3d4   :  { %1844 = vmatprep.subr.bf16.mxu0 %v7097_v18  ;;  %1885 = vmatprep.subr.bf16.mxu1 %v7099_v19  ;;  %v2045_v18 = vld [vmem:[%s10497_s6 + $0x88] sm:$0xff]  ;;  %v2028_v19 = vld [vmem:[%s10497_s6] sm:$0xff] }
 0x3d5   :  { %v8008_v47 = vpack.c.bf16 %v2045_v18, %v2044_v17  ;;  %v8010_v22 = vpack.c.bf16 %v2029_v46, %v2028_v19  ;;  %v2041_v17 = vld [vmem:[%s10497_s6 + $0x68] sm:$0xff]  ;;  %v2058_v19 = vld [vmem:[%s10497_s6 + $0xf0] sm:$0xff]  ;;  %v2210_v9 = vld [vmem:[#allocation8 + $0x20] sm:$0xff] }
 0x3d7   :  { %1845 = vmatpush1.bf16.msra.mxu0 %v7096_v23  ;;  %1886 = vmatpush1.bf16.msra.mxu1 %v7098_v24  ;;  %v2030_v24 = vld [vmem:[%s10497_s6 + $0x10] sm:$0xff] }
 0x3d8   :  { %1846 = vmatprep.subr.bf16.mxu0 %v7105_v25  ;;  %1887 = vmatprep.subr.bf16.mxu1 %v7107_v26  ;;  %v2031_v25 = vld [vmem:[%s10497_s6 + $0x18] sm:$0xff]  ;;  %v2048_v26 = vld [vmem:[%s10497_s6 + $0xa0] sm:$0xff] }
 0x3d9   :  { %v8014_v28 = vpack.c.bf16 %v2031_v25, %v2030_v24  ;;  %v8016_v29 = vpack.c.bf16 %v2049_v27, %v2048_v26 }
 0x3db   :  { %1847 = vmatpush1.bf16.msra.mxu0 %v7104_v32  ;;  %1888 = vmatpush1.bf16.msra.mxu1 %v7106_v33  ;;  %v2033_v32 = vld [vmem:[%s10497_s6 + $0x28] sm:$0xff] }
 0x3dc   :  { %1848 = vmatprep.subr.bf16.mxu0 %v7113_v34  ;;  %1889 = vmatprep.subr.bf16.mxu1 %v7115_v35  ;;  %v8018_v33 = vpack.c.bf16 %v2033_v32, %v2032_v31 }
 0x3df   :  { %1849 = vmatpush1.bf16.msra.mxu0 %v7112_v40  ;;  %1890 = vmatpush1.bf16.msra.mxu1 %v7114_v41 }
 0x3e0   :  { %1850 = vmatprep.subr.bf16.mxu0 %v7121_v42  ;;  %1891 = vmatprep.subr.bf16.mxu1 %v7123_v43 }
 0x3e3   :  { %1851 = vmatpush1.bf16.msra.mxu0 %v7120_v50  ;;  %1892 = vmatpush1.bf16.msra.mxu1 %v7122_v51 }
 0x3e4   :  { %1852 = vmatprep.subr.bf16.mxu0 %v7129_v52  ;;  %1893 = vmatprep.subr.bf16.mxu1 %v7131_v53 }
 0x3e7   :  { %1853 = vmatpush1.bf16.msra.mxu0 %v7128_v58  ;;  %1894 = vmatpush1.bf16.msra.mxu1 %v7130_v59  ;;  %v2050_v58 = vld [vmem:[%s10497_s6 + $0xb0] sm:$0xff]  ;;  %v2051_v59 = vld [vmem:[%s10497_s6 + $0xb8] sm:$0xff] }
 0x3e8   :  { %1854 = vmatprep.subr.bf16.mxu0 %v7137_v60  ;;  %1895 = vmatprep.subr.bf16.mxu1 %v7139_v61  ;;  %v8020_v60 = vpack.c.bf16 %v2051_v59, %v2050_v58  ;;  %v2034_v61 = vld [vmem:[%s10497_s6 + $0x30] sm:$0xff] }
 0x3e9   :  { %v8022_v63 = vpack.c.bf16 %v2035_v62, %v2034_v61  ;;  %v2207_v62 = vld [vmem:[#allocation8 + $0x8] sm:$0xff] }
 0x3eb   :  { %1855 = vmatpush1.bf16.msra.mxu0 %v7136_v2  ;;  %1896 = vmatpush1.bf16.msra.mxu1 %v7138_v4  ;;  %v8024_v2 = vpack.c.bf16 %v2053_v1, %v2052_v0  ;;  %v2036_v4 = vld [vmem:[%s10497_s6 + $0x40] sm:$0xff] }
 0x3ec   :  { %1856 = vmatprep.subr.bf16.mxu0 %v7145_v5  ;;  %1897 = vmatprep.subr.bf16.mxu1 %v7147_v6  ;;  %v2037_v5 = vld [vmem:[%s10497_s6 + $0x48] sm:$0xff]  ;;  %v2206_v0 = vld [vmem:[#allocation8] sm:$0xff] }
 0x3ed   :  { %v8026_v6 = vpack.c.bf16 %v2037_v5, %v2036_v4  ;;  %v2211_v4 = vld [vmem:[#allocation8 + $0x28] sm:$0xff]  ;;  %v2213_v5 = vld [vmem:[#allocation8 + $0x38] sm:$0xff] }
 0x3ee   :  { %v8076_v8 = vpack.c.bf16 %v2213_v5, %v2211_v4  ;;  %v2437_v4 = vld [vmem:[#allocation10 + $0x160] sm:$0xff] }
 0x3ef   :  { %1857 = vmatpush1.bf16.msra.mxu0 %v7144_v12  ;;  %1898 = vmatpush1.bf16.msra.mxu1 %v7146_v13  ;;  %v2039_v12 = vld [vmem:[%s10497_s6 + $0x58] sm:$0xff] }
 0x3f0   :  { %1858 = vmatprep.subr.bf16.mxu0 %v7153_v14  ;;  %1899 = vmatprep.subr.bf16.mxu1 %v7155_v15  ;;  %v8030_v13 = vpack.c.bf16 %v2039_v12, %v2038_v11  ;;  %v2056_v14 = vld [vmem:[%s10497_s6 + $0xe0] sm:$0xff]  ;;  %v2057_v15 = vld [vmem:[%s10497_s6 + $0xe8] sm:$0xff] }
 0x3f1   :  { %v2393_v12 = vld [vmem:[#allocation10] sm:$0xff] }
 0x3f3   :  { %1859 = vmatpush1.bf16.msra.mxu0 %v7152_v16  ;;  %1900 = vmatpush1.bf16.msra.mxu1 %v7154_v7  ;;  %v8032_v16 = vpack.c.bf16 %v2057_v15, %v2056_v14  ;;  %v2040_v7 = vld [vmem:[%s10497_s6 + $0x60] sm:$0xff]  ;;  %v2394_v14 = vld [vmem:[#allocation10 + $0x8] sm:$0xff] }
 0x3f4   :  { %8009 = vmatprep.subr.bf16.mxu1 %v8008_v47  ;;  %v8034_v18 = vpack.c.bf16 %v2041_v17, %v2040_v7  ;;  %v2398_v7 = vld [vmem:[#allocation10 + $0x28] sm:$0xff] }
 0x3f5   :  { %v7162_v17 = vcombine.low %v2394_v14, %v2398_v7 }
 0x3f6   :  { %1861 = vmatmul.mubr.bf16.vlgmr.msra.gmra.mrb[16].mxu0 %v9380_v21  ;;  %1902 = vmatmul.mubr.bf16.vlgmr.msra.gmra.mrb[16].mxu1 %v9380_v21  ;;  %v2046_v21 = vld [vmem:[%s10497_s6 + $0x90] sm:$0xff] }
 0x3f7   :  { %1983 = vmatprep.mubr.f32.mxu0 %v8727_v30  ;;  %v8012_v23 = vpack.c.bf16 %v2047_v20, %v2046_v21  ;;  %8011 = vmatpush3.bf16.msra.mxu1 %v8010_v22  ;;  %v2042_v21 = vld [vmem:[%s10497_s6 + $0x70] sm:$0xff]  ;;  %v2043_v20 = vld [vmem:[%s10497_s6 + $0x78] sm:$0xff] }
 0x3f9   :  { %8013 = vmatprep.subr.bf16.mxu1 %v8012_v23 }
 0x3fb   :  { %8015 = vmatpush3.bf16.msra.mxu1 %v8014_v28 }
 0x3fc   :  { %8017 = vmatprep.subr.bf16.mxu1 %v8016_v29 }
 0x3ff   :  { %8019 = vmatpush3.bf16.msra.mxu1 %v8018_v33 }
 0x400   :  { %8021 = vmatprep.subr.bf16.mxu1 %v8020_v60 }
 0x403   :  { %8023 = vmatpush3.bf16.msra.mxu1 %v8022_v63 }
 0x404   :  { %8025 = vmatprep.subr.bf16.mxu1 %v8024_v2 }
 0x407   :  { %8027 = vmatpush3.bf16.msra.mxu1 %v8026_v6 }
 0x408   :  { %8029 = vmatprep.subr.bf16.mxu1 %v8028_v10 }
 0x40b   :  { %8031 = vmatpush3.bf16.msra.mxu1 %v8030_v13 }
 0x40c   :  { %8033 = vmatprep.subr.bf16.mxu1 %v8032_v16 }
 0x40f   :  { %8035 = vmatpush3.bf16.msra.mxu1 %v8034_v18 }
 0x489   :  { %v1780_v34 = vpop.f32.mrb[12].mxu0  ;;  %v1821_v35 = vpop.f32.mrb[12].mxu1 }
 0x48a   :  { %v8002_v36 = vpack.c.bf16 %v1821_v35, %v1780_v34  ;;  %v1782_v37 = vpop.f32.mrb[13].mxu0  ;;  %v1823_v38 = vpop.f32.mrb[13].mxu1 }
 0x48b   :  { %v8000_v39 = vpack.c.bf16 %v1823_v38, %v1782_v37  ;;  %v1784_v40 = vpop.f32.mrb[14].mxu0  ;;  %v1825_v41 = vpop.f32.mrb[14].mxu1 }
 0x48c   :  { %v1785_v42 = vpop.f32.mrb[15].mxu0  ;;  %v1826_v43 = vpop.f32.mrb[15].mxu1 }
 0x48d   :  { %8001 = vmatprep.subr.bf16.mxu0 %v8000_v39 }
 0x48e   :  { %8003 = vmatpush1.bf16.msra.mxu0 %v8002_v36 }
 0x4c9   :  { %v1862_v44 = vpop.f32.mrb[16].mxu0  ;;  %v1903_v45 = vpop.f32.mrb[16].mxu1 }
 0x4ca   :  { %v8006_v48 = vpack.c.bf16 %v1903_v45, %v1862_v44  ;;  %v1864_v49 = vpop.f32.mrb[17].mxu0  ;;  %v1905_v50 = vpop.f32.mrb[17].mxu1 }
 0x4cb   :  { %v8004_v51 = vpack.c.bf16 %v1905_v50, %v1864_v49  ;;  %v1866_v52 = vpop.f32.mrb[18].mxu0  ;;  %v1907_v53 = vpop.f32.mrb[18].mxu1 }
 0x4cc   :  { %v1867_v54 = vpop.f32.mrb[19].mxu0  ;;  %v1908_v55 = vpop.f32.mrb[19].mxu1 }
 0x4cd   :  { %8005 = vmatprep.subr.bf16.mxu0 %v8004_v51 }
 0x4ce   :  { %8007 = vmatpush1.bf16.msra.mxu0 %v8006_v48 }
 0x4cf   :  { %8041 = vmatprep.subr.bf16.mxu0 %v8008_v47  ;;  %v2059_v47 = vld [vmem:[%s10497_s6 + $0xf8] sm:$0xff] }
 0x4d0   :  { %v8036_v46 = vpack.c.bf16 %v2059_v47, %v2058_v19 }
 0x4d1   :  { %7156 = vmatmul.mubr.msk.f32.vlgmr.msra.gmra.mrb[20].mxu0 %vm1912_vm3, %v1910_v56 }
 0x4d2   :  { %1989 = vmatprep.mubr.f32.mxu0 %v8727_v30  ;;  %8043 = vmatpush3.bf16.msra.mxu0 %v8010_v22  ;;  %v8038_v22 = vpack.c.bf16 %v2043_v20, %v2042_v21 }
 0x4d3   :  { %8045 = vmatprep.subr.bf16.mxu0 %v8012_v23  ;;  %8037 = vmatprep.subr.bf16.mxu1 %v8036_v46 }
 0x4d4   :  { %8039 = vmatpush3.bf16.msra.mxu1 %v8038_v22 }
 0x4d5   :  { %7157 = vmatmul.mubr.msk.f32.gmra.mrb[22].mxu0 %vm1912_vm3, %v1911_v57 }
 0x4d6   :  { %8047 = vmatpush3.bf16.msra.mxu0 %v8014_v28 }
 0x4d7   :  { %8049 = vmatprep.subr.bf16.mxu0 %v8016_v29 }
 0x4da   :  { %8051 = vmatpush3.bf16.msra.mxu0 %v8018_v33 }
 0x4db   :  { %8053 = vmatprep.subr.bf16.mxu0 %v8020_v60 }
 0x4de   :  { %8055 = vmatpush3.bf16.msra.mxu0 %v8022_v63  ;;  %v2209_v63 = vld [vmem:[#allocation8 + $0x18] sm:$0xff] }
 0x4df   :  { %8057 = vmatprep.subr.bf16.mxu0 %v8024_v2  ;;  %v8072_v1 = vpack.c.bf16 %v2209_v63, %v2207_v62  ;;  %v2208_v2 = vld [vmem:[#allocation8 + $0x10] sm:$0xff]  ;;  %v2426_v62 = vld [vmem:[#allocation10 + $0x108] sm:$0xff] }
 0x4e0   :  { %v2430_v63 = vld [vmem:[#allocation10 + $0x128] sm:$0xff] }
 0x4e1   :  { %8073 = vmatprep.subr.bf16.mxu1 %v8072_v1  ;;  %v7195_v5 = vcombine.high %v2426_v62, %v2430_v63 }
 0x4e2   :  { %8059 = vmatpush3.bf16.msra.mxu0 %v8026_v6  ;;  %v8074_v6 = vpack.c.bf16 %v2208_v2, %v2206_v0  ;;  %v2433_v2 = vld [vmem:[#allocation10 + $0x140] sm:$0xff] }
 0x4e3   :  { %8061 = vmatprep.subr.bf16.mxu0 %v8028_v10  ;;  %v2212_v10 = vld [vmem:[#allocation8 + $0x30] sm:$0xff] }
 0x4e4   :  { %v8078_v11 = vpack.c.bf16 %v2212_v10, %v2210_v9  ;;  %v2438_v9 = vld [vmem:[#allocation10 + $0x168] sm:$0xff]  ;;  %v7201_v10 = vcombine.high %v2433_v2, %v2437_v4 }
 0x4e6   :  { %8063 = vmatpush3.bf16.msra.mxu0 %v8030_v13  ;;  %v2397_v13 = vld [vmem:[#allocation10 + $0x20] sm:$0xff] }
 0x4e7   :  { %8065 = vmatprep.subr.bf16.mxu0 %v8032_v16  ;;  %v7160_v15 = vcombine.low %v2393_v12, %v2397_v13  ;;  %v7161_v16 = vcombine.high %v2393_v12, %v2397_v13  ;;  %v2441_v12 = vld [vmem:[#allocation10 + $0x180] sm:$0xff] }
 0x4e8   :  { %v2445_v13 = vld [vmem:[#allocation10 + $0x1a0] sm:$0xff] }
 0x4ea   :  { %8067 = vmatpush3.bf16.msra.mxu0 %v8034_v18  ;;  %v7163_v18 = vcombine.high %v2394_v14, %v2398_v7  ;;  %v2446_v7 = vld [vmem:[#allocation10 + $0x1a8] sm:$0xff] }
 0x4eb   :  { %8069 = vmatprep.subr.bf16.mxu0 %v8036_v46 }
 0x4ee   :  { %8071 = vmatpush3.bf16.msra.mxu0 %v8038_v22 }
 0x4ef   :  { %8081 = vmatprep.subr.bf16.mxu0 %v8072_v1 }
 0x5a4   :  { %v9654_v23 = vpop.f32.mrb[20].mxu0 }
 0x5a5   :  { %v9656_v24 = vpop.f32.mrb[21].mxu0  ;;  %v2010_v26 = vmul.f32 %v9654_v23, %v9654_v23 }
 0x5a6   :  { %v2011_v31 = vmul.f32 %v9656_v24, %v9656_v24 }
 0x5a8   :  { %v9658_v25 = vpop.f32.mrb[22].mxu0 }
 0x5a9   :  { %v1996_v27 = vadd.f32 %v9658_v25, %v9654_v23  ;;  %v2012_v28 = vmul.f32 %v9658_v25, %v9658_v25  ;;  %v9666_v29 = vpop.f32.mrb[23].mxu0 }
 0x5aa   :  { %v2003_v32 = vadd.f32 %v9666_v29, %v9656_v24  ;;  %v2013_v33 = vmul.f32 %v9666_v29, %v9666_v29 }
 0x5ab   :  { %v1997_v34 = vrot.slane %v1996_v27, 4  ;;  %v2014_v35 = vadd.f32 %v2012_v28, %v2010_v26 }
 0x5ac   :  { %v2004_v36 = vrot.slane %v2003_v32, 4  ;;  %v2021_v37 = vadd.f32 %v2013_v33, %v2011_v31  ;;  %v2401_v33 = vld [vmem:[#allocation10 + $0x40] sm:$0xff] }
 0x5ad   :  { %v1998_v38 = vadd.f32 %v1997_v34, %v1996_v27  ;;  %v2015_v39 = vrot.slane %v2014_v35, 4  ;;  %v2405_v34 = vld [vmem:[#allocation10 + $0x60] sm:$0xff] }
 0x5ae   :  { %v2005_v40 = vadd.f32 %v2004_v36, %v2003_v32  ;;  %v2022_v41 = vrot.slane %v2021_v37, 4  ;;  %v2406_v36 = vld [vmem:[#allocation10 + $0x68] sm:$0xff] }
 0x5af   :  { %v1999_v42 = vrot.slane %v1998_v38, 2  ;;  %v2016_v43 = vadd.f32 %v2015_v39, %v2014_v35  ;;  %v2402_v35 = vld [vmem:[#allocation10 + $0x48] sm:$0xff]  ;;  %v2409_v39 = vld [vmem:[#allocation10 + $0x80] sm:$0xff] }
 0x5b0   :  { %v2006_v44 = vrot.slane %v2005_v40, 2  ;;  %v2023_v45 = vadd.f32 %v2022_v41, %v2021_v37  ;;  %v7169_v37 = vcombine.high %v2401_v33, %v2405_v34 }
 0x5b1   :  { %v2000_v48 = vadd.f32 %v1999_v42, %v1998_v38  ;;  %v2017_v49 = vrot.slane %v2016_v43, 2  ;;  %v7171_v42 = vcombine.high %v2402_v35, %v2406_v36 }
 0x5b2   :  { %v2007_v50 = vadd.f32 %v2006_v44, %v2005_v40  ;;  %v2024_v51 = vrot.slane %v2023_v45, 2  ;;  %v2413_v40 = vld [vmem:[#allocation10 + $0xa0] sm:$0xff]  ;;  %v2410_v44 = vld [vmem:[#allocation10 + $0x88] sm:$0xff] }
 0x5b3   :  { %v2018_v52 = vadd.f32 %v2017_v49, %v2016_v43  ;;  %v2001_v53 = vrot.slane %v2000_v48, 1  ;;  %v7168_v43 = vcombine.low %v2401_v33, %v2405_v34  ;;  %v7170_v49 = vcombine.low %v2402_v35, %v2406_v36  ;;  %v2458_v34 = vld [vmem:[#allocation10 + $0x208] sm:$0xff] }
 0x5b4   :  { %v2008_v54 = vrot.slane %v2007_v50, 1  ;;  %v2025_v55 = vadd.f32 %v2024_v51, %v2023_v45  ;;  %v2414_v45 = vld [vmem:[#allocation10 + $0xa8] sm:$0xff]  ;;  %v2421_v51 = vld [vmem:[#allocation10 + $0xe0] sm:$0xff] }
 0x5b5   :  { %v2019_v56 = vrot.slane %v2018_v52, 1  ;;  %v2002_v59 = vadd.f32 %v2001_v53, %v2000_v48  ;;  %v7177_v48 = vcombine.high %v2409_v39, %v2413_v40  ;;  %v7176_v53 = vcombine.low %v2409_v39, %v2413_v40  ;;  %v2462_v35 = vld [vmem:[#allocation10 + $0x228] sm:$0xff]  ;;  %v2469_v39 = vld [vmem:[#allocation10 + $0x260] sm:$0xff] }
 0x5b6   :  { %v2009_v57 = vadd.f32 %v2008_v54, %v2007_v50  ;;  %v2026_v58 = vrot.slane %v2025_v55, 1  ;;  %v2417_v50 = vld [vmem:[#allocation10 + $0xc0] sm:$0xff]  ;;  %v2418_v54 = vld [vmem:[#allocation10 + $0xc8] sm:$0xff]  ;;  %v7227_v40 = vcombine.high %v2458_v34, %v2462_v35 }
 0x5b7   :  { %v2020_v61 = vadd.f32 %v2019_v56, %v2018_v52  ;;  %v7179_v52 = vcombine.high %v2410_v44, %v2414_v45  ;;  %v7185_v56 = vcombine.high %v2417_v50, %v2421_v51 }
 0x5b8   :  { %2124 = vmatprep.mubr.f32.mxu1 %v2009_v57  ;;  %v2027_v60 = vadd.f32 %v2026_v58, %v2025_v55  ;;  %v2422_v55 = vld [vmem:[#allocation10 + $0xe8] sm:$0xff]  ;;  %v7178_v57 = vcombine.low %v2410_v44, %v2414_v45  ;;  %v2425_v58 = vld [vmem:[#allocation10 + $0x100] sm:$0xff]  ;;  %v7226_v45 = vcombine.low %v2458_v34, %v2462_v35 }
 0x5b9   :  { %2125 = vmatmul.mubr.f32.vlgmr.msra.gmra.mrb[20].mxu1 %v2002_v59  ;;  %v2429_v59 = vld [vmem:[#allocation10 + $0x120] sm:$0xff]  ;;  %v7186_v1 = vcombine.low %v2418_v54, %v2422_v55  ;;  %v2518_v35 = vld [vmem:[#allocation10 + $0x3e8] sm:$0xff] }
 0x5ba   :  { %2195 = vmatprep.mubr.f32.mxu0 %v2027_v60  ;;  %2281 = vmatprep.mubr.f32.mxu1 %v8727_v30  ;;  %v7187_v60 = vcombine.high %v2418_v54, %v2422_v55  ;;  %v7193_v0 = vcombine.high %v2425_v58, %v2429_v59 }
 0x5bb   :  { %2196 = vmatmul.mubr.f32.vlgmr.msra.gmra.mrb[24].mxu0 %v2020_v61  ;;  %8075 = vmatpush1.bf16.msra.mxu1 %v8074_v6  ;;  %v7184_v61 = vcombine.low %v2417_v50, %v2421_v51 }
 0x5bc   :  { %2356 = vmatprep.mubr.f32.mxu0 %v8727_v30  ;;  %8083 = vmatpush1.bf16.msra.mxu0 %v8074_v6  ;;  %v7192_v6 = vcombine.low %v2425_v58, %v2429_v59 }
 0x5bd   :  { %8077 = vmatprep.subr.bf16.mxu1 %v8076_v8  ;;  %8085 = vmatprep.subr.bf16.mxu0 %v8076_v8  ;;  %v2434_v8 = vld [vmem:[#allocation10 + $0x148] sm:$0xff] }
 0x5be   :  { %v7203_v14 = vcombine.high %v2434_v8, %v2438_v9 }
 0x5bf   :  { %8079 = vmatpush1.bf16.msra.mxu1 %v8078_v11 }
 0x5c0   :  { %8087 = vmatpush1.bf16.msra.mxu0 %v8078_v11  ;;  %3161 = vmatprep.subr.bf16.mxu1 %v7161_v16  ;;  %v7194_v11 = vcombine.low %v2426_v62, %v2430_v63  ;;  %v2442_v16 = vld [vmem:[#allocation10 + $0x188] sm:$0xff] }
 0x5c1   :  { %3204 = vmatprep.subr.bf16.mxu0 %v7163_v18  ;;  %v7202_v18 = vcombine.low %v2434_v8, %v2438_v9 }
 0x68c   :  { %v7670_v19 = vpop.f32.mrb[20].mxu1 }
 0x68d   :  { %v7671_v47 = vpop.f32.mrb[21].mxu1 }
 0x68e   :  { %v7672_v46 = vadd.f32 %v7671_v47, %v7670_v19  ;;  %v7705_v21 = vpop.f32.mrb[24].mxu0  ;;  %v2449_v19 = vld [vmem:[#allocation10 + $0x1c0] sm:$0xff] }
 0x68f   :  { %v7706_v20 = vpop.f32.mrb[25].mxu0  ;;  %v2453_v47 = vld [vmem:[#allocation10 + $0x1e0] sm:$0xff] }
 0x690   :  { %v2130_v22 = vmul.f32 0.0078125, %v7672_v46  ;;  %v7707_v26 = vadd.f32 %v7706_v20, %v7705_v21  ;;  %v7211_v46 = vcombine.high %v2442_v16, %v2446_v7  ;;  %v7208_v21 = vcombine.low %v2441_v12, %v2445_v13  ;;  %v2450_v20 = vld [vmem:[#allocation10 + $0x1c8] sm:$0xff] }
 0x691   :  { %v7216_v33 = vcombine.low %v2449_v19, %v2453_v47 }
 0x692   :  { %v2202_v27 = vmul.f32 %v2130_v22, %v2130_v22  ;;  %v2201_v28 = vmul.f32 0.0078125, %v7707_v26  ;;  %v7217_v26 = vcombine.high %v2449_v19, %v2453_v47  ;;  %v2505_v47 = vld [vmem:[#allocation10 + $0x380] sm:$0xff] }
 0x694   :  { %v2203_v31 = vsub.f32 %v2201_v28, %v2202_v27  ;;  %v7210_v27 = vcombine.low %v2442_v16, %v2446_v7  ;;  %v2457_v28 = vld [vmem:[#allocation10 + $0x200] sm:$0xff]  ;;  %v2502_v7 = vld [vmem:[#allocation10 + $0x368] sm:$0xff] }
 0x696   :  { %v2204_v32 = vadd.f32 1e-05, %v2203_v31  ;;  %v2461_v31 = vld [vmem:[#allocation10 + $0x220] sm:$0xff] }
 0x697   :  { %v7225_v36 = vcombine.high %v2457_v28, %v2461_v31 }
 0x698   :  { %8359 = vrsqrt.f32 %v2204_v32 }
 0x6a2   :  { %v8360_v38 = vpop.eup %8359 }
 0x6a3   :  { %7158 = vmatmul.mubr.msk.f32.vlgmr.msra.gmra.mrb[22].mxu1 %vm1912_vm3, %v8360_v38  ;;  %v2288_v41 = vmul.f32 %v8360_v38, %v2130_v22  ;;  %v2454_v22 = vld [vmem:[#allocation10 + $0x1e8] sm:$0xff]  ;;  %v2465_v38 = vld [vmem:[#allocation10 + $0x240] sm:$0xff] }
 0x6a4   :  { %3162 = vmatpush1.bf16.msra.mxu1 %v7160_v15  ;;  %v7200_v15 = vcombine.low %v2433_v2, %v2437_v4  ;;  %v7219_v32 = vcombine.high %v2450_v20, %v2454_v22  ;;  %v7233_v44 = vcombine.high %v2465_v38, %v2469_v39  ;;  %v7232_v51 = vcombine.low %v2465_v38, %v2469_v39  ;;  %v2395_v39 = vld [vmem:[#allocation10 + $0x10] sm:$0xff] }
 0x6a5   :  { %7159 = vmatmul.mubr.msk.f32.vlgmr.msra.gmra.mrb[26].mxu0 %vm1912_vm3, %v2288_v41  ;;  %3163 = vmatprep.subr.bf16.mxu1 %v7169_v37  ;;  %v7218_v37 = vcombine.low %v2450_v20, %v2454_v22  ;;  %v7224_v41 = vcombine.low %v2457_v28, %v2461_v31  ;;  %v2510_v22 = vld [vmem:[#allocation10 + $0x3a8] sm:$0xff]  ;;  %v2513_v31 = vld [vmem:[#allocation10 + $0x3c0] sm:$0xff] }
 0x6a6   :  { %3205 = vmatpush1.bf16.msra.mxu0 %v7162_v17  ;;  %v7209_v17 = vcombine.high %v2441_v12, %v2445_v13  ;;  %v2497_v13 = vld [vmem:[#allocation10 + $0x340] sm:$0xff] }
 0x6a7   :  { %3206 = vmatprep.subr.bf16.mxu0 %v7171_v42  ;;  %v2466_v42 = vld [vmem:[#allocation10 + $0x248] sm:$0xff] }
 0x6a8   :  { %3164 = vmatpush1.bf16.msra.mxu1 %v7168_v43  ;;  %v2470_v43 = vld [vmem:[#allocation10 + $0x268] sm:$0xff] }
 0x6a9   :  { %3165 = vmatprep.subr.bf16.mxu1 %v7177_v48  ;;  %v2473_v48 = vld [vmem:[#allocation10 + $0x280] sm:$0xff]  ;;  %v7235_v50 = vcombine.high %v2466_v42, %v2470_v43  ;;  %v7234_v55 = vcombine.low %v2466_v42, %v2470_v43  ;;  %v2400_v43 = vld [vmem:[#allocation10 + $0x38] sm:$0xff] }
 0x6aa   :  { %3207 = vmatpush1.bf16.msra.mxu0 %v7170_v49  ;;  %v2477_v49 = vld [vmem:[#allocation10 + $0x2a0] sm:$0xff] }
 0x6ab   :  { %3208 = vmatprep.subr.bf16.mxu0 %v7179_v52  ;;  %v2474_v52 = vld [vmem:[#allocation10 + $0x288] sm:$0xff]  ;;  %v7241_v54 = vcombine.high %v2473_v48, %v2477_v49  ;;  %v7240_v59 = vcombine.low %v2473_v48, %v2477_v49 }
 0x6ac   :  { %3166 = vmatpush1.bf16.msra.mxu1 %v7176_v53  ;;  %v2478_v53 = vld [vmem:[#allocation10 + $0x2a8] sm:$0xff] }
 0x6ad   :  { %3167 = vmatprep.subr.bf16.mxu1 %v7185_v56  ;;  %v2481_v56 = vld [vmem:[#allocation10 + $0x2c0] sm:$0xff]  ;;  %v7243_v58 = vcombine.high %v2474_v52, %v2478_v53  ;;  %v7242_v63 = vcombine.low %v2474_v52, %v2478_v53 }
 0x6ae   :  { %3209 = vmatpush1.bf16.msra.mxu0 %v7178_v57  ;;  %v2485_v57 = vld [vmem:[#allocation10 + $0x2e0] sm:$0xff] }
 0x6af   :  { %3210 = vmatprep.subr.bf16.mxu0 %v7187_v60  ;;  %v2482_v60 = vld [vmem:[#allocation10 + $0x2c8] sm:$0xff]  ;;  %v7249_v62 = vcombine.high %v2481_v56, %v2485_v57  ;;  %v7248_v4 = vcombine.low %v2481_v56, %v2485_v57 }
 0x6b0   :  { %3168 = vmatpush1.bf16.msra.mxu1 %v7184_v61  ;;  %v2486_v61 = vld [vmem:[#allocation10 + $0x2e8] sm:$0xff] }
 0x6b1   :  { %3169 = vmatprep.subr.bf16.mxu1 %v7193_v0  ;;  %v2489_v0 = vld [vmem:[#allocation10 + $0x300] sm:$0xff]  ;;  %v7251_v2 = vcombine.high %v2482_v60, %v2486_v61  ;;  %v7250_v9 = vcombine.low %v2482_v60, %v2486_v61 }
 0x6b2   :  { %3211 = vmatpush1.bf16.msra.mxu0 %v7186_v1  ;;  %v2493_v1 = vld [vmem:[#allocation10 + $0x320] sm:$0xff] }
 0x6b3   :  { %3212 = vmatprep.subr.bf16.mxu0 %v7195_v5  ;;  %v2490_v5 = vld [vmem:[#allocation10 + $0x308] sm:$0xff]  ;;  %v7257_v8 = vcombine.high %v2489_v0, %v2493_v1 }
 0x6b4   :  { %3170 = vmatpush1.bf16.msra.mxu1 %v7192_v6  ;;  %v2494_v6 = vld [vmem:[#allocation10 + $0x328] sm:$0xff] }
 0x6b5   :  { %3171 = vmatprep.subr.bf16.mxu1 %v7201_v10  ;;  %v7259_v10 = vcombine.high %v2490_v5, %v2494_v6  ;;  %v7258_v12 = vcombine.low %v2490_v5, %v2494_v6 }
 0x6b6   :  { %3213 = vmatpush1.bf16.msra.mxu0 %v7194_v11  ;;  %v7256_v11 = vcombine.low %v2489_v0, %v2493_v1 }
 0x6b7   :  { %3214 = vmatprep.subr.bf16.mxu0 %v7203_v14  ;;  %v2501_v14 = vld [vmem:[#allocation10 + $0x360] sm:$0xff] }
 0x6b8   :  { %3172 = vmatpush1.bf16.msra.mxu1 %v7200_v15  ;;  %v2498_v15 = vld [vmem:[#allocation10 + $0x348] sm:$0xff]  ;;  %v7265_v16 = vcombine.high %v2497_v13, %v2501_v14 }
 0x6b9   :  { %3173 = vmatprep.subr.bf16.mxu1 %v7209_v17  ;;  %v7264_v17 = vcombine.low %v2497_v13, %v2501_v14  ;;  %v7267_v19 = vcombine.high %v2498_v15, %v2502_v7  ;;  %v2412_v13 = vld [vmem:[#allocation10 + $0x98] sm:$0xff] }
 0x6ba   :  { %3215 = vmatpush1.bf16.msra.mxu0 %v7202_v18  ;;  %v7266_v18 = vcombine.low %v2498_v15, %v2502_v7  ;;  %v2416_v14 = vld [vmem:[#allocation10 + $0xb8] sm:$0xff] }
 0x6bb   :  { %3216 = vmatprep.subr.bf16.mxu0 %v7211_v46  ;;  %v2509_v46 = vld [vmem:[#allocation10 + $0x3a0] sm:$0xff] }
 0x6bc   :  { %3174 = vmatpush1.bf16.msra.mxu1 %v7208_v21  ;;  %v2506_v21 = vld [vmem:[#allocation10 + $0x388] sm:$0xff]  ;;  %v7273_v20 = vcombine.high %v2505_v47, %v2509_v46 }
 0x6bd   :  { %3175 = vmatprep.subr.bf16.mxu1 %v7217_v26  ;;  %v7272_v26 = vcombine.low %v2505_v47, %v2509_v46  ;;  %v7275_v28 = vcombine.high %v2506_v21, %v2510_v22  ;;  %v2420_v47 = vld [vmem:[#allocation10 + $0xd8] sm:$0xff] }
 0x6be   :  { %3217 = vmatpush1.bf16.msra.mxu0 %v7210_v27  ;;  %v7274_v27 = vcombine.low %v2506_v21, %v2510_v22  ;;  %v2424_v46 = vld [vmem:[#allocation10 + $0xf8] sm:$0xff] }
 0x6bf   :  { %3218 = vmatprep.subr.bf16.mxu0 %v7219_v32  ;;  %v2517_v32 = vld [vmem:[#allocation10 + $0x3e0] sm:$0xff] }
 0x6c0   :  { %3176 = vmatpush1.bf16.msra.mxu1 %v7216_v33  ;;  %v2514_v33 = vld [vmem:[#allocation10 + $0x3c8] sm:$0xff]  ;;  %v7281_v34 = vcombine.high %v2513_v31, %v2517_v32 }
 0x6c1   :  { %3177 = vmatprep.subr.bf16.mxu1 %v7225_v36  ;;  %v7280_v36 = vcombine.low %v2513_v31, %v2517_v32  ;;  %v7283_v38 = vcombine.high %v2514_v33, %v2518_v35  ;;  %v2428_v31 = vld [vmem:[#allocation10 + $0x118] sm:$0xff] }
 0x6c2   :  { %3219 = vmatpush1.bf16.msra.mxu0 %v7218_v37  ;;  %v7282_v37 = vcombine.low %v2514_v33, %v2518_v35  ;;  %v2432_v32 = vld [vmem:[#allocation10 + $0x138] sm:$0xff] }
 0x6c3   :  { %3220 = vmatprep.subr.bf16.mxu0 %v7227_v40  ;;  %v2399_v40 = vld [vmem:[#allocation10 + $0x30] sm:$0xff] }
 0x6c4   :  { %3178 = vmatpush1.bf16.msra.mxu1 %v7224_v41  ;;  %v2396_v41 = vld [vmem:[#allocation10 + $0x18] sm:$0xff]  ;;  %v7165_v42 = vcombine.high %v2395_v39, %v2399_v40 }
 0x6c5   :  { %3179 = vmatprep.subr.bf16.mxu1 %v7233_v44  ;;  %v7164_v44 = vcombine.low %v2395_v39, %v2399_v40  ;;  %v7167_v48 = vcombine.high %v2396_v41, %v2400_v43  ;;  %v2436_v39 = vld [vmem:[#allocation10 + $0x158] sm:$0xff] }
 0x6c6   :  { %3221 = vmatpush1.bf16.msra.mxu0 %v7226_v45  ;;  %v7166_v45 = vcombine.low %v2396_v41, %v2400_v43  ;;  %v2440_v40 = vld [vmem:[#allocation10 + $0x178] sm:$0xff] }
 0x6c7   :  { %3222 = vmatprep.subr.bf16.mxu0 %v7235_v50 }
 0x6c8   :  { %3180 = vmatpush1.bf16.msra.mxu1 %v7232_v51 }
 0x6c9   :  { %3181 = vmatprep.subr.bf16.mxu1 %v7241_v54 }
 0x6ca   :  { %3223 = vmatpush1.bf16.msra.mxu0 %v7234_v55 }
 0x6cb   :  { %3224 = vmatprep.subr.bf16.mxu0 %v7243_v58 }
 0x6cc   :  { %3182 = vmatpush1.bf16.msra.mxu1 %v7240_v59 }
 0x6cd   :  { %3183 = vmatprep.subr.bf16.mxu1 %v7249_v62 }
 0x6ce   :  { %3225 = vmatpush1.bf16.msra.mxu0 %v7242_v63 }
 0x6cf   :  { %3226 = vmatprep.subr.bf16.mxu0 %v7251_v2 }
 0x6d0   :  { %3184 = vmatpush1.bf16.msra.mxu1 %v7248_v4 }
 0x6d1   :  { %3185 = vmatprep.subr.bf16.mxu1 %v7257_v8  ;;  %v2404_v8 = vld [vmem:[#allocation10 + $0x58] sm:$0xff] }
 0x6d2   :  { %3227 = vmatpush1.bf16.msra.mxu0 %v7250_v9  ;;  %v2408_v9 = vld [vmem:[#allocation10 + $0x78] sm:$0xff] }
 0x6d3   :  { %3228 = vmatprep.subr.bf16.mxu0 %v7259_v10 }
 0x6d4   :  { %3186 = vmatpush1.bf16.msra.mxu1 %v7256_v11  ;;  %v7175_v11 = vcombine.high %v2404_v8, %v2408_v9 }
 0x6d5   :  { %3187 = vmatprep.subr.bf16.mxu1 %v7265_v16  ;;  %v7174_v16 = vcombine.low %v2404_v8, %v2408_v9  ;;  %v2467_v8 = vld [vmem:[#allocation10 + $0x250] sm:$0xff] }
 0x6d6   :  { %3229 = vmatpush1.bf16.msra.mxu0 %v7258_v12  ;;  %v2415_v12 = vld [vmem:[#allocation10 + $0xb0] sm:$0xff] }
 0x6d7   :  { %3230 = vmatprep.subr.bf16.mxu0 %v7267_v19  ;;  %v2423_v19 = vld [vmem:[#allocation10 + $0xf0] sm:$0xff] }
 0x6d8   :  { %3188 = vmatpush1.bf16.msra.mxu1 %v7264_v17  ;;  %v7183_v17 = vcombine.high %v2412_v13, %v2416_v14  ;;  %v2471_v9 = vld [vmem:[#allocation10 + $0x270] sm:$0xff] }
 0x6d9   :  { %3189 = vmatprep.subr.bf16.mxu1 %v7273_v20  ;;  %v7182_v20 = vcombine.low %v2412_v13, %v2416_v14  ;;  %v2475_v14 = vld [vmem:[#allocation10 + $0x290] sm:$0xff] }
 0x6da   :  { %3231 = vmatpush1.bf16.msra.mxu0 %v7266_v18  ;;  %v2419_v18 = vld [vmem:[#allocation10 + $0xd0] sm:$0xff] }
 0x6db   :  { %3232 = vmatprep.subr.bf16.mxu0 %v7275_v28  ;;  %v7189_v22 = vcombine.high %v2419_v18, %v2423_v19  ;;  %v2431_v28 = vld [vmem:[#allocation10 + $0x130] sm:$0xff]  ;;  %v7188_v33 = vcombine.low %v2419_v18, %v2423_v19 }
 0x6dc   :  { %3190 = vmatpush1.bf16.msra.mxu1 %v7272_v26  ;;  %v7191_v26 = vcombine.high %v2420_v47, %v2424_v46 }
 0x6dd   :  { %3191 = vmatprep.subr.bf16.mxu1 %v7281_v34  ;;  %v7190_v34 = vcombine.low %v2420_v47, %v2424_v46  ;;  %v2483_v46 = vld [vmem:[#allocation10 + $0x2d0] sm:$0xff] }
 0x6de   :  { %3233 = vmatpush1.bf16.msra.mxu0 %v7274_v27  ;;  %v2427_v27 = vld [vmem:[#allocation10 + $0x110] sm:$0xff] }
 0x6df   :  { %3234 = vmatprep.subr.bf16.mxu0 %v7283_v38  ;;  %v7197_v35 = vcombine.high %v2427_v27, %v2431_v28  ;;  %v2439_v38 = vld [vmem:[#allocation10 + $0x170] sm:$0xff]  ;;  %v7196_v41 = vcombine.low %v2427_v27, %v2431_v28 }
 0x6e0   :  { %3192 = vmatpush1.bf16.msra.mxu1 %v7280_v36  ;;  %v7199_v36 = vcombine.high %v2428_v31, %v2432_v32 }
 0x6e1   :  { %3247 = vmatprep.subr.bf16.mxu1 %v7165_v42  ;;  %v7198_v42 = vcombine.low %v2428_v31, %v2432_v32  ;;  %v2491_v32 = vld [vmem:[#allocation10 + $0x310] sm:$0xff] }
 0x6e2   :  { %3235 = vmatpush1.bf16.msra.mxu0 %v7282_v37  ;;  %v2435_v37 = vld [vmem:[#allocation10 + $0x150] sm:$0xff] }
 0x6e3   :  { %3290 = vmatprep.subr.bf16.mxu0 %v7167_v48  ;;  %v7205_v43 = vcombine.high %v2435_v37, %v2439_v38  ;;  %v2447_v48 = vld [vmem:[#allocation10 + $0x1b0] sm:$0xff] }
 0x776   :  { %v2283_v49 = vpop.f32.mrb[22].mxu1 }
 0x777   :  { %v2366_v50 = vrot.slane %v2283_v49, %v9360_v3  ;;  %v2285_v51 = vpop.f32.mrb[23].mxu1  ;;  %v2444_v49 = vld [vmem:[#allocation10 + $0x198] sm:$0xff] }
 0x778   :  { %v2370_v52 = vrot.slane %v2285_v51, %v9360_v3  ;;  %v2358_v53 = vpop.f32.mrb[26].mxu0  ;;  %v7204_v51 = vcombine.low %v2435_v37, %v2439_v38 }
 0x779   :  { %v2371_v54 = vmul.f32 %v2366_v50, %v9654_v23  ;;  %v2373_v55 = vmul.f32 %v2366_v50, %v9658_v25  ;;  %v2378_v56 = vrot.slane %v2358_v53, %v9360_v3  ;;  %v2360_v57 = vpop.f32.mrb[27].mxu0  ;;  %v2403_v23 = vld [vmem:[#allocation10 + $0x50] sm:$0xff]  ;;  %v2448_v50 = vld [vmem:[#allocation10 + $0x1b8] sm:$0xff] }
 0x77a   :  { %v2372_v58 = vmul.f32 %v2370_v52, %v9656_v24  ;;  %v2374_v59 = vmul.f32 %v2370_v52, %v9666_v29  ;;  %v2382_v60 = vrot.slane %v2360_v57, %v9360_v3  ;;  %v2407_v25 = vld [vmem:[#allocation10 + $0x70] sm:$0xff]  ;;  %v7206_v52 = vcombine.low %v2436_v39, %v2440_v40  ;;  %v2452_v57 = vld [vmem:[#allocation10 + $0x1d8] sm:$0xff] }
 0x77b   :  { %v2383_v61 = vsub.f32 %v2371_v54, %v2378_v56  ;;  %v2385_v62 = vsub.f32 %v2373_v55, %v2378_v56  ;;  %v2411_v24 = vld [vmem:[#allocation10 + $0x90] sm:$0xff]  ;;  %v7173_v29 = vcombine.high %v2403_v23, %v2407_v25  ;;  %v7172_v15 = vcombine.low %v2403_v23, %v2407_v25 }
 0x77c   :  { %v2384_v63 = vsub.f32 %v2372_v58, %v2382_v60  ;;  %v2386_v0 = vsub.f32 %v2374_v59, %v2382_v60  ;;  %v7181_v7 = vcombine.high %v2411_v24, %v2415_v12  ;;  %v7180_v21 = vcombine.low %v2411_v24, %v2415_v12  ;;  %v2451_v55 = vld [vmem:[#allocation10 + $0x1d0] sm:$0xff]  ;;  %v2456_v58 = vld [vmem:[#allocation10 + $0x1f8] sm:$0xff] }
 0x77d   :  { %v2387_v1 = vmax.f32 %v2383_v61, 0.0  ;;  %v2389_v2 = vmax.f32 %v2385_v62, 0.0  ;;  %v7215_v54 = vcombine.high %v2444_v49, %v2448_v50  ;;  %v2455_v56 = vld [vmem:[#allocation10 + $0x1f0] sm:$0xff]  ;;  %v7214_v60 = vcombine.low %v2444_v49, %v2448_v50  ;;  %v2472_v24 = vld [vmem:[#allocation10 + $0x278] sm:$0xff] }
 0x77e   :  { %v2388_v4 = vmax.f32 %v2384_v63, 0.0  ;;  %v2390_v5 = vmax.f32 %v2386_v0, 0.0  ;;  %v7221_v61 = vcombine.high %v2451_v55, %v2455_v56  ;;  %v7223_v62 = vcombine.high %v2452_v57, %v2456_v58  ;;  %v2459_v63 = vld [vmem:[#allocation10 + $0x210] sm:$0xff] }
 0x77f   :  { %v9686_v6 = vpack.c.bf16 %v2389_v2, %v2387_v1  ;;  %v2463_v0 = vld [vmem:[#allocation10 + $0x230] sm:$0xff]  ;;  %v2460_v1 = vld [vmem:[#allocation10 + $0x218] sm:$0xff]  ;;  %v7237_v12 = vcombine.high %v2467_v8, %v2471_v9 }
 0x780   :  { %v2392_v10 = vpack.c.bf16 %v2390_v5, %v2388_v4  ;;  %v2464_v2 = vld [vmem:[#allocation10 + $0x238] sm:$0xff]  ;;  %v7220_v4 = vcombine.low %v2451_v55, %v2455_v56  ;;  %v7222_v5 = vcombine.low %v2452_v57, %v2456_v58  ;;  %v7229_v23 = vcombine.high %v2459_v63, %v2463_v0  ;;  %v2507_v50 = vld [vmem:[#allocation10 + $0x390] sm:$0xff] }
 0x781   :  { %v7231_v25 = vcombine.high %v2460_v1, %v2464_v2  ;;  %v2515_v58 = vld [vmem:[#allocation10 + $0x3d0] sm:$0xff] }
 0x782   :  { %3193 = vmatprep.mubr.bf16.mxu1 %v2392_v10  ;;  %3236 = vmatprep.mubr.bf16.mxu0 %v2392_v10 }
 0x783   :  { %3194 = vmatmul.mubr.bf16.vlgmr.msra.gmra.mrb[24].mxu1 %v9686_v6  ;;  %3237 = vmatmul.mubr.bf16.vlgmr.msra.gmra.mrb[28].mxu0 %v9686_v6 }
 0x784   :  { %3248 = vmatpush1.bf16.msra.mxu1 %v7164_v44  ;;  %3291 = vmatpush1.bf16.msra.mxu0 %v7166_v45  ;;  %v7207_v44 = vcombine.high %v2436_v39, %v2440_v40  ;;  %v2443_v45 = vld [vmem:[#allocation10 + $0x190] sm:$0xff] }
 0x785   :  { %3279 = vmatprep.mubr.bf16.mxu1 %v2392_v10  ;;  %3322 = vmatprep.mubr.bf16.mxu0 %v2392_v10  ;;  %v7213_v53 = vcombine.high %v2443_v45, %v2447_v48  ;;  %v7212_v59 = vcombine.low %v2443_v45, %v2447_v48  ;;  %v2468_v10 = vld [vmem:[#allocation10 + $0x258] sm:$0xff]  ;;  %v2499_v40 = vld [vmem:[#allocation10 + $0x350] sm:$0xff] }
 0x786   :  { %3249 = vmatprep.subr.bf16.mxu1 %v7173_v29  ;;  %3292 = vmatprep.subr.bf16.mxu0 %v7175_v11  ;;  %v7228_v29 = vcombine.low %v2459_v63, %v2463_v0  ;;  %v7230_v11 = vcombine.low %v2460_v1, %v2464_v2  ;;  %v7239_v13 = vcombine.high %v2468_v10, %v2472_v24 }
 0x787   :  { %v7238_v18 = vcombine.low %v2468_v10, %v2472_v24 }
 0x788   :  { %3250 = vmatpush1.bf16.msra.mxu1 %v7172_v15  ;;  %3293 = vmatpush1.bf16.msra.mxu0 %v7174_v16  ;;  %v2479_v15 = vld [vmem:[#allocation10 + $0x2b0] sm:$0xff]  ;;  %v2476_v16 = vld [vmem:[#allocation10 + $0x298] sm:$0xff] }
 0x789   :  { %3251 = vmatprep.subr.bf16.mxu1 %v7181_v7  ;;  %3294 = vmatprep.subr.bf16.mxu0 %v7183_v17  ;;  %v2480_v7 = vld [vmem:[#allocation10 + $0x2b8] sm:$0xff]  ;;  %v7236_v17 = vcombine.low %v2467_v8, %v2471_v9  ;;  %v7245_v19 = vcombine.high %v2475_v14, %v2479_v15  ;;  %v3483_v9 = vld [vmem:[%s10501_s10 + $0x8] sm:$0xff] }
 0x78a   :  { %v7247_v47 = vcombine.high %v2476_v16, %v2480_v7  ;;  %v7246_v27 = vcombine.low %v2476_v16, %v2480_v7 }
 0x78c   :  { %3252 = vmatpush1.bf16.msra.mxu1 %v7180_v21  ;;  %3295 = vmatpush1.bf16.msra.mxu0 %v7182_v20  ;;  %v2487_v21 = vld [vmem:[#allocation10 + $0x2f0] sm:$0xff]  ;;  %v2484_v20 = vld [vmem:[#allocation10 + $0x2d8] sm:$0xff] }
 0x78d   :  { %3253 = vmatprep.subr.bf16.mxu1 %v7189_v22  ;;  %3296 = vmatprep.subr.bf16.mxu0 %v7191_v26  ;;  %v2488_v22 = vld [vmem:[#allocation10 + $0x2f8] sm:$0xff]  ;;  %v7244_v26 = vcombine.low %v2475_v14, %v2479_v15  ;;  %v7253_v28 = vcombine.high %v2483_v46, %v2487_v21 }
 0x78e   :  { %v7255_v31 = vcombine.high %v2484_v20, %v2488_v22  ;;  %v7254_v37 = vcombine.low %v2484_v20, %v2488_v22 }
 0x790   :  { %3254 = vmatpush1.bf16.msra.mxu1 %v7188_v33  ;;  %3297 = vmatpush1.bf16.msra.mxu0 %v7190_v34  ;;  %v2495_v33 = vld [vmem:[#allocation10 + $0x330] sm:$0xff]  ;;  %v2492_v34 = vld [vmem:[#allocation10 + $0x318] sm:$0xff] }
 0x791   :  { %3255 = vmatprep.subr.bf16.mxu1 %v7197_v35  ;;  %3298 = vmatprep.subr.bf16.mxu0 %v7199_v36  ;;  %v2496_v35 = vld [vmem:[#allocation10 + $0x338] sm:$0xff]  ;;  %v7252_v36 = vcombine.low %v2483_v46, %v2487_v21  ;;  %v7261_v38 = vcombine.high %v2491_v32, %v2495_v33 }
 0x792   :  { %v7263_v39 = vcombine.high %v2492_v34, %v2496_v35  ;;  %v7262_v45 = vcombine.low %v2492_v34, %v2496_v35  ;;  %v3333_v34 = vld [vmem:[#allocation11] sm:$0xff]  ;;  %v3334_v35 = vld [vmem:[#allocation11 + $0x8] sm:$0xff] }
 0x794   :  { %3256 = vmatpush1.bf16.msra.mxu1 %v7196_v41  ;;  %3299 = vmatpush1.bf16.msra.mxu0 %v7198_v42  ;;  %v2503_v41 = vld [vmem:[#allocation10 + $0x370] sm:$0xff]  ;;  %v2500_v42 = vld [vmem:[#allocation10 + $0x358] sm:$0xff] }
 0x795   :  { %3257 = vmatprep.subr.bf16.mxu1 %v7205_v43  ;;  %3300 = vmatprep.subr.bf16.mxu0 %v7207_v44  ;;  %v2504_v43 = vld [vmem:[#allocation10 + $0x378] sm:$0xff]  ;;  %v7260_v44 = vcombine.low %v2491_v32, %v2495_v33  ;;  %v7269_v48 = vcombine.high %v2499_v40, %v2503_v41 }
 0x796   :  { %v7271_v49 = vcombine.high %v2500_v42, %v2504_v43  ;;  %v7270_v55 = vcombine.low %v2500_v42, %v2504_v43  ;;  %v3485_v42 = vld [vmem:[%s10501_s10 + $0x18] sm:$0xff] }
 0x798   :  { %3258 = vmatpush1.bf16.msra.mxu1 %v7204_v51  ;;  %3301 = vmatpush1.bf16.msra.mxu0 %v7206_v52  ;;  %v2511_v51 = vld [vmem:[#allocation10 + $0x3b0] sm:$0xff]  ;;  %v2508_v52 = vld [vmem:[#allocation10 + $0x398] sm:$0xff] }
 0x799   :  { %3259 = vmatprep.subr.bf16.mxu1 %v7213_v53  ;;  %3302 = vmatprep.subr.bf16.mxu0 %v7215_v54  ;;  %v2512_v53 = vld [vmem:[#allocation10 + $0x3b8] sm:$0xff]  ;;  %v7268_v54 = vcombine.low %v2499_v40, %v2503_v41  ;;  %v7277_v56 = vcombine.high %v2507_v50, %v2511_v51  ;;  %v3484_v41 = vld [vmem:[%s10501_s10 + $0x10] sm:$0xff] }
 0x79a   :  { %v7279_v57 = vcombine.high %v2508_v52, %v2512_v53  ;;  %v7278_v63 = vcombine.low %v2508_v52, %v2512_v53  ;;  %v8110_v43 = vpack.c.bf16 %v3485_v42, %v3484_v41  ;;  %v3504_v52 = vld [vmem:[%s10501_s10 + $0xb0] sm:$0xff]  ;;  %v3505_v53 = vld [vmem:[%s10501_s10 + $0xb8] sm:$0xff] }
 0x79c   :  { %3260 = vmatpush1.bf16.msra.mxu1 %v7212_v59  ;;  %3303 = vmatpush1.bf16.msra.mxu0 %v7214_v60  ;;  %v2519_v59 = vld [vmem:[#allocation10 + $0x3f0] sm:$0xff]  ;;  %v2516_v60 = vld [vmem:[#allocation10 + $0x3d8] sm:$0xff] }
 0x79d   :  { %3261 = vmatprep.subr.bf16.mxu1 %v7221_v61  ;;  %3304 = vmatprep.subr.bf16.mxu0 %v7223_v62  ;;  %v2520_v61 = vld [vmem:[#allocation10 + $0x3f8] sm:$0xff]  ;;  %v7276_v62 = vcombine.low %v2507_v50, %v2511_v51  ;;  %v7285_v0 = vcombine.high %v2515_v58, %v2519_v59  ;;  %v7284_v2 = vcombine.low %v2515_v58, %v2519_v59  ;;  %v3487_v50 = vld [vmem:[%s10501_s10 + $0x28] sm:$0xff]  ;;  %v3506_v58 = vld [vmem:[%s10501_s10 + $0xc0] sm:$0xff] }
 0x79e   :  { %v7287_v1 = vcombine.high %v2516_v60, %v2520_v61  ;;  %v3507_v59 = vld [vmem:[%s10501_s10 + $0xc8] sm:$0xff] }
 0x7a0   :  { %3262 = vmatpush1.bf16.msra.mxu1 %v7220_v4  ;;  %3305 = vmatpush1.bf16.msra.mxu0 %v7222_v5  ;;  %v7286_v4 = vcombine.low %v2516_v60, %v2520_v61  ;;  %v3498_v5 = vld [vmem:[%s10501_s10 + $0x80] sm:$0xff]  ;;  %v8120_v60 = vpack.c.bf16 %v3507_v59, %v3506_v58 }
 0x7a1   :  { %3263 = vmatprep.subr.bf16.mxu1 %v7229_v23  ;;  %3306 = vmatprep.subr.bf16.mxu0 %v7231_v25  ;;  %v3499_v23 = vld [vmem:[%s10501_s10 + $0x88] sm:$0xff]  ;;  %v3482_v25 = vld [vmem:[%s10501_s10] sm:$0xff] }
 0x7a2   :  { %v8104_v8 = vpack.c.bf16 %v3499_v23, %v3498_v5  ;;  %v3490_v61 = vld [vmem:[%s10501_s10 + $0x40] sm:$0xff]  ;;  %v3493_v5 = vld [vmem:[%s10501_s10 + $0x58] sm:$0xff] }
 0x7a4   :  { %3264 = vmatpush1.bf16.msra.mxu1 %v7228_v29  ;;  %3307 = vmatpush1.bf16.msra.mxu0 %v7230_v11 }
 0x7a5   :  { %3265 = vmatprep.subr.bf16.mxu1 %v7237_v12  ;;  %3308 = vmatprep.subr.bf16.mxu0 %v7239_v13 }
 0x7a8   :  { %3266 = vmatpush1.bf16.msra.mxu1 %v7236_v17  ;;  %3309 = vmatpush1.bf16.msra.mxu0 %v7238_v18 }
 0x7a9   :  { %3267 = vmatprep.subr.bf16.mxu1 %v7245_v19  ;;  %3310 = vmatprep.subr.bf16.mxu0 %v7247_v47 }
 0x7ac   :  { %3268 = vmatpush1.bf16.msra.mxu1 %v7244_v26  ;;  %3311 = vmatpush1.bf16.msra.mxu0 %v7246_v27 }
 0x7ad   :  { %3269 = vmatprep.subr.bf16.mxu1 %v7253_v28  ;;  %3312 = vmatprep.subr.bf16.mxu0 %v7255_v31 }
 0x7b0   :  { %3270 = vmatpush1.bf16.msra.mxu1 %v7252_v36  ;;  %3313 = vmatpush1.bf16.msra.mxu0 %v7254_v37  ;;  %v3335_v36 = vld [vmem:[#allocation11 + $0x10] sm:$0xff]  ;;  %v3336_v37 = vld [vmem:[#allocation11 + $0x18] sm:$0xff] }
 0x7b1   :  { %3271 = vmatprep.subr.bf16.mxu1 %v7261_v38  ;;  %3314 = vmatprep.subr.bf16.mxu0 %v7263_v39  ;;  %v3500_v38 = vld [vmem:[%s10501_s10 + $0x90] sm:$0xff]  ;;  %v3501_v39 = vld [vmem:[%s10501_s10 + $0x98] sm:$0xff] }
 0x7b2   :  { %v8108_v40 = vpack.c.bf16 %v3501_v39, %v3500_v38 }
 0x7b4   :  { %3272 = vmatpush1.bf16.msra.mxu1 %v7260_v44  ;;  %3315 = vmatpush1.bf16.msra.mxu0 %v7262_v45  ;;  %v3502_v44 = vld [vmem:[%s10501_s10 + $0xa0] sm:$0xff]  ;;  %v3503_v45 = vld [vmem:[%s10501_s10 + $0xa8] sm:$0xff] }
 0x7b5   :  { %3273 = vmatprep.subr.bf16.mxu1 %v7269_v48  ;;  %3316 = vmatprep.subr.bf16.mxu0 %v7271_v49  ;;  %v8112_v48 = vpack.c.bf16 %v3503_v45, %v3502_v44  ;;  %v3486_v49 = vld [vmem:[%s10501_s10 + $0x20] sm:$0xff] }
 0x7b6   :  { %v8114_v51 = vpack.c.bf16 %v3487_v50, %v3486_v49 }
 0x7b8   :  { %3274 = vmatpush1.bf16.msra.mxu1 %v7268_v54  ;;  %3317 = vmatpush1.bf16.msra.mxu0 %v7270_v55  ;;  %v8116_v54 = vpack.c.bf16 %v3505_v53, %v3504_v52  ;;  %v3488_v55 = vld [vmem:[%s10501_s10 + $0x30] sm:$0xff] }
 0x7b9   :  { %3275 = vmatprep.subr.bf16.mxu1 %v7277_v56  ;;  %3318 = vmatprep.subr.bf16.mxu0 %v7279_v57  ;;  %v3489_v56 = vld [vmem:[%s10501_s10 + $0x38] sm:$0xff] }
 0x7ba   :  { %v8118_v57 = vpack.c.bf16 %v3489_v56, %v3488_v55 }
 0x7bc   :  { %3276 = vmatpush1.bf16.msra.mxu1 %v7276_v62  ;;  %3319 = vmatpush1.bf16.msra.mxu0 %v7278_v63  ;;  %v3491_v62 = vld [vmem:[%s10501_s10 + $0x48] sm:$0xff] }
 0x7bd   :  { %3277 = vmatprep.subr.bf16.mxu1 %v7285_v0  ;;  %3320 = vmatprep.subr.bf16.mxu0 %v7287_v1  ;;  %v8122_v63 = vpack.c.bf16 %v3491_v62, %v3490_v61  ;;  %v3508_v0 = vld [vmem:[%s10501_s10 + $0xd0] sm:$0xff]  ;;  %v3509_v1 = vld [vmem:[%s10501_s10 + $0xd8] sm:$0xff] }
 0x7c0   :  { %3278 = vmatpush1.bf16.msra.mxu1 %v7284_v2  ;;  %3321 = vmatpush1.bf16.msra.mxu0 %v7286_v4  ;;  %v8124_v2 = vpack.c.bf16 %v3509_v1, %v3508_v0  ;;  %v3492_v4 = vld [vmem:[%s10501_s10 + $0x50] sm:$0xff] }
 0x7c1   :  { %8105 = vmatprep.subr.bf16.mxu0 %v8104_v8  ;;  %v8126_v23 = vpack.c.bf16 %v3493_v5, %v3492_v4 }
 0x7c3   :  { %3280 = vmatmul.mubr.bf16.vlgmr.msra.gmra.mrb[28].mxu1 %v9686_v6  ;;  %3323 = vmatmul.mubr.bf16.vlgmr.msra.gmra.mrb[32].mxu0 %v9686_v6  ;;  %v8106_v6 = vpack.c.bf16 %v3483_v9, %v3482_v25  ;;  %v3510_v25 = vld [vmem:[%s10501_s10 + $0xe0] sm:$0xff] }
 0x7c4   :  { %3413 = vmatprep.mubr.f32.mxu1 %v8727_v30 }
 0x7c5   :  { %8107 = vmatpush3.bf16.msra.mxu0 %v8106_v6 }
 0x7c6   :  { %8109 = vmatprep.subr.bf16.mxu0 %v8108_v40 }
 0x7c9   :  { %8111 = vmatpush3.bf16.msra.mxu0 %v8110_v43 }
 0x7ca   :  { %8113 = vmatprep.subr.bf16.mxu0 %v8112_v48 }
 0x7cd   :  { %8115 = vmatpush3.bf16.msra.mxu0 %v8114_v51 }
 0x7ce   :  { %8117 = vmatprep.subr.bf16.mxu0 %v8116_v54 }
 0x7d1   :  { %8119 = vmatpush3.bf16.msra.mxu0 %v8118_v57 }
 0x7d2   :  { %8121 = vmatprep.subr.bf16.mxu0 %v8120_v60 }
 0x7d5   :  { %8123 = vmatpush3.bf16.msra.mxu0 %v8122_v63 }
 0x7d6   :  { %8125 = vmatprep.subr.bf16.mxu0 %v8124_v2 }
 0x7d9   :  { %8127 = vmatpush3.bf16.msra.mxu0 %v8126_v23 }
 0x856   :  { %v3195_v10 = vpop.f32.mrb[24].mxu1  ;;  %v3238_v24 = vpop.f32.mrb[28].mxu0 }
 0x857   :  { %v3197_v29 = vpop.f32.mrb[25].mxu1  ;;  %v3240_v11 = vpop.f32.mrb[29].mxu0 }
 0x858   :  { %v3199_v12 = vpop.f32.mrb[26].mxu1  ;;  %v3242_v13 = vpop.f32.mrb[30].mxu0 }
 0x859   :  { %v8090_v14 = vpack.c.bf16 %v3199_v12, %v3195_v10  ;;  %v8094_v15 = vpack.c.bf16 %v3242_v13, %v3238_v24  ;;  %v3201_v16 = vpop.f32.mrb[27].mxu1  ;;  %v3244_v7 = vpop.f32.mrb[31].mxu0  ;;  %v3495_v10 = vld [vmem:[%s10501_s10 + $0x68] sm:$0xff]  ;;  %v3496_v13 = vld [vmem:[%s10501_s10 + $0x70] sm:$0xff] }
 0x85a   :  { %v8088_v17 = vpack.c.bf16 %v3201_v16, %v3197_v29  ;;  %v8092_v18 = vpack.c.bf16 %v3244_v7, %v3240_v11  ;;  %v3512_v29 = vld [vmem:[%s10501_s10 + $0xf0] sm:$0xff]  ;;  %v3513_v11 = vld [vmem:[%s10501_s10 + $0xf8] sm:$0xff] }
 0x85b   :  { %v8132_v12 = vpack.c.bf16 %v3513_v11, %v3512_v29  ;;  %v3662_v29 = vld [vmem:[#allocation13 + $0x10] sm:$0xff] }
 0x85c   :  { %8089 = vmatprep.subr.bf16.mxu1 %v8088_v17 }
 0x85d   :  { %8091 = vmatpush1.bf16.msra.mxu1 %v8090_v14  ;;  %v3497_v14 = vld [vmem:[%s10501_s10 + $0x78] sm:$0xff] }
 0x85e   :  { %8093 = vmatprep.subr.bf16.mxu1 %v8092_v18 }
 0x861   :  { %8095 = vmatpush1.bf16.msra.mxu1 %v8094_v15  ;;  %v8134_v15 = vpack.c.bf16 %v3497_v14, %v3496_v13  ;;  %v3862_v13 = vld [vmem:[#allocation14 + $0x28] sm:$0xff] }
 0x896   :  { %v3281_v19 = vpop.f32.mrb[28].mxu1  ;;  %v3324_v47 = vpop.f32.mrb[32].mxu0 }
 0x897   :  { %v3283_v46 = vpop.f32.mrb[29].mxu1  ;;  %v3326_v21 = vpop.f32.mrb[33].mxu0 }
 0x898   :  { %v3285_v20 = vpop.f32.mrb[30].mxu1  ;;  %v3328_v22 = vpop.f32.mrb[34].mxu0 }
 0x899   :  { %v8098_v26 = vpack.c.bf16 %v3285_v20, %v3281_v19  ;;  %v8102_v27 = vpack.c.bf16 %v3328_v22, %v3324_v47  ;;  %v3287_v28 = vpop.f32.mrb[31].mxu1  ;;  %v3330_v31 = vpop.f32.mrb[35].mxu0 }
 0x89a   :  { %v8096_v32 = vpack.c.bf16 %v3287_v28, %v3283_v46  ;;  %v8100_v33 = vpack.c.bf16 %v3330_v31, %v3326_v21 }
 0x89c   :  { %8097 = vmatprep.subr.bf16.mxu1 %v8096_v32 }
 0x89d   :  { %8099 = vmatpush1.bf16.msra.mxu1 %v8098_v26 }
 0x89e   :  { %8101 = vmatprep.subr.bf16.mxu1 %v8100_v33 }
 0x8a1   :  { %8103 = vmatpush1.bf16.msra.mxu1 %v8102_v27 }
 0x8a2   :  { %8137 = vmatprep.subr.bf16.mxu1 %v8104_v8  ;;  %v3511_v8 = vld [vmem:[%s10501_s10 + $0xe8] sm:$0xff] }
 0x8a3   :  { %v8128_v9 = vpack.c.bf16 %v3511_v8, %v3510_v25 }
 0x8a4   :  { %7288 = vmatmul.mubr.msk.f32.vlgmr.msra.gmra.mrb[32].mxu1 %vm804_vm2, %v3333_v34 }
 0x8a5   :  { %3419 = vmatprep.mubr.f32.mxu1 %v8727_v30  ;;  %8139 = vmatpush3.bf16.msra.mxu1 %v8106_v6  ;;  %v3494_v6 = vld [vmem:[%s10501_s10 + $0x60] sm:$0xff] }
 0x8a6   :  { %8141 = vmatprep.subr.bf16.mxu1 %v8108_v40  ;;  %v8130_v24 = vpack.c.bf16 %v3495_v10, %v3494_v6  ;;  %8129 = vmatprep.subr.bf16.mxu0 %v8128_v9  ;;  %v3663_v6 = vld [vmem:[#allocation13 + $0x18] sm:$0xff]  ;;  %v3660_v10 = vld [vmem:[#allocation13] sm:$0xff] }
 0x8a7   :  { %v9837_v11 = vpack.c.bf16 %v3662_v29, %v3660_v10 }
 0x8a8   :  { %7289 = vmatmul.mubr.msk.f32.gmra.mrb[34].mxu1 %vm804_vm2, %v3334_v35  ;;  %8131 = vmatpush3.bf16.msra.mxu0 %v8130_v24 }
 0x8a9   :  { %3425 = vmatprep.mubr.f32.mxu1 %v8727_v30  ;;  %8143 = vmatpush3.bf16.msra.mxu1 %v8110_v43 }
 0x8aa   :  { %8145 = vmatprep.subr.bf16.mxu1 %v8112_v48  ;;  %8133 = vmatprep.subr.bf16.mxu0 %v8132_v12 }
 0x8ac   :  { %7290 = vmatmul.mubr.msk.f32.gmra.mrb[36].mxu1 %vm804_vm2, %v3335_v36  ;;  %8135 = vmatpush3.bf16.msra.mxu0 %v8134_v15 }
 0x8ad   :  { %3431 = vmatprep.mubr.f32.mxu1 %v8727_v30  ;;  %8147 = vmatpush3.bf16.msra.mxu1 %v8114_v51 }
 0x8ae   :  { %8149 = vmatprep.subr.bf16.mxu1 %v8116_v54 }
 0x8b0   :  { %7291 = vmatmul.mubr.msk.f32.gmra.mrb[38].mxu1 %vm804_vm2, %v3336_v37 }
 0x8b1   :  { %8151 = vmatpush3.bf16.msra.mxu1 %v8118_v57 }
 0x8b2   :  { %8153 = vmatprep.subr.bf16.mxu1 %v8120_v60 }
 0x8b5   :  { %8155 = vmatpush3.bf16.msra.mxu1 %v8122_v63 }
 0x8b6   :  { %8157 = vmatprep.subr.bf16.mxu1 %v8124_v2 }
 0x8b9   :  { %8159 = vmatpush3.bf16.msra.mxu1 %v8126_v23 }
 0x8ba   :  { %8161 = vmatprep.subr.bf16.mxu1 %v8128_v9  ;;  %v3661_v9 = vld [vmem:[#allocation13 + $0x8] sm:$0xff] }
 0x8bd   :  { %8163 = vmatpush3.bf16.msra.mxu1 %v8130_v24  ;;  %v8168_v24 = vpack.c.bf16 %v3663_v6, %v3661_v9  ;;  %v3954_v9 = vld [vmem:[#allocation14 + $0x308] sm:$0xff] }
 0x8be   :  { %8165 = vmatprep.subr.bf16.mxu1 %v8132_v12  ;;  %v3858_v12 = vld [vmem:[#allocation14 + $0x8] sm:$0xff] }
 0x8bf   :  { %8169 = vmatprep.subr.bf16.mxu0 %v8168_v24  ;;  %v7296_v14 = vcombine.low %v3858_v12, %v3862_v13  ;;  %v3958_v6 = vld [vmem:[#allocation14 + $0x328] sm:$0xff] }
 0x8c0   :  { %v7393_v10 = vcombine.high %v3954_v9, %v3958_v6 }
 0x8c1   :  { %8167 = vmatpush3.bf16.msra.mxu1 %v8134_v15  ;;  %v7297_v15 = vcombine.high %v3858_v12, %v3862_v13 }
 0x8c3   :  { %4678 = vmatprep.subr.bf16.mxu1 %v7297_v15 }
 0x977   :  { %v9796_v16 = vpop.f32.mrb[32].mxu1 }
 0x978   :  { %v9798_v7 = vpop.f32.mrb[33].mxu1  ;;  %v3456_v18 = vmul.f32 %v9796_v16, %v9796_v16 }
 0x979   :  { %v3457_v21 = vmul.f32 %v9798_v7, %v9798_v7 }
 0x97b   :  { %v9800_v17 = vpop.f32.mrb[34].mxu1 }
 0x97c   :  { %v3438_v19 = vadd.f32 %v9800_v17, %v9796_v16  ;;  %v3458_v47 = vmul.f32 %v9800_v17, %v9800_v17  ;;  %v9808_v46 = vpop.f32.mrb[35].mxu1 }
 0x97d   :  { %v3447_v20 = vadd.f32 %v9808_v46, %v9798_v7  ;;  %v3459_v22 = vmul.f32 %v9808_v46, %v9808_v46 }
 0x97e   :  { %v3464_v26 = vadd.f32 %v3458_v47, %v3456_v18  ;;  %v3866_v18 = vld [vmem:[#allocation14 + $0x48] sm:$0xff] }
 0x97f   :  { %v3473_v27 = vadd.f32 %v3459_v22, %v3457_v21  ;;  %v9816_v28 = vpop.f32.mrb[36].mxu1  ;;  %v3878_v22 = vld [vmem:[#allocation14 + $0xa8] sm:$0xff] }
 0x980   :  { %v3439_v31 = vadd.f32 %v3438_v19, %v9816_v28  ;;  %v3460_v32 = vmul.f32 %v9816_v28, %v9816_v28  ;;  %v9821_v33 = vpop.f32.mrb[37].mxu1  ;;  %v3870_v19 = vld [vmem:[#allocation14 + $0x68] sm:$0xff] }
 0x981   :  { %v3448_v34 = vadd.f32 %v3447_v20, %v9821_v33  ;;  %v3461_v35 = vmul.f32 %v9821_v33, %v9821_v33  ;;  %v7305_v47 = vcombine.high %v3866_v18, %v3870_v19  ;;  %v7304_v21 = vcombine.low %v3866_v18, %v3870_v19  ;;  %v3874_v20 = vld [vmem:[#allocation14 + $0x88] sm:$0xff] }
 0x982   :  { %v3465_v36 = vadd.f32 %v3464_v26, %v3460_v32  ;;  %v7313_v26 = vcombine.high %v3874_v20, %v3878_v22  ;;  %v3886_v32 = vld [vmem:[#allocation14 + $0xe8] sm:$0xff] }
 0x983   :  { %v3474_v37 = vadd.f32 %v3473_v27, %v3461_v35  ;;  %v9826_v38 = vpop.f32.mrb[38].mxu1  ;;  %v7312_v27 = vcombine.low %v3874_v20, %v3878_v22 }
 0x984   :  { %v3440_v39 = vadd.f32 %v3439_v31, %v9826_v38  ;;  %v3462_v40 = vmul.f32 %v9826_v38, %v9826_v38  ;;  %v9831_v41 = vpop.f32.mrb[39].mxu1  ;;  %v3882_v31 = vld [vmem:[#allocation14 + $0xc8] sm:$0xff] }
 0x985   :  { %v3449_v42 = vadd.f32 %v3448_v34, %v9831_v41  ;;  %v3463_v43 = vmul.f32 %v9831_v41, %v9831_v41  ;;  %v7321_v34 = vcombine.high %v3882_v31, %v3886_v32  ;;  %v7320_v35 = vcombine.low %v3882_v31, %v3886_v32 }
 0x986   :  { %v3441_v44 = vrot.slane %v3440_v39, 4  ;;  %v3466_v45 = vadd.f32 %v3465_v36, %v3462_v40  ;;  %v3890_v36 = vld [vmem:[#allocation14 + $0x108] sm:$0xff] }
 0x987   :  { %v3450_v48 = vrot.slane %v3449_v42, 4  ;;  %v3475_v49 = vadd.f32 %v3474_v37, %v3463_v43  ;;  %v3894_v37 = vld [vmem:[#allocation14 + $0x128] sm:$0xff] }
 0x988   :  { %v3442_v50 = vadd.f32 %v3441_v44, %v3440_v39  ;;  %v3467_v51 = vrot.slane %v3466_v45, 4  ;;  %v7329_v39 = vcombine.high %v3890_v36, %v3894_v37  ;;  %v7328_v40 = vcombine.low %v3890_v36, %v3894_v37  ;;  %v3902_v43 = vld [vmem:[#allocation14 + $0x168] sm:$0xff] }
 0x989   :  { %v3451_v52 = vadd.f32 %v3450_v48, %v3449_v42  ;;  %v3476_v53 = vrot.slane %v3475_v49, 4  ;;  %v3898_v42 = vld [vmem:[#allocation14 + $0x148] sm:$0xff] }
 0x98a   :  { %v3443_v54 = vrot.slane %v3442_v50, 2  ;;  %v3468_v55 = vadd.f32 %v3467_v51, %v3466_v45  ;;  %v7337_v44 = vcombine.high %v3898_v42, %v3902_v43  ;;  %v7336_v45 = vcombine.low %v3898_v42, %v3902_v43  ;;  %v3906_v48 = vld [vmem:[#allocation14 + $0x188] sm:$0xff]  ;;  %v3877_v42 = vld [vmem:[#allocation14 + $0xa0] sm:$0xff] }
 0x98b   :  { %v3452_v56 = vrot.slane %v3451_v52, 2  ;;  %v3477_v57 = vadd.f32 %v3476_v53, %v3475_v49  ;;  %v3910_v49 = vld [vmem:[#allocation14 + $0x1a8] sm:$0xff] }
 0x98c   :  { %v3444_v58 = vadd.f32 %v3443_v54, %v3442_v50  ;;  %v3469_v59 = vrot.slane %v3468_v55, 2  ;;  %v7345_v50 = vcombine.high %v3906_v48, %v3910_v49  ;;  %v7344_v51 = vcombine.low %v3906_v48, %v3910_v49  ;;  %v3918_v53 = vld [vmem:[#allocation14 + $0x1e8] sm:$0xff]  ;;  %v3885_v48 = vld [vmem:[#allocation14 + $0xe0] sm:$0xff] }
 0x98d   :  { %v3453_v60 = vadd.f32 %v3452_v56, %v3451_v52  ;;  %v3478_v61 = vrot.slane %v3477_v57, 2  ;;  %v3914_v52 = vld [vmem:[#allocation14 + $0x1c8] sm:$0xff] }
 0x98e   :  { %v3470_v62 = vadd.f32 %v3469_v59, %v3468_v55  ;;  %v3445_v63 = vrot.slane %v3444_v58, 1  ;;  %v7353_v54 = vcombine.high %v3914_v52, %v3918_v53  ;;  %v7352_v55 = vcombine.low %v3914_v52, %v3918_v53  ;;  %v3922_v56 = vld [vmem:[#allocation14 + $0x208] sm:$0xff] }
 0x98f   :  { %v3454_v0 = vrot.slane %v3453_v60, 1  ;;  %v3479_v1 = vadd.f32 %v3478_v61, %v3477_v57  ;;  %v3926_v57 = vld [vmem:[#allocation14 + $0x228] sm:$0xff] }
 0x990   :  { %v3471_v2 = vrot.slane %v3470_v62, 1  ;;  %v3446_v23 = vadd.f32 %v3445_v63, %v3444_v58  ;;  %v7361_v58 = vcombine.high %v3922_v56, %v3926_v57  ;;  %v7360_v59 = vcombine.low %v3922_v56, %v3926_v57  ;;  %v3934_v61 = vld [vmem:[#allocation14 + $0x268] sm:$0xff] }
 0x991   :  { %v3455_v4 = vadd.f32 %v3454_v0, %v3453_v60  ;;  %v3480_v5 = vrot.slane %v3479_v1, 1  ;;  %v3930_v60 = vld [vmem:[#allocation14 + $0x248] sm:$0xff] }
 0x992   :  { %v3472_v8 = vadd.f32 %v3471_v2, %v3470_v62  ;;  %v7369_v62 = vcombine.high %v3930_v60, %v3934_v61  ;;  %v7368_v63 = vcombine.low %v3930_v60, %v3934_v61  ;;  %v3938_v0 = vld [vmem:[#allocation14 + $0x288] sm:$0xff] }
 0x993   :  { %3578 = vmatprep.mubr.f32.mxu0 %v3455_v4  ;;  %v3481_v25 = vadd.f32 %v3480_v5, %v3479_v1  ;;  %v3942_v1 = vld [vmem:[#allocation14 + $0x2a8] sm:$0xff] }
 0x994   :  { %3579 = vmatmul.mubr.f32.vlgmr.msra.gmra.mrb[36].mxu0 %v3446_v23  ;;  %v7377_v2 = vcombine.high %v3938_v0, %v3942_v1  ;;  %v7376_v4 = vcombine.low %v3938_v0, %v3942_v1  ;;  %v3946_v5 = vld [vmem:[#allocation14 + $0x2c8] sm:$0xff] }
 0x995   :  { %3649 = vmatprep.mubr.f32.mxu1 %v3481_v25  ;;  %3731 = vmatprep.mubr.f32.mxu0 %v8727_v30  ;;  %v3950_v23 = vld [vmem:[#allocation14 + $0x2e8] sm:$0xff] }
 0x996   :  { %3650 = vmatmul.mubr.f32.vlgmr.msra.gmra.mrb[40].mxu1 %v3472_v8  ;;  %8171 = vmatpush1.bf16.msra.mxu0 %v9837_v11  ;;  %v7385_v25 = vcombine.high %v3946_v5, %v3950_v23  ;;  %v7384_v8 = vcombine.low %v3946_v5, %v3950_v23 }
 0x997   :  { %8173 = vmatprep.subr.bf16.mxu0 %v8168_v24  ;;  %4679 = vmatpush1.bf16.msra.mxu1 %v7296_v14  ;;  %v7392_v24 = vcombine.low %v3954_v9, %v3958_v6 }
 0x998   :  { %4680 = vmatprep.subr.bf16.mxu1 %v7305_v47 }
 0x99b   :  { %4681 = vmatpush1.bf16.msra.mxu1 %v7304_v21 }
 0x99c   :  { %4682 = vmatprep.subr.bf16.mxu1 %v7313_v26  ;;  %v3857_v26 = vld [vmem:[#allocation14] sm:$0xff] }
 0x99f   :  { %4683 = vmatpush1.bf16.msra.mxu1 %v7312_v27  ;;  %v3861_v27 = vld [vmem:[#allocation14 + $0x20] sm:$0xff] }
 0x9a0   :  { %4684 = vmatprep.subr.bf16.mxu1 %v7321_v34  ;;  %v7295_v31 = vcombine.high %v3857_v26, %v3861_v27  ;;  %v3865_v34 = vld [vmem:[#allocation14 + $0x40] sm:$0xff]  ;;  %v7294_v37 = vcombine.low %v3857_v26, %v3861_v27 }
 0x9a1   :  { %v3961_v26 = vld [vmem:[#allocation14 + $0x340] sm:$0xff] }
 0x9a2   :  { %v3965_v27 = vld [vmem:[#allocation14 + $0x360] sm:$0xff] }
 0x9a3   :  { %4685 = vmatpush1.bf16.msra.mxu1 %v7320_v35  ;;  %v3869_v35 = vld [vmem:[#allocation14 + $0x60] sm:$0xff] }
 0x9a4   :  { %4686 = vmatprep.subr.bf16.mxu1 %v7329_v39  ;;  %v7303_v39 = vcombine.high %v3865_v34, %v3869_v35  ;;  %v7302_v43 = vcombine.low %v3865_v34, %v3869_v35  ;;  %v3966_v34 = vld [vmem:[#allocation14 + $0x368] sm:$0xff]  ;;  %v7398_v35 = vcombine.low %v3961_v26, %v3965_v27 }
 0x9a7   :  { %4687 = vmatpush1.bf16.msra.mxu1 %v7328_v40  ;;  %v3873_v40 = vld [vmem:[#allocation14 + $0x80] sm:$0xff] }
 0x9a8   :  { %4688 = vmatprep.subr.bf16.mxu1 %v7337_v44  ;;  %v7311_v44 = vcombine.high %v3873_v40, %v3877_v42  ;;  %v7310_v49 = vcombine.low %v3873_v40, %v3877_v42  ;;  %v3973_v40 = vld [vmem:[#allocation14 + $0x3a0] sm:$0xff]  ;;  %v3970_v42 = vld [vmem:[#allocation14 + $0x388] sm:$0xff] }
 0x9ab   :  { %4689 = vmatpush1.bf16.msra.mxu1 %v7336_v45  ;;  %v3881_v45 = vld [vmem:[#allocation14 + $0xc0] sm:$0xff] }
 0x9ac   :  { %4690 = vmatprep.subr.bf16.mxu1 %v7345_v50  ;;  %v7319_v50 = vcombine.high %v3881_v45, %v3885_v48  ;;  %v7318_v52 = vcombine.low %v3881_v45, %v3885_v48 }
 0x9af   :  { %4691 = vmatpush1.bf16.msra.mxu1 %v7344_v51  ;;  %v3893_v51 = vld [vmem:[#allocation14 + $0x120] sm:$0xff] }
 0x9b0   :  { %4692 = vmatprep.subr.bf16.mxu1 %v7353_v54  ;;  %v3897_v54 = vld [vmem:[#allocation14 + $0x140] sm:$0xff] }
 0x9b3   :  { %4693 = vmatpush1.bf16.msra.mxu1 %v7352_v55  ;;  %v3901_v55 = vld [vmem:[#allocation14 + $0x160] sm:$0xff] }
 0x9b4   :  { %4694 = vmatprep.subr.bf16.mxu1 %v7361_v58  ;;  %v7335_v57 = vcombine.high %v3897_v54, %v3901_v55  ;;  %v3905_v58 = vld [vmem:[#allocation14 + $0x180] sm:$0xff]  ;;  %v7334_v60 = vcombine.low %v3897_v54, %v3901_v55 }
 0x9b7   :  { %4695 = vmatpush1.bf16.msra.mxu1 %v7360_v59  ;;  %v3909_v59 = vld [vmem:[#allocation14 + $0x1a0] sm:$0xff] }
 0x9b8   :  { %4696 = vmatprep.subr.bf16.mxu1 %v7369_v62  ;;  %v7343_v61 = vcombine.high %v3905_v58, %v3909_v59  ;;  %v3913_v62 = vld [vmem:[#allocation14 + $0x1c0] sm:$0xff]  ;;  %v7342_v0 = vcombine.low %v3905_v58, %v3909_v59  ;;  %v3863_v58 = vld [vmem:[#allocation14 + $0x30] sm:$0xff]  ;;  %v3860_v59 = vld [vmem:[#allocation14 + $0x18] sm:$0xff] }
 0x9bb   :  { %4697 = vmatpush1.bf16.msra.mxu1 %v7368_v63  ;;  %v3917_v63 = vld [vmem:[#allocation14 + $0x1e0] sm:$0xff] }
 0x9bc   :  { %4698 = vmatprep.subr.bf16.mxu1 %v7377_v2  ;;  %v7351_v1 = vcombine.high %v3913_v62, %v3917_v63  ;;  %v3921_v2 = vld [vmem:[#allocation14 + $0x200] sm:$0xff]  ;;  %v7350_v5 = vcombine.low %v3913_v62, %v3917_v63 }
 0x9bf   :  { %4699 = vmatpush1.bf16.msra.mxu1 %v7376_v4  ;;  %v3925_v4 = vld [vmem:[#allocation14 + $0x220] sm:$0xff] }
 0x9c0   :  { %4700 = vmatprep.subr.bf16.mxu1 %v7385_v25  ;;  %v7359_v23 = vcombine.high %v3921_v2, %v3925_v4  ;;  %v3929_v25 = vld [vmem:[#allocation14 + $0x240] sm:$0xff]  ;;  %v7358_v9 = vcombine.low %v3921_v2, %v3925_v4 }
 0x9c3   :  { %4701 = vmatpush1.bf16.msra.mxu1 %v7384_v8  ;;  %v3933_v8 = vld [vmem:[#allocation14 + $0x260] sm:$0xff] }
 0x9c4   :  { %4702 = vmatprep.subr.bf16.mxu1 %v7393_v10  ;;  %v7367_v6 = vcombine.high %v3929_v25, %v3933_v8  ;;  %v3937_v10 = vld [vmem:[#allocation14 + $0x280] sm:$0xff] }
 0x9c7   :  { %4703 = vmatpush1.bf16.msra.mxu1 %v7392_v24  ;;  %v3941_v24 = vld [vmem:[#allocation14 + $0x2a0] sm:$0xff] }
 0xa67   :  { %v7740_v29 = vpop.f32.mrb[36].mxu0 }
 0xa68   :  { %v7741_v12 = vpop.f32.mrb[37].mxu0 }
 0xa69   :  { %v7742_v13 = vadd.f32 %v7741_v12, %v7740_v29  ;;  %v7775_v14 = vpop.f32.mrb[40].mxu1  ;;  %v7366_v29 = vcombine.low %v3929_v25, %v3933_v8  ;;  %v7375_v12 = vcombine.high %v3937_v10, %v3941_v24 }
 0xa6a   :  { %v7776_v15 = vpop.f32.mrb[41].mxu1 }
 0xa6b   :  { %v3584_v18 = vmul.f32 0.001953125, %v7742_v13  ;;  %v7777_v19 = vadd.f32 %v7776_v15, %v7775_v14  ;;  %v3945_v13 = vld [vmem:[#allocation14 + $0x2c0] sm:$0xff]  ;;  %v7374_v15 = vcombine.low %v3937_v10, %v3941_v24 }
 0xa6c   :  { %v3949_v14 = vld [vmem:[#allocation14 + $0x2e0] sm:$0xff] }
 0xa6d   :  { %v3656_v47 = vmul.f32 %v3584_v18, %v3584_v18  ;;  %v3655_v21 = vmul.f32 0.001953125, %v7777_v19  ;;  %v3953_v19 = vld [vmem:[#allocation14 + $0x300] sm:$0xff] }
 0xa6f   :  { %v3657_v20 = vsub.f32 %v3655_v21, %v3656_v47  ;;  %v3957_v47 = vld [vmem:[#allocation14 + $0x320] sm:$0xff]  ;;  %v7382_v21 = vcombine.low %v3945_v13, %v3949_v14 }
 0xa71   :  { %v3658_v22 = vadd.f32 1e-05, %v3657_v20  ;;  %v7391_v20 = vcombine.high %v3953_v19, %v3957_v47 }
 0xa73   :  { %8361 = vrsqrt.f32 %v3658_v22  ;;  %v7390_v22 = vcombine.low %v3953_v19, %v3957_v47 }
 0xa7d   :  { %v8362_v32 = vpop.eup %8361 }
 0xa7e   :  { %7292 = vmatmul.mubr.msk.f32.vlgmr.msra.gmra.mrb[38].mxu0 %vm279_vm0, %v8362_v32  ;;  %v3738_v36 = vmul.f32 %v8362_v32, %v3584_v18  ;;  %v7383_v18 = vcombine.high %v3945_v13, %v3949_v14  ;;  %v7399_v32 = vcombine.high %v3961_v26, %v3965_v27 }
 0xa7f   :  { %8175 = vmatpush1.bf16.msra.mxu0 %v9837_v11  ;;  %3806 = vmatprep.mubr.f32.mxu0 %v8727_v30  ;;  %v3889_v11 = vld [vmem:[#allocation14 + $0x100] sm:$0xff] }
 0xa80   :  { %4625 = vmatprep.subr.bf16.mxu0 %v7295_v31  ;;  %v7327_v53 = vcombine.high %v3889_v11, %v3893_v51  ;;  %v7326_v56 = vcombine.low %v3889_v11, %v3893_v51  ;;  %v3962_v31 = vld [vmem:[#allocation14 + $0x348] sm:$0xff]  ;;  %v3981_v11 = vld [vmem:[#allocation14 + $0x3e0] sm:$0xff] }
 0xa81   :  { %v3978_v51 = vld [vmem:[#allocation14 + $0x3c8] sm:$0xff] }
 0xa82   :  { %7293 = vmatmul.mubr.msk.f32.vlgmr.msra.gmra.mrb[40].mxu0 %vm279_vm0, %v3738_v36  ;;  %v7400_v36 = vcombine.low %v3962_v31, %v3966_v34 }
 0xa83   :  { %4626 = vmatpush1.bf16.msra.mxu0 %v7294_v37  ;;  %v7401_v37 = vcombine.high %v3962_v31, %v3966_v34  ;;  %v3867_v31 = vld [vmem:[#allocation14 + $0x50] sm:$0xff] }
 0xa84   :  { %4627 = vmatprep.subr.bf16.mxu0 %v7303_v39  ;;  %v3969_v39 = vld [vmem:[#allocation14 + $0x380] sm:$0xff]  ;;  %v3871_v34 = vld [vmem:[#allocation14 + $0x70] sm:$0xff] }
 0xa85   :  { %4704 = vmatprep.subr.bf16.mxu1 %v7401_v37  ;;  %v7406_v45 = vcombine.low %v3969_v39, %v3973_v40 }
 0xa86   :  { %4705 = vmatpush1.bf16.msra.mxu1 %v7400_v36  ;;  %v3872_v36 = vld [vmem:[#allocation14 + $0x78] sm:$0xff] }
 0xa87   :  { %4628 = vmatpush1.bf16.msra.mxu0 %v7302_v43  ;;  %v7407_v43 = vcombine.high %v3969_v39, %v3973_v40 }
 0xa88   :  { %4629 = vmatprep.subr.bf16.mxu0 %v7311_v44  ;;  %v3974_v44 = vld [vmem:[#allocation14 + $0x3a8] sm:$0xff] }
 0xa89   :  { %v7408_v48 = vcombine.low %v3970_v42, %v3974_v44 }
 0xa8b   :  { %4630 = vmatpush1.bf16.msra.mxu0 %v7310_v49  ;;  %v7409_v49 = vcombine.high %v3970_v42, %v3974_v44  ;;  %v3875_v42 = vld [vmem:[#allocation14 + $0x90] sm:$0xff] }
 0xa8c   :  { %4631 = vmatprep.subr.bf16.mxu0 %v7319_v50  ;;  %v3977_v50 = vld [vmem:[#allocation14 + $0x3c0] sm:$0xff] }
 0xa8d   :  { %4706 = vmatprep.subr.bf16.mxu1 %v7409_v49  ;;  %v7414_v54 = vcombine.low %v3977_v50, %v3981_v11  ;;  %v3880_v49 = vld [vmem:[#allocation14 + $0xb8] sm:$0xff] }
 0xa8e   :  { %4707 = vmatpush1.bf16.msra.mxu1 %v7408_v48  ;;  %v3876_v48 = vld [vmem:[#allocation14 + $0x98] sm:$0xff] }
 0xa8f   :  { %4632 = vmatpush1.bf16.msra.mxu0 %v7318_v52  ;;  %v7415_v52 = vcombine.high %v3977_v50, %v3981_v11  ;;  %v7306_v50 = vcombine.low %v3867_v31, %v3871_v34 }
 0xa90   :  { %4633 = vmatprep.subr.bf16.mxu0 %v7327_v53  ;;  %v3982_v53 = vld [vmem:[#allocation14 + $0x3e8] sm:$0xff] }
 0xa91   :  { %v7416_v55 = vcombine.low %v3978_v51, %v3982_v53 }
 0xa93   :  { %4634 = vmatpush1.bf16.msra.mxu0 %v7326_v56  ;;  %v7417_v56 = vcombine.high %v3978_v51, %v3982_v53  ;;  %v3883_v53 = vld [vmem:[#allocation14 + $0xd0] sm:$0xff] }
 0xa94   :  { %4635 = vmatprep.subr.bf16.mxu0 %v7335_v57  ;;  %v3859_v57 = vld [vmem:[#allocation14 + $0x10] sm:$0xff] }
 0xa95   :  { %4708 = vmatprep.subr.bf16.mxu1 %v7417_v56  ;;  %v7298_v62 = vcombine.low %v3859_v57, %v3863_v58  ;;  %v3888_v56 = vld [vmem:[#allocation14 + $0xf8] sm:$0xff] }
 0xa96   :  { %4709 = vmatpush1.bf16.msra.mxu1 %v7416_v55  ;;  %v3884_v55 = vld [vmem:[#allocation14 + $0xd8] sm:$0xff] }
 0xa97   :  { %4636 = vmatpush1.bf16.msra.mxu0 %v7334_v60  ;;  %v7299_v60 = vcombine.high %v3859_v57, %v3863_v58  ;;  %v7316_v58 = vcombine.low %v3876_v48, %v3880_v49 }
 0xa98   :  { %4637 = vmatprep.subr.bf16.mxu0 %v7343_v61  ;;  %v3864_v61 = vld [vmem:[#allocation14 + $0x38] sm:$0xff] }
 0xa99   :  { %v7300_v63 = vcombine.low %v3860_v59, %v3864_v61 }
 0xa9b   :  { %4638 = vmatpush1.bf16.msra.mxu0 %v7342_v0  ;;  %v7301_v0 = vcombine.high %v3860_v59, %v3864_v61  ;;  %v3891_v59 = vld [vmem:[#allocation14 + $0x110] sm:$0xff]  ;;  %v7325_v61 = vcombine.high %v3884_v55, %v3888_v56 }
 0xa9c   :  { %4639 = vmatprep.subr.bf16.mxu0 %v7351_v1 }
 0xa9d   :  { %4784 = vmatprep.subr.bf16.mxu1 %v7301_v0  ;;  %v3896_v0 = vld [vmem:[#allocation14 + $0x138] sm:$0xff] }
 0xa9f   :  { %4640 = vmatpush1.bf16.msra.mxu0 %v7350_v5 }
 0xaa0   :  { %4641 = vmatprep.subr.bf16.mxu0 %v7359_v23 }
 0xaa3   :  { %4642 = vmatpush1.bf16.msra.mxu0 %v7358_v9 }
 0xaa4   :  { %4643 = vmatprep.subr.bf16.mxu0 %v7367_v6 }
 0xaa7   :  { %4644 = vmatpush1.bf16.msra.mxu0 %v7366_v29 }
 0xaa8   :  { %4645 = vmatprep.subr.bf16.mxu0 %v7375_v12 }
 0xaab   :  { %4646 = vmatpush1.bf16.msra.mxu0 %v7374_v15 }
 0xaac   :  { %4647 = vmatprep.subr.bf16.mxu0 %v7383_v18 }
 0xaaf   :  { %4648 = vmatpush1.bf16.msra.mxu0 %v7382_v21 }
 0xab0   :  { %4649 = vmatprep.subr.bf16.mxu0 %v7391_v20 }
 0xab3   :  { %4650 = vmatpush1.bf16.msra.mxu0 %v7390_v22 }
 0xab4   :  { %4651 = vmatprep.subr.bf16.mxu0 %v7399_v32 }
 0xab7   :  { %4652 = vmatpush1.bf16.msra.mxu0 %v7398_v35  ;;  %v3868_v35 = vld [vmem:[#allocation14 + $0x58] sm:$0xff] }
 0xab8   :  { %4653 = vmatprep.subr.bf16.mxu0 %v7407_v43  ;;  %v7307_v43 = vcombine.high %v3867_v31, %v3871_v34  ;;  %v7309_v44 = vcombine.high %v3868_v35, %v3872_v36  ;;  %v7308_v11 = vcombine.low %v3868_v35, %v3872_v36 }
 0xabb   :  { %4654 = vmatpush1.bf16.msra.mxu0 %v7406_v45  ;;  %v3879_v45 = vld [vmem:[#allocation14 + $0xb0] sm:$0xff] }
 0xabc   :  { %4655 = vmatprep.subr.bf16.mxu0 %v7415_v52  ;;  %v7315_v51 = vcombine.high %v3875_v42, %v3879_v45  ;;  %v7317_v52 = vcombine.high %v3876_v48, %v3880_v49  ;;  %v7314_v57 = vcombine.low %v3875_v42, %v3879_v45  ;;  %v3935_v42 = vld [vmem:[#allocation14 + $0x270] sm:$0xff] }
 0xabf   :  { %4656 = vmatpush1.bf16.msra.mxu0 %v7414_v54  ;;  %v3887_v54 = vld [vmem:[#allocation14 + $0xf0] sm:$0xff] }
 0xac0   :  { %4731 = vmatprep.subr.bf16.mxu0 %v7299_v60  ;;  %v7323_v60 = vcombine.high %v3883_v53, %v3887_v54 }
 0xb51   :  { %v3733_v1 = vpop.f32.mrb[38].mxu0 }
 0xb52   :  { %v3816_v2 = vrot.slane %v3733_v1, %v9360_v3  ;;  %v3735_v4 = vpop.f32.mrb[39].mxu0  ;;  %v7322_v1 = vcombine.low %v3883_v53, %v3887_v54  ;;  %v3944_v53 = vld [vmem:[#allocation14 + $0x2b8] sm:$0xff] }
 0xb53   :  { %v3820_v5 = vrot.slane %v3735_v4, %v9360_v3 }
 0xb54   :  { %v3821_v23 = vmul.f32 %v3816_v2, %v9796_v16  ;;  %v3823_v25 = vmul.f32 %v3816_v2, %v9800_v17  ;;  %v3825_v8 = vmul.f32 %v3816_v2, %v9816_v28  ;;  %v3827_v9 = vmul.f32 %v3816_v2, %v9826_v38 }
 0xb55   :  { %v3822_v6 = vmul.f32 %v3820_v5, %v9798_v7  ;;  %v3824_v10 = vmul.f32 %v3820_v5, %v9808_v46  ;;  %v3826_v24 = vmul.f32 %v3820_v5, %v9821_v33  ;;  %v3828_v29 = vmul.f32 %v3820_v5, %v9831_v41  ;;  %v3808_v12 = vpop.f32.mrb[40].mxu0 }
 0xb56   :  { %v3832_v13 = vrot.slane %v3808_v12, %v9360_v3  ;;  %v3810_v14 = vpop.f32.mrb[41].mxu0  ;;  %v7324_v2 = vcombine.low %v3884_v55, %v3888_v56  ;;  %v3907_v12 = vld [vmem:[#allocation14 + $0x190] sm:$0xff] }
 0xb57   :  { %v3836_v16 = vrot.slane %v3810_v14, %v9360_v3  ;;  %v3908_v14 = vld [vmem:[#allocation14 + $0x198] sm:$0xff] }
 0xb58   :  { %v3837_v15 = vsub.f32 %v3821_v23, %v3832_v13  ;;  %v3839_v17 = vsub.f32 %v3823_v25, %v3832_v13  ;;  %v3841_v18 = vsub.f32 %v3825_v8, %v3832_v13  ;;  %v3843_v28 = vsub.f32 %v3827_v9, %v3832_v13  ;;  %v3899_v23 = vld [vmem:[#allocation14 + $0x150] sm:$0xff]  ;;  %v3900_v8 = vld [vmem:[#allocation14 + $0x158] sm:$0xff] }
 0xb59   :  { %v3838_v19 = vsub.f32 %v3822_v6, %v3836_v16  ;;  %v3840_v38 = vsub.f32 %v3824_v10, %v3836_v16  ;;  %v3842_v47 = vsub.f32 %v3826_v24, %v3836_v16  ;;  %v3844_v7 = vsub.f32 %v3828_v29, %v3836_v16  ;;  %v3903_v25 = vld [vmem:[#allocation14 + $0x170] sm:$0xff]  ;;  %v3904_v9 = vld [vmem:[#allocation14 + $0x178] sm:$0xff] }
 0xb5a   :  { %v3845_v21 = vmax.f32 %v3837_v15, 0.0  ;;  %v3847_v46 = vmax.f32 %v3839_v17, 0.0  ;;  %v3849_v20 = vmax.f32 %v3841_v18, 0.0  ;;  %v3851_v33 = vmax.f32 %v3843_v28, 0.0  ;;  %v3911_v13 = vld [vmem:[#allocation14 + $0x1b0] sm:$0xff]  ;;  %v3912_v16 = vld [vmem:[#allocation14 + $0x1b8] sm:$0xff] }
 0xb5b   :  { %v3846_v22 = vmax.f32 %v3838_v19, 0.0  ;;  %v3848_v41 = vmax.f32 %v3840_v38, 0.0  ;;  %v3850_v26 = vmax.f32 %v3842_v47, 0.0  ;;  %v3852_v27 = vmax.f32 %v3844_v7, 0.0  ;;  %v3915_v19 = vld [vmem:[#allocation14 + $0x1d0] sm:$0xff]  ;;  %v3916_v47 = vld [vmem:[#allocation14 + $0x1d8] sm:$0xff] }
 0xb5c   :  { %v9856_v32 = vpack.c.bf16 %v3847_v46, %v3845_v21  ;;  %v9858_v37 = vpack.c.bf16 %v3851_v33, %v3849_v20  ;;  %v7339_v24 = vcombine.high %v3899_v23, %v3903_v25  ;;  %v7341_v29 = vcombine.high %v3900_v8, %v3904_v9  ;;  %v3919_v38 = vld [vmem:[#allocation14 + $0x1f0] sm:$0xff]  ;;  %v3920_v7 = vld [vmem:[#allocation14 + $0x1f8] sm:$0xff] }
 0xb5d   :  { %v3854_v39 = vpack.c.bf16 %v3848_v41, %v3846_v22  ;;  %v9860_v40 = vpack.c.bf16 %v3852_v27, %v3850_v26  ;;  %v7338_v15 = vcombine.low %v3899_v23, %v3903_v25  ;;  %v7340_v17 = vcombine.low %v3900_v8, %v3904_v9  ;;  %v3923_v22 = vld [vmem:[#allocation14 + $0x210] sm:$0xff]  ;;  %v3924_v26 = vld [vmem:[#allocation14 + $0x218] sm:$0xff] }
 0xb5e   :  { %v7347_v18 = vcombine.high %v3907_v12, %v3911_v13  ;;  %v7349_v28 = vcombine.high %v3908_v14, %v3912_v16  ;;  %v7346_v21 = vcombine.low %v3907_v12, %v3911_v13  ;;  %v7348_v46 = vcombine.low %v3908_v14, %v3912_v16  ;;  %v3927_v41 = vld [vmem:[#allocation14 + $0x230] sm:$0xff]  ;;  %v3928_v27 = vld [vmem:[#allocation14 + $0x238] sm:$0xff] }
 0xb5f   :  { %4657 = vmatprep.mubr.bf16.mxu0 %v3854_v39  ;;  %4710 = vmatprep.mubr.bf16.mxu1 %v3854_v39  ;;  %v7355_v20 = vcombine.high %v3915_v19, %v3919_v38  ;;  %v7357_v33 = vcombine.high %v3916_v47, %v3920_v7  ;;  %v7354_v31 = vcombine.low %v3915_v19, %v3919_v38  ;;  %v3960_v23 = vld [vmem:[#allocation14 + $0x338] sm:$0xff] }
 0xb60   :  { %4658 = vmatmul.mubr.bf16.vlgmr.msra.gmra.mrb[44].mxu0 %v9856_v32  ;;  %4711 = vmatmul.mubr.bf16.vlgmr.msra.gmra.mrb[44].mxu1 %v9856_v32  ;;  %v7356_v34 = vcombine.low %v3916_v47, %v3920_v7  ;;  %v7363_v35 = vcombine.high %v3923_v22, %v3927_v41  ;;  %v7365_v36 = vcombine.high %v3924_v26, %v3928_v27  ;;  %v3968_v12 = vld [vmem:[#allocation14 + $0x378] sm:$0xff] }
 0xb61   :  { %4732 = vmatpush1.bf16.msra.mxu0 %v7298_v62  ;;  %4785 = vmatpush1.bf16.msra.mxu1 %v7300_v63  ;;  %v3895_v62 = vld [vmem:[#allocation14 + $0x130] sm:$0xff]  ;;  %v3892_v63 = vld [vmem:[#allocation14 + $0x118] sm:$0xff]  ;;  %v7362_v45 = vcombine.low %v3923_v22, %v3927_v41  ;;  %v7364_v48 = vcombine.low %v3924_v26, %v3928_v27 }
 0xb62   :  { %4667 = vmatprep.mubr.bf16.mxu0 %v9860_v40  ;;  %4720 = vmatprep.mubr.bf16.mxu1 %v9860_v40  ;;  %v7331_v4 = vcombine.high %v3891_v59, %v3895_v62  ;;  %v7333_v5 = vcombine.high %v3892_v63, %v3896_v0  ;;  %v7330_v6 = vcombine.low %v3891_v59, %v3895_v62  ;;  %v3951_v59 = vld [vmem:[#allocation14 + $0x2f0] sm:$0xff]  ;;  %v3976_v19 = vld [vmem:[#allocation14 + $0x3b8] sm:$0xff] }
 0xb63   :  { %4733 = vmatprep.subr.bf16.mxu0 %v7307_v43  ;;  %4786 = vmatprep.subr.bf16.mxu1 %v7309_v44  ;;  %v7332_v10 = vcombine.low %v3892_v63, %v3896_v0  ;;  %v3932_v43 = vld [vmem:[#allocation14 + $0x258] sm:$0xff] }
 0xb64   :  { %v3936_v44 = vld [vmem:[#allocation14 + $0x278] sm:$0xff] }
 0xb65   :  { %4734 = vmatpush1.bf16.msra.mxu0 %v7306_v50  ;;  %4787 = vmatpush1.bf16.msra.mxu1 %v7308_v11  ;;  %v7373_v50 = vcombine.high %v3932_v43, %v3936_v44  ;;  %v3939_v11 = vld [vmem:[#allocation14 + $0x290] sm:$0xff]  ;;  %v7372_v55 = vcombine.low %v3932_v43, %v3936_v44  ;;  %v3984_v22 = vld [vmem:[#allocation14 + $0x3f8] sm:$0xff] }
 0xb66   :  { %4735 = vmatprep.subr.bf16.mxu0 %v7315_v51  ;;  %4788 = vmatprep.subr.bf16.mxu1 %v7317_v52  ;;  %v3943_v51 = vld [vmem:[#allocation14 + $0x2b0] sm:$0xff]  ;;  %v3940_v52 = vld [vmem:[#allocation14 + $0x298] sm:$0xff] }
 0xb67   :  { %v7379_v56 = vcombine.high %v3939_v11, %v3943_v51  ;;  %v7378_v62 = vcombine.low %v3939_v11, %v3943_v51  ;;  %v7380_v63 = vcombine.low %v3940_v52, %v3944_v53 }
 0xb68   :  { %4668 = vmatmul.mubr.bf16.gmra.mrb[48].mxu0 %v9858_v37  ;;  %4721 = vmatmul.mubr.bf16.gmra.mrb[48].mxu1 %v9858_v37 }
 0xb69   :  { %4736 = vmatpush1.bf16.msra.mxu0 %v7314_v57  ;;  %4789 = vmatpush1.bf16.msra.mxu1 %v7316_v58  ;;  %v7381_v57 = vcombine.high %v3940_v52, %v3944_v53  ;;  %v3947_v58 = vld [vmem:[#allocation14 + $0x2d0] sm:$0xff] }
 0xb6a   :  { %4763 = vmatprep.mubr.bf16.mxu0 %v3854_v39  ;;  %4816 = vmatprep.mubr.bf16.mxu1 %v3854_v39  ;;  %v3931_v39 = vld [vmem:[#allocation14 + $0x250] sm:$0xff]  ;;  %v7387_v0 = vcombine.high %v3947_v58, %v3951_v59  ;;  %v7386_v25 = vcombine.low %v3947_v58, %v3951_v59 }
 0xb6b   :  { %4737 = vmatprep.subr.bf16.mxu0 %v7323_v60  ;;  %4790 = vmatprep.subr.bf16.mxu1 %v7325_v61  ;;  %v7371_v49 = vcombine.high %v3931_v39, %v3935_v42  ;;  %v7370_v54 = vcombine.low %v3931_v39, %v3935_v42  ;;  %v3948_v60 = vld [vmem:[#allocation14 + $0x2d8] sm:$0xff] }
 0xb6c   :  { %v3952_v61 = vld [vmem:[#allocation14 + $0x2f8] sm:$0xff] }
 0xb6d   :  { %4738 = vmatpush1.bf16.msra.mxu0 %v7322_v1  ;;  %4791 = vmatpush1.bf16.msra.mxu1 %v7324_v2  ;;  %v7389_v1 = vcombine.high %v3948_v60, %v3952_v61  ;;  %v3955_v2 = vld [vmem:[#allocation14 + $0x310] sm:$0xff]  ;;  %v7388_v8 = vcombine.low %v3948_v60, %v3952_v61 }
 0xb6e   :  { %4739 = vmatprep.subr.bf16.mxu0 %v7331_v4  ;;  %4792 = vmatprep.subr.bf16.mxu1 %v7333_v5  ;;  %v3959_v4 = vld [vmem:[#allocation14 + $0x330] sm:$0xff]  ;;  %v3956_v5 = vld [vmem:[#allocation14 + $0x318] sm:$0xff] }
 0xb6f   :  { %v7395_v9 = vcombine.high %v3955_v2, %v3959_v4  ;;  %v7394_v13 = vcombine.low %v3955_v2, %v3959_v4  ;;  %v7396_v14 = vcombine.low %v3956_v5, %v3960_v23 }
 0xb71   :  { %4740 = vmatpush1.bf16.msra.mxu0 %v7330_v6  ;;  %4793 = vmatpush1.bf16.msra.mxu1 %v7332_v10  ;;  %v7397_v6 = vcombine.high %v3956_v5, %v3960_v23  ;;  %v3963_v10 = vld [vmem:[#allocation14 + $0x350] sm:$0xff] }
 0xb72   :  { %4741 = vmatprep.subr.bf16.mxu0 %v7339_v24  ;;  %4794 = vmatprep.subr.bf16.mxu1 %v7341_v29  ;;  %v3967_v24 = vld [vmem:[#allocation14 + $0x370] sm:$0xff]  ;;  %v3964_v29 = vld [vmem:[#allocation14 + $0x358] sm:$0xff] }
 0xb73   :  { %v7403_v16 = vcombine.high %v3963_v10, %v3967_v24  ;;  %v7402_v38 = vcombine.low %v3963_v10, %v3967_v24  ;;  %v7404_v47 = vcombine.low %v3964_v29, %v3968_v12 }
 0xb75   :  { %4742 = vmatpush1.bf16.msra.mxu0 %v7338_v15  ;;  %4795 = vmatpush1.bf16.msra.mxu1 %v7340_v17  ;;  %v7405_v15 = vcombine.high %v3964_v29, %v3968_v12  ;;  %v3971_v17 = vld [vmem:[#allocation14 + $0x390] sm:$0xff] }
 0xb76   :  { %4743 = vmatprep.subr.bf16.mxu0 %v7347_v18  ;;  %4796 = vmatprep.subr.bf16.mxu1 %v7349_v28  ;;  %v3975_v18 = vld [vmem:[#allocation14 + $0x3b0] sm:$0xff]  ;;  %v3972_v28 = vld [vmem:[#allocation14 + $0x398] sm:$0xff] }
 0xb77   :  { %v7411_v7 = vcombine.high %v3971_v17, %v3975_v18  ;;  %v7410_v41 = vcombine.low %v3971_v17, %v3975_v18  ;;  %v7412_v26 = vcombine.low %v3972_v28, %v3976_v19 }
 0xb79   :  { %4744 = vmatpush1.bf16.msra.mxu0 %v7346_v21  ;;  %4797 = vmatpush1.bf16.msra.mxu1 %v7348_v46  ;;  %v7413_v21 = vcombine.high %v3972_v28, %v3976_v19  ;;  %v3979_v46 = vld [vmem:[#allocation14 + $0x3d0] sm:$0xff] }
 0xb7a   :  { %4745 = vmatprep.subr.bf16.mxu0 %v7355_v20  ;;  %4798 = vmatprep.subr.bf16.mxu1 %v7357_v33  ;;  %v3983_v20 = vld [vmem:[#allocation14 + $0x3f0] sm:$0xff]  ;;  %v3980_v33 = vld [vmem:[#allocation14 + $0x3d8] sm:$0xff] }
 0xb7b   :  { %v7419_v27 = vcombine.high %v3979_v46, %v3983_v20 }
 0xb7d   :  { %4746 = vmatpush1.bf16.msra.mxu0 %v7354_v31  ;;  %4799 = vmatpush1.bf16.msra.mxu1 %v7356_v34  ;;  %v7421_v31 = vcombine.high %v3980_v33, %v3984_v22  ;;  %v7418_v34 = vcombine.low %v3979_v46, %v3983_v20  ;;  %v4841_v46 = vld [vmem:[#allocation16 + $0x20] sm:$0xff]  ;;  %v4842_v20 = vld [vmem:[#allocation16 + $0x28] sm:$0xff] }
 0xb7e   :  { %4747 = vmatprep.subr.bf16.mxu0 %v7363_v35  ;;  %4800 = vmatprep.subr.bf16.mxu1 %v7365_v36  ;;  %v7420_v35 = vcombine.low %v3980_v33, %v3984_v22  ;;  %v4843_v33 = vld [vmem:[#allocation16 + $0x30] sm:$0xff]  ;;  %v4844_v22 = vld [vmem:[#allocation16 + $0x38] sm:$0xff] }
 0xb81   :  { %4748 = vmatpush1.bf16.msra.mxu0 %v7362_v45  ;;  %4801 = vmatpush1.bf16.msra.mxu1 %v7364_v48 }
 0xb82   :  { %4749 = vmatprep.subr.bf16.mxu0 %v7371_v49  ;;  %4802 = vmatprep.subr.bf16.mxu1 %v7373_v50 }
 0xb85   :  { %4750 = vmatpush1.bf16.msra.mxu0 %v7370_v54  ;;  %4803 = vmatpush1.bf16.msra.mxu1 %v7372_v55 }
 0xb86   :  { %4751 = vmatprep.subr.bf16.mxu0 %v7379_v56  ;;  %4804 = vmatprep.subr.bf16.mxu1 %v7381_v57 }
 0xb89   :  { %4752 = vmatpush1.bf16.msra.mxu0 %v7378_v62  ;;  %4805 = vmatpush1.bf16.msra.mxu1 %v7380_v63 }
 0xb8a   :  { %4753 = vmatprep.subr.bf16.mxu0 %v7387_v0  ;;  %4806 = vmatprep.subr.bf16.mxu1 %v7389_v1 }
 0xb8d   :  { %4754 = vmatpush1.bf16.msra.mxu0 %v7386_v25  ;;  %4807 = vmatpush1.bf16.msra.mxu1 %v7388_v8 }
 0xb8e   :  { %4755 = vmatprep.subr.bf16.mxu0 %v7395_v9  ;;  %4808 = vmatprep.subr.bf16.mxu1 %v7397_v6 }
 0xb91   :  { %4756 = vmatpush1.bf16.msra.mxu0 %v7394_v13  ;;  %4809 = vmatpush1.bf16.msra.mxu1 %v7396_v14 }
 0xb92   :  { %4757 = vmatprep.subr.bf16.mxu0 %v7403_v16  ;;  %4810 = vmatprep.subr.bf16.mxu1 %v7405_v15 }
 0xb95   :  { %4758 = vmatpush1.bf16.msra.mxu0 %v7402_v38  ;;  %4811 = vmatpush1.bf16.msra.mxu1 %v7404_v47  ;;  %v4837_v38 = vld [vmem:[#allocation16] sm:$0xff]  ;;  %v4838_v47 = vld [vmem:[#allocation16 + $0x8] sm:$0xff] }
 0xb96   :  { %4759 = vmatprep.subr.bf16.mxu0 %v7411_v7  ;;  %4812 = vmatprep.subr.bf16.mxu1 %v7413_v21  ;;  %v4839_v7 = vld [vmem:[#allocation16 + $0x10] sm:$0xff]  ;;  %v4840_v21 = vld [vmem:[#allocation16 + $0x18] sm:$0xff] }
 0xb99   :  { %4760 = vmatpush1.bf16.msra.mxu0 %v7410_v41  ;;  %4813 = vmatpush1.bf16.msra.mxu1 %v7412_v26  ;;  %v5042_v41 = vld [vmem:[%s10505_s14 + $0x80] sm:$0xff]  ;;  %v5043_v26 = vld [vmem:[%s10505_s14 + $0x88] sm:$0xff] }
 0xb9a   :  { %4761 = vmatprep.subr.bf16.mxu0 %v7419_v27  ;;  %4814 = vmatprep.subr.bf16.mxu1 %v7421_v31  ;;  %v8208_v27 = vpack.c.bf16 %v5043_v26, %v5042_v41  ;;  %v5026_v31 = vld [vmem:[%s10505_s14] sm:$0xff] }
 0xb9d   :  { %4762 = vmatpush1.bf16.msra.mxu0 %v7418_v34  ;;  %4815 = vmatpush1.bf16.msra.mxu1 %v7420_v35  ;;  %v5027_v34 = vld [vmem:[%s10505_s14 + $0x8] sm:$0xff] }
 0xb9e   :  { %v8210_v35 = vpack.c.bf16 %v5027_v34, %v5026_v31  ;;  %8209 = vmatprep.subr.bf16.mxu1 %v8208_v27 }
 0xba0   :  { %4764 = vmatmul.mubr.bf16.vlgmr.msra.gmra.mrb[52].mxu0 %v9856_v32  ;;  %4817 = vmatmul.mubr.bf16.vlgmr.msra.gmra.mrb[52].mxu1 %v9856_v32 }
 0xba1   :  { %4773 = vmatprep.mubr.bf16.mxu0 %v9860_v40  ;;  %4826 = vmatprep.mubr.bf16.mxu1 %v9860_v40 }
 0xba2   :  { %8211 = vmatpush3.bf16.msra.mxu1 %v8210_v35 }
 0xba8   :  { %4774 = vmatmul.mubr.bf16.gmra.mrb[56].mxu0 %v9858_v37  ;;  %4827 = vmatmul.mubr.bf16.gmra.mrb[56].mxu1 %v9858_v37 }
 0xba9   :  { %4909 = vmatprep.mubr.f32.mxu0 %v8727_v30 }
 0xc33   :  { %v4659_v36 = vpop.f32.mrb[44].mxu0  ;;  %v4712_v39 = vpop.f32.mrb[44].mxu1 }
 0xc34   :  { %v4661_v42 = vpop.f32.mrb[45].mxu0  ;;  %v4714_v43 = vpop.f32.mrb[45].mxu1 }
 0xc35   :  { %v4663_v44 = vpop.f32.mrb[46].mxu0  ;;  %v4716_v45 = vpop.f32.mrb[46].mxu1 }
 0xc36   :  { %v8178_v48 = vpack.c.bf16 %v4663_v44, %v4659_v36  ;;  %v8186_v49 = vpack.c.bf16 %v4716_v45, %v4712_v39  ;;  %v4665_v50 = vpop.f32.mrb[47].mxu0  ;;  %v4718_v32 = vpop.f32.mrb[47].mxu1  ;;  %v5044_v36 = vld [vmem:[%s10505_s14 + $0x90] sm:$0xff]  ;;  %v5045_v39 = vld [vmem:[%s10505_s14 + $0x98] sm:$0xff] }
 0xc37   :  { %v8176_v11 = vpack.c.bf16 %v4665_v50, %v4661_v42  ;;  %v8184_v51 = vpack.c.bf16 %v4718_v32, %v4714_v43  ;;  %v8212_v42 = vpack.c.bf16 %v5045_v39, %v5044_v36  ;;  %v5028_v43 = vld [vmem:[%s10505_s14 + $0x10] sm:$0xff]  ;;  %v5029_v44 = vld [vmem:[%s10505_s14 + $0x18] sm:$0xff]  ;;  %v5030_v32 = vld [vmem:[%s10505_s14 + $0x20] sm:$0xff] }
 0xc38   :  { %v8214_v45 = vpack.c.bf16 %v5029_v44, %v5028_v43 }
 0xc39   :  { %8177 = vmatprep.subr.bf16.mxu0 %v8176_v11  ;;  %8213 = vmatprep.subr.bf16.mxu1 %v8212_v42  ;;  %v5031_v11 = vld [vmem:[%s10505_s14 + $0x28] sm:$0xff] }
 0xc3a   :  { %8179 = vmatpush1.bf16.msra.mxu0 %v8178_v48  ;;  %8215 = vmatpush3.bf16.msra.mxu1 %v8214_v45  ;;  %v5046_v48 = vld [vmem:[%s10505_s14 + $0xa0] sm:$0xff] }
 0xc3b   :  { %v4669_v40 = vpop.f32.mrb[48].mxu0  ;;  %v4722_v52 = vpop.f32.mrb[48].mxu1 }
 0xc3c   :  { %v4671_v53 = vpop.f32.mrb[49].mxu0  ;;  %v4724_v37 = vpop.f32.mrb[49].mxu1 }
 0xc3d   :  { %v4673_v54 = vpop.f32.mrb[50].mxu0  ;;  %v4726_v55 = vpop.f32.mrb[50].mxu1 }
 0xc3e   :  { %v8182_v56 = vpack.c.bf16 %v4673_v54, %v4669_v40  ;;  %v8190_v57 = vpack.c.bf16 %v4726_v55, %v4722_v52  ;;  %v4675_v58 = vpop.f32.mrb[51].mxu0  ;;  %v4728_v59 = vpop.f32.mrb[51].mxu1  ;;  %v5048_v40 = vld [vmem:[%s10505_s14 + $0xb0] sm:$0xff]  ;;  %v5049_v52 = vld [vmem:[%s10505_s14 + $0xb8] sm:$0xff] }
 0xc3f   :  { %v8180_v60 = vpack.c.bf16 %v4675_v58, %v4671_v53  ;;  %v8188_v61 = vpack.c.bf16 %v4728_v59, %v4724_v37  ;;  %v8220_v53 = vpack.c.bf16 %v5049_v52, %v5048_v40  ;;  %v5032_v37 = vld [vmem:[%s10505_s14 + $0x30] sm:$0xff]  ;;  %v5033_v54 = vld [vmem:[%s10505_s14 + $0x38] sm:$0xff]  ;;  %v5034_v59 = vld [vmem:[%s10505_s14 + $0x40] sm:$0xff] }
 0xc40   :  { %v8222_v55 = vpack.c.bf16 %v5033_v54, %v5032_v37 }
 0xc41   :  { %8181 = vmatprep.subr.bf16.mxu0 %v8180_v60  ;;  %v5035_v60 = vld [vmem:[%s10505_s14 + $0x48] sm:$0xff] }
 0xc42   :  { %8183 = vmatpush1.bf16.msra.mxu0 %v8182_v56  ;;  %v5050_v56 = vld [vmem:[%s10505_s14 + $0xc0] sm:$0xff] }
 0xc43   :  { %8185 = vmatprep.subr.bf16.mxu0 %v8184_v51  ;;  %v8218_v51 = vpack.c.bf16 %v5031_v11, %v5030_v32 }
 0xc46   :  { %8187 = vmatpush1.bf16.msra.mxu0 %v8186_v49  ;;  %v5047_v49 = vld [vmem:[%s10505_s14 + $0xa8] sm:$0xff] }
 0xc47   :  { %8189 = vmatprep.subr.bf16.mxu0 %v8188_v61  ;;  %v8216_v50 = vpack.c.bf16 %v5047_v49, %v5046_v48  ;;  %v8226_v61 = vpack.c.bf16 %v5035_v60, %v5034_v59 }
 0xc49   :  { %8217 = vmatprep.subr.bf16.mxu1 %v8216_v50 }
 0xc4a   :  { %8191 = vmatpush1.bf16.msra.mxu0 %v8190_v57  ;;  %8219 = vmatpush3.bf16.msra.mxu1 %v8218_v51  ;;  %v5051_v57 = vld [vmem:[%s10505_s14 + $0xc8] sm:$0xff] }
 0xc4b   :  { %8221 = vmatprep.subr.bf16.mxu1 %v8220_v53  ;;  %v8224_v58 = vpack.c.bf16 %v5051_v57, %v5050_v56 }
 0xc4e   :  { %8223 = vmatpush3.bf16.msra.mxu1 %v8222_v55 }
 0xc4f   :  { %8225 = vmatprep.subr.bf16.mxu1 %v8224_v58 }
 0xc52   :  { %8227 = vmatpush3.bf16.msra.mxu1 %v8226_v61 }
 0xc73   :  { %v4765_v62 = vpop.f32.mrb[52].mxu0  ;;  %v4818_v63 = vpop.f32.mrb[52].mxu1 }
 0xc74   :  { %v4767_v0 = vpop.f32.mrb[53].mxu0  ;;  %v4820_v1 = vpop.f32.mrb[53].mxu1 }
 0xc75   :  { %v4769_v2 = vpop.f32.mrb[54].mxu0  ;;  %v4822_v4 = vpop.f32.mrb[54].mxu1 }
 0xc76   :  { %v8194_v5 = vpack.c.bf16 %v4769_v2, %v4765_v62  ;;  %v8202_v23 = vpack.c.bf16 %v4822_v4, %v4818_v63  ;;  %v4771_v25 = vpop.f32.mrb[55].mxu0  ;;  %v4824_v8 = vpop.f32.mrb[55].mxu1  ;;  %v5052_v62 = vld [vmem:[%s10505_s14 + $0xd0] sm:$0xff]  ;;  %v5053_v63 = vld [vmem:[%s10505_s14 + $0xd8] sm:$0xff] }
 0xc77   :  { %v8192_v9 = vpack.c.bf16 %v4771_v25, %v4767_v0  ;;  %v8200_v6 = vpack.c.bf16 %v4824_v8, %v4820_v1  ;;  %v8228_v0 = vpack.c.bf16 %v5053_v63, %v5052_v62  ;;  %v5036_v1 = vld [vmem:[%s10505_s14 + $0x50] sm:$0xff]  ;;  %v5037_v2 = vld [vmem:[%s10505_s14 + $0x58] sm:$0xff]  ;;  %v5038_v8 = vld [vmem:[%s10505_s14 + $0x60] sm:$0xff] }
 0xc78   :  { %v8230_v4 = vpack.c.bf16 %v5037_v2, %v5036_v1 }
 0xc79   :  { %8193 = vmatprep.subr.bf16.mxu0 %v8192_v9  ;;  %8229 = vmatprep.subr.bf16.mxu1 %v8228_v0  ;;  %v5039_v9 = vld [vmem:[%s10505_s14 + $0x68] sm:$0xff] }
 0xc7a   :  { %8195 = vmatpush1.bf16.msra.mxu0 %v8194_v5  ;;  %8231 = vmatpush3.bf16.msra.mxu1 %v8230_v4  ;;  %v5054_v5 = vld [vmem:[%s10505_s14 + $0xe0] sm:$0xff] }
 0xc7b   :  { %v4775_v10 = vpop.f32.mrb[56].mxu0  ;;  %v4828_v24 = vpop.f32.mrb[56].mxu1 }
 0xc7c   :  { %v4777_v29 = vpop.f32.mrb[57].mxu0  ;;  %v4830_v12 = vpop.f32.mrb[57].mxu1 }
 0xc7d   :  { %v4779_v13 = vpop.f32.mrb[58].mxu0  ;;  %v4832_v14 = vpop.f32.mrb[58].mxu1 }
 0xc7e   :  { %v8198_v16 = vpack.c.bf16 %v4779_v13, %v4775_v10  ;;  %v8206_v15 = vpack.c.bf16 %v4832_v14, %v4828_v24  ;;  %v4781_v17 = vpop.f32.mrb[59].mxu0  ;;  %v4834_v18 = vpop.f32.mrb[59].mxu1  ;;  %v5056_v10 = vld [vmem:[%s10505_s14 + $0xf0] sm:$0xff]  ;;  %v5057_v24 = vld [vmem:[%s10505_s14 + $0xf8] sm:$0xff] }
 0xc7f   :  { %v8196_v28 = vpack.c.bf16 %v4781_v17, %v4777_v29  ;;  %v8204_v19 = vpack.c.bf16 %v4834_v18, %v4830_v12  ;;  %v8236_v29 = vpack.c.bf16 %v5057_v24, %v5056_v10  ;;  %v5040_v12 = vld [vmem:[%s10505_s14 + $0x70] sm:$0xff]  ;;  %v5041_v13 = vld [vmem:[%s10505_s14 + $0x78] sm:$0xff] }
 0xc80   :  { %v8238_v14 = vpack.c.bf16 %v5041_v13, %v5040_v12 }
 0xc81   :  { %8197 = vmatprep.subr.bf16.mxu0 %v8196_v28 }
 0xc82   :  { %8199 = vmatpush1.bf16.msra.mxu0 %v8198_v16 }
 0xc83   :  { %8201 = vmatprep.subr.bf16.mxu0 %v8200_v6  ;;  %v8234_v6 = vpack.c.bf16 %v5039_v9, %v5038_v8 }
 0xc86   :  { %8203 = vmatpush1.bf16.msra.mxu0 %v8202_v23  ;;  %v5055_v23 = vld [vmem:[%s10505_s14 + $0xe8] sm:$0xff] }
 0xc87   :  { %8205 = vmatprep.subr.bf16.mxu0 %v8204_v19  ;;  %v8232_v25 = vpack.c.bf16 %v5055_v23, %v5054_v5 }
 0xc89   :  { %8233 = vmatprep.subr.bf16.mxu1 %v8232_v25 }
 0xc8a   :  { %8207 = vmatpush1.bf16.msra.mxu0 %v8206_v15  ;;  %8235 = vmatpush3.bf16.msra.mxu1 %v8234_v6 }
 0xc8b   :  { %8241 = vmatprep.subr.bf16.mxu0 %v8208_v27  ;;  %8237 = vmatprep.subr.bf16.mxu1 %v8236_v29 }
 0xc8d   :  { %4910 = vmatmul.mubr.f32.vlgmr.msra.gmra.mrb[42].mxu0 %v4837_v38 }
 0xc8e   :  { %4915 = vmatprep.mubr.f32.mxu0 %v8727_v30  ;;  %8243 = vmatpush3.bf16.msra.mxu0 %v8210_v35 }
 0xc8f   :  { %8245 = vmatprep.subr.bf16.mxu0 %v8212_v42  ;;  %8239 = vmatpush3.bf16.msra.mxu1 %v8238_v14 }
 0xc91   :  { %4916 = vmatmul.mubr.f32.gmra.mrb[60].mxu0 %v4838_v47 }
 0xc92   :  { %4921 = vmatprep.mubr.f32.mxu0 %v8727_v30  ;;  %8247 = vmatpush3.bf16.msra.mxu0 %v8214_v45 }
 0xc93   :  { %8249 = vmatprep.subr.bf16.mxu0 %v8216_v50 }
 0xc95   :  { %4922 = vmatmul.mubr.f32.gmra.mrb[62].mxu0 %v4839_v7 }
 0xc96   :  { %4927 = vmatprep.mubr.f32.mxu0 %v8727_v30  ;;  %8251 = vmatpush3.bf16.msra.mxu0 %v8218_v51 }
 0xc97   :  { %8253 = vmatprep.subr.bf16.mxu0 %v8220_v53 }
 0xc99   :  { %4928 = vmatmul.mubr.f32.gmra.mrb[64].mxu0 %v4840_v21 }
 0xc9a   :  { %4933 = vmatprep.mubr.f32.mxu0 %v8727_v30  ;;  %8255 = vmatpush3.bf16.msra.mxu0 %v8222_v55 }
 0xc9b   :  { %8257 = vmatprep.subr.bf16.mxu0 %v8224_v58 }
 0xc9d   :  { %4934 = vmatmul.mubr.f32.gmra.mrb[66].mxu0 %v4841_v46 }
 0xc9e   :  { %4939 = vmatprep.mubr.f32.mxu0 %v8727_v30  ;;  %8259 = vmatpush3.bf16.msra.mxu0 %v8226_v61 }
 0xc9f   :  { %8261 = vmatprep.subr.bf16.mxu0 %v8228_v0 }
 0xca1   :  { %4940 = vmatmul.mubr.f32.gmra.mrb[68].mxu0 %v4842_v20 }
 0xca2   :  { %4945 = vmatprep.mubr.f32.mxu0 %v8727_v30  ;;  %8263 = vmatpush3.bf16.msra.mxu0 %v8230_v4 }
 0xca3   :  { %8265 = vmatprep.subr.bf16.mxu0 %v8232_v25 }
 0xca5   :  { %4946 = vmatmul.mubr.f32.gmra.mrb[70].mxu0 %v4843_v33 }
 0xca6   :  { %4951 = vmatprep.mubr.f32.mxu0 %v8727_v30  ;;  %8267 = vmatpush3.bf16.msra.mxu0 %v8234_v6 }
 0xca7   :  { %8269 = vmatprep.subr.bf16.mxu0 %v8236_v29 }
 0xca9   :  { %4952 = vmatmul.mubr.f32.gmra.mrb[72].mxu0 %v4844_v22 }
 0xcaa   :  { %8271 = vmatpush3.bf16.msra.mxu0 %v8238_v14 }
 0xd60   :  { %v9978_v16 = vpop.f32.mrb[42].mxu0 }
 0xd61   :  { %v9980_v15 = vpop.f32.mrb[43].mxu0  ;;  %v4984_v18 = vmul.f32 %v9978_v16, %v9978_v16 }
 0xd62   :  { %v4985_v47 = vmul.f32 %v9980_v15, %v9980_v15 }
 0xd64   :  { %v9982_v17 = vpop.f32.mrb[60].mxu0 }
 0xd65   :  { %v4958_v28 = vadd.f32 %v9982_v17, %v9978_v16  ;;  %v4986_v19 = vmul.f32 %v9982_v17, %v9982_v17  ;;  %v9990_v38 = vpop.f32.mrb[61].mxu0 }
 0xd66   :  { %v4971_v7 = vadd.f32 %v9990_v38, %v9980_v15  ;;  %v4987_v21 = vmul.f32 %v9990_v38, %v9990_v38 }
 0xd67   :  { %v5000_v46 = vadd.f32 %v4986_v19, %v4984_v18 }
 0xd68   :  { %v5013_v20 = vadd.f32 %v4987_v21, %v4985_v47  ;;  %v9998_v33 = vpop.f32.mrb[62].mxu0 }
 0xd69   :  { %v4959_v22 = vadd.f32 %v4958_v28, %v9998_v33  ;;  %v4988_v41 = vmul.f32 %v9998_v33, %v9998_v33  ;;  %v10003_v26 = vpop.f32.mrb[63].mxu0 }
 0xd6a   :  { %v4972_v27 = vadd.f32 %v4971_v7, %v10003_v26  ;;  %v4989_v31 = vmul.f32 %v10003_v26, %v10003_v26 }
 0xd6b   :  { %v5001_v34 = vadd.f32 %v5000_v46, %v4988_v41 }
 0xd6c   :  { %v5014_v35 = vadd.f32 %v5013_v20, %v4989_v31  ;;  %v10008_v36 = vpop.f32.mrb[64].mxu0 }
 0xd6d   :  { %v4960_v39 = vadd.f32 %v4959_v22, %v10008_v36  ;;  %v4990_v42 = vmul.f32 %v10008_v36, %v10008_v36  ;;  %v10013_v43 = vpop.f32.mrb[65].mxu0 }
 0xd6e   :  { %v4973_v44 = vadd.f32 %v4972_v27, %v10013_v43  ;;  %v4991_v45 = vmul.f32 %v10013_v43, %v10013_v43 }
 0xd6f   :  { %v5002_v48 = vadd.f32 %v5001_v34, %v4990_v42 }
 0xd70   :  { %v5015_v49 = vadd.f32 %v5014_v35, %v4991_v45  ;;  %v10018_v50 = vpop.f32.mrb[66].mxu0 }
 0xd71   :  { %v4961_v32 = vadd.f32 %v4960_v39, %v10018_v50  ;;  %v4992_v11 = vmul.f32 %v10018_v50, %v10018_v50  ;;  %v10023_v51 = vpop.f32.mrb[67].mxu0 }
 0xd72   :  { %v4974_v40 = vadd.f32 %v4973_v44, %v10023_v51  ;;  %v4993_v52 = vmul.f32 %v10023_v51, %v10023_v51 }
 0xd73   :  { %v5003_v53 = vadd.f32 %v5002_v48, %v4992_v11 }
 0xd74   :  { %v5016_v37 = vadd.f32 %v5015_v49, %v4993_v52  ;;  %v10028_v54 = vpop.f32.mrb[68].mxu0  ;;  %v5204_v52 = vld [vmem:[%s10506_s15] sm:$0xff] }
 0xd75   :  { %v4962_v55 = vadd.f32 %v4961_v32, %v10028_v54  ;;  %v4994_v56 = vmul.f32 %v10028_v54, %v10028_v54  ;;  %v10033_v57 = vpop.f32.mrb[69].mxu0 }
 0xd76   :  { %v4975_v58 = vadd.f32 %v4974_v40, %v10033_v57  ;;  %v4995_v59 = vmul.f32 %v10033_v57, %v10033_v57  ;;  %v5205_v40 = vld [vmem:[%s10506_s15 + $0x8] sm:$0xff] }
 0xd77   :  { %v5004_v60 = vadd.f32 %v5003_v53, %v4994_v56  ;;  %5210 = vmatprep.subr.mxu0 %v5205_v40  ;;  %5285 = vmatprep.subr.mxu1 %v5205_v40  ;;  %v5428_v53 = vld [vmem:[#allocation17] sm:$0xff] }
 0xd78   :  { %v5017_v61 = vadd.f32 %v5016_v37, %v4995_v59  ;;  %v10038_v62 = vpop.f32.mrb[70].mxu0  ;;  %v5432_v37 = vld [vmem:[#allocation17 + $0x20] sm:$0xff]  ;;  %v5433_v59 = vld [vmem:[#allocation17 + $0x28] sm:$0xff] }
 0xd79   :  { %v4963_v63 = vadd.f32 %v4962_v55, %v10038_v62  ;;  %v4996_v0 = vmul.f32 %v10038_v62, %v10038_v62  ;;  %v10043_v1 = vpop.f32.mrb[71].mxu0  ;;  %v5429_v55 = vld [vmem:[#allocation17 + $0x8] sm:$0xff]  ;;  %v7424_v56 = vcombine.low %v5428_v53, %v5432_v37 }
 0xd7a   :  { %v4976_v2 = vadd.f32 %v4975_v58, %v10043_v1  ;;  %v4997_v4 = vmul.f32 %v10043_v1, %v10043_v1  ;;  %v7425_v58 = vcombine.high %v5428_v53, %v5432_v37  ;;  %v5460_v53 = vld [vmem:[#allocation17 + $0x100] sm:$0xff] }
 0xd7b   :  { %v5005_v5 = vadd.f32 %v5004_v60, %v4996_v0  ;;  %v7426_v60 = vcombine.low %v5429_v55, %v5433_v59  ;;  %v5464_v37 = vld [vmem:[#allocation17 + $0x120] sm:$0xff] }
 0xd7c   :  { %v5018_v23 = vadd.f32 %v5017_v61, %v4997_v4  ;;  %v10048_v25 = vpop.f32.mrb[72].mxu0  ;;  %v7427_v61 = vcombine.high %v5429_v55, %v5433_v59  ;;  %v5473_v59 = vld [vmem:[#allocation17 + $0x168] sm:$0xff] }
 0xd7d   :  { %v4964_v8 = vadd.f32 %v4963_v63, %v10048_v25  ;;  %v4998_v9 = vmul.f32 %v10048_v25, %v10048_v25  ;;  %v10053_v6 = vpop.f32.mrb[73].mxu0 }
 0xd7e   :  { %v4977_v10 = vadd.f32 %v4976_v2, %v10053_v6  ;;  %v4999_v24 = vmul.f32 %v10053_v6, %v10053_v6 }
 0xd7f   :  { %v4965_v29 = vrot.slane %v4964_v8, 4  ;;  %v5006_v12 = vadd.f32 %v5005_v5, %v4998_v9 }
 0xd80   :  { %v4978_v13 = vrot.slane %v4977_v10, 4  ;;  %v5019_v14 = vadd.f32 %v5018_v23, %v4999_v24 }
 0xd81   :  { %v4966_v18 = vadd.f32 %v4965_v29, %v4964_v8  ;;  %v5007_v28 = vrot.slane %v5006_v12, 4 }
 0xd82   :  { %v4979_v19 = vadd.f32 %v4978_v13, %v4977_v10  ;;  %v5020_v47 = vrot.slane %v5019_v14, 4  ;;  %v5441_v13 = vld [vmem:[#allocation17 + $0x68] sm:$0xff] }
 0xd83   :  { %v4967_v7 = vrot.slane %v4966_v18, 2  ;;  %v5008_v21 = vadd.f32 %v5007_v28, %v5006_v12  ;;  %v5437_v12 = vld [vmem:[#allocation17 + $0x48] sm:$0xff] }
 0xd84   :  { %v4980_v46 = vrot.slane %v4979_v19, 2  ;;  %v5021_v20 = vadd.f32 %v5020_v47, %v5019_v14  ;;  %v5436_v14 = vld [vmem:[#allocation17 + $0x40] sm:$0xff]  ;;  %v7435_v28 = vcombine.high %v5437_v12, %v5441_v13  ;;  %v5445_v47 = vld [vmem:[#allocation17 + $0x88] sm:$0xff] }
 0xd85   :  { %v4968_v22 = vadd.f32 %v4967_v7, %v4966_v18  ;;  %v5009_v41 = vrot.slane %v5008_v21, 2  ;;  %v5440_v18 = vld [vmem:[#allocation17 + $0x60] sm:$0xff]  ;;  %v5449_v7 = vld [vmem:[#allocation17 + $0xa8] sm:$0xff] }
 0xd86   :  { %v4981_v27 = vadd.f32 %v4980_v46, %v4979_v19  ;;  %v5022_v31 = vrot.slane %v5021_v20, 2  ;;  %v7433_v46 = vcombine.high %v5436_v14, %v5440_v18 }
 0xd87   :  { %v4969_v34 = vrot.slane %v4968_v22, 1  ;;  %v5010_v35 = vadd.f32 %v5009_v41, %v5008_v21  ;;  %v5448_v41 = vld [vmem:[#allocation17 + $0xa0] sm:$0xff] }
 0xd88   :  { %v4982_v39 = vrot.slane %v4981_v27, 1  ;;  %v5023_v42 = vadd.f32 %v5022_v31, %v5021_v20  ;;  %v7434_v20 = vcombine.low %v5437_v12, %v5441_v13  ;;  %v7432_v31 = vcombine.low %v5436_v14, %v5440_v18  ;;  %v5485_v13 = vld [vmem:[#allocation17 + $0x1c8] sm:$0xff] }
 0xd89   :  { %v5011_v44 = vrot.slane %v5010_v35, 1  ;;  %v4970_v49 = vadd.f32 %v4969_v34, %v4968_v22  ;;  %v5444_v22 = vld [vmem:[#allocation17 + $0x80] sm:$0xff]  ;;  %v5453_v34 = vld [vmem:[#allocation17 + $0xc8] sm:$0xff] }
 0xd8a   :  { %v4983_v45 = vadd.f32 %v4982_v39, %v4981_v27  ;;  %v5024_v48 = vrot.slane %v5023_v42, 1  ;;  %v7443_v27 = vcombine.high %v5445_v47, %v5449_v7  ;;  %v7441_v39 = vcombine.high %v5444_v22, %v5448_v41  ;;  %v5489_v14 = vld [vmem:[#allocation17 + $0x1e8] sm:$0xff] }
 0xd8b   :  { %v5012_v11 = vadd.f32 %v5011_v44, %v5010_v35  ;;  %v5457_v35 = vld [vmem:[#allocation17 + $0xe8] sm:$0xff]  ;;  %v5452_v44 = vld [vmem:[#allocation17 + $0xc0] sm:$0xff] }
 0xd8c   :  { %5122 = vmatprep.mubr.f32.mxu1 %v4983_v45  ;;  %v5025_v32 = vadd.f32 %v5024_v48, %v5023_v42  ;;  %v7442_v42 = vcombine.low %v5445_v47, %v5449_v7  ;;  %v5456_v45 = vld [vmem:[#allocation17 + $0xe0] sm:$0xff]  ;;  %v7451_v48 = vcombine.high %v5453_v34, %v5457_v35  ;;  %v7483_v7 = vcombine.high %v5485_v13, %v5489_v14 }
 0xd8d   :  { %5123 = vmatmul.mubr.f32.vlgmr.msra.gmra.mrb[42].mxu1 %v4970_v49  ;;  %v7440_v49 = vcombine.low %v5444_v22, %v5448_v41  ;;  %v7449_v40 = vcombine.high %v5452_v44, %v5456_v45  ;;  %v5488_v47 = vld [vmem:[#allocation17 + $0x1e0] sm:$0xff]  ;;  %v7482_v41 = vcombine.low %v5485_v13, %v5489_v14 }
 0xd8e   :  { %5193 = vmatprep.mubr.f32.mxu0 %v5025_v32  ;;  %5349 = vmatprep.mubr.f32.mxu1 %v8727_v30  ;;  %v5461_v32 = vld [vmem:[#allocation17 + $0x108] sm:$0xff] }
 0xd8f   :  { %5194 = vmatmul.mubr.f32.vlgmr.msra.gmra.mrb[74].mxu0 %v5012_v11  ;;  %5286 = vmatpush1.msra.mxu1 %v5204_v52  ;;  %v5465_v11 = vld [vmem:[#allocation17 + $0x128] sm:$0xff] }
 0xd90   :  { %5274 = vmatprep.mubr.f32.mxu0 %v8727_v30  ;;  %5211 = vmatpush1.msra.mxu0 %v5204_v52  ;;  %v7450_v52 = vcombine.low %v5453_v34, %v5457_v35  ;;  %v7459_v55 = vcombine.high %v5461_v32, %v5465_v11 }
 0xd91   :  { %6196 = vmatprep.subr.bf16.mxu1 %v7425_v58  ;;  %6269 = vmatprep.subr.bf16.mxu0 %v7427_v61  ;;  %v5469_v58 = vld [vmem:[#allocation17 + $0x148] sm:$0xff]  ;;  %v7458_v61 = vcombine.low %v5461_v32, %v5465_v11 }
 0xe60   :  { %v7810_v63 = vpop.f32.mrb[42].mxu1 }
 0xe61   :  { %v7811_v0 = vpop.f32.mrb[43].mxu1 }
 0xe62   :  { %v7812_v2 = vadd.f32 %v7811_v0, %v7810_v63  ;;  %v7845_v4 = vpop.f32.mrb[74].mxu0  ;;  %v5468_v63 = vld [vmem:[#allocation17 + $0x140] sm:$0xff] }
 0xe63   :  { %v7846_v5 = vpop.f32.mrb[75].mxu0  ;;  %v5472_v0 = vld [vmem:[#allocation17 + $0x160] sm:$0xff] }
 0xe64   :  { %v5128_v23 = vmul.f32 0.00048828125, %v7812_v2  ;;  %v7847_v8 = vadd.f32 %v7846_v5, %v7845_v4  ;;  %v7467_v2 = vcombine.high %v5469_v58, %v5473_v59  ;;  %v7456_v4 = vcombine.low %v5460_v53, %v5464_v37  ;;  %v5477_v5 = vld [vmem:[#allocation17 + $0x188] sm:$0xff] }
 0xe65   :  { %v7464_v12 = vcombine.low %v5468_v63, %v5472_v0 }
 0xe66   :  { %v5200_v9 = vmul.f32 %v5128_v23, %v5128_v23  ;;  %v5199_v10 = vmul.f32 0.00048828125, %v7847_v8  ;;  %v7465_v8 = vcombine.high %v5468_v63, %v5472_v0 }
 0xe68   :  { %v5201_v24 = vsub.f32 %v5199_v10, %v5200_v9  ;;  %v7466_v9 = vcombine.low %v5469_v58, %v5473_v59  ;;  %v5476_v10 = vld [vmem:[#allocation17 + $0x180] sm:$0xff] }
 0xe6a   :  { %v5202_v29 = vadd.f32 1e-05, %v5201_v24  ;;  %v5480_v24 = vld [vmem:[#allocation17 + $0x1a0] sm:$0xff] }
 0xe6b   :  { %v7473_v18 = vcombine.high %v5476_v10, %v5480_v24 }
 0xe6c   :  { %8363 = vrsqrt.f32 %v5202_v29 }
 0xe76   :  { %v8364_v19 = vpop.eup %8363 }
 0xe77   :  { %7422 = vmatmul.mubr.msk.f32.vlgmr.msra.gmra.mrb[76].mxu0 %vm5206_vm4, %v8364_v19  ;;  %v5281_v21 = vmul.f32 %v8364_v19, %v5128_v23  ;;  %v5481_v23 = vld [vmem:[#allocation17 + $0x1a8] sm:$0xff]  ;;  %v5484_v19 = vld [vmem:[#allocation17 + $0x1c0] sm:$0xff] }
 0xe78   :  { %6270 = vmatpush1.bf16.msra.mxu0 %v7426_v60  ;;  %v7457_v60 = vcombine.high %v5460_v53, %v5464_v37  ;;  %v7475_v29 = vcombine.high %v5477_v5, %v5481_v23  ;;  %v7481_v22 = vcombine.high %v5484_v19, %v5488_v47  ;;  %v7480_v35 = vcombine.low %v5484_v19, %v5488_v47  ;;  %v5532_v47 = vld [vmem:[#allocation17 + $0x340] sm:$0xff] }
 0xe79   :  { %7423 = vmatmul.mubr.msk.f32.vlgmr.msra.gmra.mrb[60].mxu1 %vm5206_vm4, %v5281_v21  ;;  %6271 = vmatprep.subr.bf16.mxu0 %v7435_v28  ;;  %v7474_v28 = vcombine.low %v5477_v5, %v5481_v23  ;;  %v7472_v21 = vcombine.low %v5476_v10, %v5480_v24 }
 0xe7a   :  { %6197 = vmatpush1.bf16.msra.mxu1 %v7424_v56  ;;  %v7448_v56 = vcombine.low %v5452_v44, %v5456_v45 }
 0xe7b   :  { %6198 = vmatprep.subr.bf16.mxu1 %v7433_v46  ;;  %v5493_v46 = vld [vmem:[#allocation17 + $0x208] sm:$0xff] }
 0xe7c   :  { %6272 = vmatpush1.bf16.msra.mxu0 %v7434_v20  ;;  %v5497_v20 = vld [vmem:[#allocation17 + $0x228] sm:$0xff] }
 0xe7d   :  { %6273 = vmatprep.subr.bf16.mxu0 %v7443_v27  ;;  %v5492_v27 = vld [vmem:[#allocation17 + $0x200] sm:$0xff]  ;;  %v7491_v34 = vcombine.high %v5493_v46, %v5497_v20  ;;  %v7490_v45 = vcombine.low %v5493_v46, %v5497_v20  ;;  %v5537_v20 = vld [vmem:[#allocation17 + $0x368] sm:$0xff] }
 0xe7e   :  { %6199 = vmatpush1.bf16.msra.mxu1 %v7432_v31  ;;  %v5496_v31 = vld [vmem:[#allocation17 + $0x220] sm:$0xff] }
 0xe7f   :  { %6200 = vmatprep.subr.bf16.mxu1 %v7441_v39  ;;  %v5501_v39 = vld [vmem:[#allocation17 + $0x248] sm:$0xff]  ;;  %v7489_v44 = vcombine.high %v5492_v27, %v5496_v31  ;;  %v7488_v11 = vcombine.low %v5492_v27, %v5496_v31  ;;  %v5540_v31 = vld [vmem:[#allocation17 + $0x380] sm:$0xff] }
 0xe80   :  { %6274 = vmatpush1.bf16.msra.mxu0 %v7442_v42  ;;  %v5505_v42 = vld [vmem:[#allocation17 + $0x268] sm:$0xff] }
 0xe81   :  { %6275 = vmatprep.subr.bf16.mxu0 %v7451_v48  ;;  %v5500_v48 = vld [vmem:[#allocation17 + $0x240] sm:$0xff]  ;;  %v7499_v32 = vcombine.high %v5501_v39, %v5505_v42  ;;  %v7498_v37 = vcombine.low %v5501_v39, %v5505_v42  ;;  %v5545_v42 = vld [vmem:[#allocation17 + $0x3a8] sm:$0xff] }
 0xe82   :  { %6201 = vmatpush1.bf16.msra.mxu1 %v7440_v49  ;;  %v5504_v49 = vld [vmem:[#allocation17 + $0x260] sm:$0xff] }
 0xe83   :  { %6202 = vmatprep.subr.bf16.mxu1 %v7449_v40  ;;  %v5509_v40 = vld [vmem:[#allocation17 + $0x288] sm:$0xff]  ;;  %v7497_v53 = vcombine.high %v5500_v48, %v5504_v49  ;;  %v7496_v59 = vcombine.low %v5500_v48, %v5504_v49  ;;  %v5548_v49 = vld [vmem:[#allocation17 + $0x3c0] sm:$0xff] }
 0xe84   :  { %6276 = vmatpush1.bf16.msra.mxu0 %v7450_v52  ;;  %v5513_v52 = vld [vmem:[#allocation17 + $0x2a8] sm:$0xff] }
 0xe85   :  { %6277 = vmatprep.subr.bf16.mxu0 %v7459_v55  ;;  %v5508_v55 = vld [vmem:[#allocation17 + $0x280] sm:$0xff]  ;;  %v7507_v58 = vcombine.high %v5509_v40, %v5513_v52  ;;  %v7506_v0 = vcombine.low %v5509_v40, %v5513_v52 }
 0xe86   :  { %6203 = vmatpush1.bf16.msra.mxu1 %v7448_v56  ;;  %v5512_v56 = vld [vmem:[#allocation17 + $0x2a0] sm:$0xff] }
 0xe87   :  { %6204 = vmatprep.subr.bf16.mxu1 %v7457_v60  ;;  %v5517_v60 = vld [vmem:[#allocation17 + $0x2c8] sm:$0xff]  ;;  %v7505_v63 = vcombine.high %v5508_v55, %v5512_v56  ;;  %v7504_v23 = vcombine.low %v5508_v55, %v5512_v56  ;;  %v10066_v56 = vld [vmem:[#allocation17 + $0x10] sm:$0xff] }
 0xe88   :  { %6278 = vmatpush1.bf16.msra.mxu0 %v7458_v61  ;;  %v5521_v61 = vld [vmem:[#allocation17 + $0x2e8] sm:$0xff] }
 0xe89   :  { %6279 = vmatprep.subr.bf16.mxu0 %v7467_v2  ;;  %v5516_v2 = vld [vmem:[#allocation17 + $0x2c0] sm:$0xff]  ;;  %v7515_v5 = vcombine.high %v5517_v60, %v5521_v61  ;;  %v7514_v24 = vcombine.low %v5517_v60, %v5521_v61  ;;  %v10074_v61 = vld [vmem:[#allocation17 + $0x38] sm:$0xff] }
 0xe8a   :  { %6205 = vmatpush1.bf16.msra.mxu1 %v7456_v4  ;;  %v5520_v4 = vld [vmem:[#allocation17 + $0x2e0] sm:$0xff] }
 0xe8b   :  { %6206 = vmatprep.subr.bf16.mxu1 %v7465_v8  ;;  %v5525_v8 = vld [vmem:[#allocation17 + $0x308] sm:$0xff]  ;;  %v7513_v10 = vcombine.high %v5516_v2, %v5520_v4  ;;  %v7512_v14 = vcombine.low %v5516_v2, %v5520_v4  ;;  %v10082_v4 = vld [vmem:[#allocation17 + $0x50] sm:$0xff] }
 0xe8c   :  { %6280 = vmatpush1.bf16.msra.mxu0 %v7466_v9  ;;  %v5529_v9 = vld [vmem:[#allocation17 + $0x328] sm:$0xff] }
 0xe8d   :  { %6281 = vmatprep.subr.bf16.mxu0 %v7475_v29  ;;  %v5524_v29 = vld [vmem:[#allocation17 + $0x300] sm:$0xff]  ;;  %v7523_v13 = vcombine.high %v5525_v8, %v5529_v9 }
 0xe8e   :  { %6207 = vmatpush1.bf16.msra.mxu1 %v7464_v12  ;;  %v5528_v12 = vld [vmem:[#allocation17 + $0x320] sm:$0xff] }
 0xe8f   :  { %6208 = vmatprep.subr.bf16.mxu1 %v7473_v18  ;;  %v7521_v18 = vcombine.high %v5524_v29, %v5528_v12  ;;  %v7520_v19 = vcombine.low %v5524_v29, %v5528_v12 }
 0xe90   :  { %6282 = vmatpush1.bf16.msra.mxu0 %v7474_v28  ;;  %v7522_v28 = vcombine.low %v5525_v8, %v5529_v9  ;;  %v10088_v8 = vld [vmem:[#allocation17 + $0x78] sm:$0xff]  ;;  %v10090_v9 = vld [vmem:[#allocation17 + $0x90] sm:$0xff] }
 0xe91   :  { %6283 = vmatprep.subr.bf16.mxu0 %v7483_v7  ;;  %v5536_v7 = vld [vmem:[#allocation17 + $0x360] sm:$0xff] }
 0xe92   :  { %6209 = vmatpush1.bf16.msra.mxu1 %v7472_v21  ;;  %v5533_v21 = vld [vmem:[#allocation17 + $0x348] sm:$0xff]  ;;  %v7529_v46 = vcombine.high %v5532_v47, %v5536_v7 }
 0xe93   :  { %6210 = vmatprep.subr.bf16.mxu1 %v7481_v22  ;;  %v7528_v22 = vcombine.low %v5532_v47, %v5536_v7  ;;  %v7531_v27 = vcombine.high %v5533_v21, %v5537_v20 }
 0xe94   :  { %6284 = vmatpush1.bf16.msra.mxu0 %v7482_v41  ;;  %v7530_v41 = vcombine.low %v5533_v21, %v5537_v20 }
 0xe95   :  { %6285 = vmatprep.subr.bf16.mxu0 %v7491_v34  ;;  %v5544_v34 = vld [vmem:[#allocation17 + $0x3a0] sm:$0xff] }
 0xe96   :  { %6211 = vmatpush1.bf16.msra.mxu1 %v7480_v35  ;;  %v5541_v35 = vld [vmem:[#allocation17 + $0x388] sm:$0xff]  ;;  %v7537_v39 = vcombine.high %v5540_v31, %v5544_v34 }
 0xe97   :  { %6212 = vmatprep.subr.bf16.mxu1 %v7489_v44  ;;  %v7536_v44 = vcombine.low %v5540_v31, %v5544_v34  ;;  %v7539_v48 = vcombine.high %v5541_v35, %v5545_v42 }
 0xe98   :  { %6286 = vmatpush1.bf16.msra.mxu0 %v7490_v45  ;;  %v7538_v45 = vcombine.low %v5541_v35, %v5545_v42 }
 0xe99   :  { %6287 = vmatprep.subr.bf16.mxu0 %v7499_v32  ;;  %v5552_v32 = vld [vmem:[#allocation17 + $0x3e0] sm:$0xff] }
 0xe9a   :  { %6213 = vmatpush1.bf16.msra.mxu1 %v7488_v11  ;;  %v5549_v11 = vld [vmem:[#allocation17 + $0x3c8] sm:$0xff]  ;;  %v7544_v40 = vcombine.low %v5548_v49, %v5552_v32  ;;  %v7545_v52 = vcombine.high %v5548_v49, %v5552_v32 }
 0xe9b   :  { %6214 = vmatprep.subr.bf16.mxu1 %v7497_v53  ;;  %v5553_v53 = vld [vmem:[#allocation17 + $0x3e8] sm:$0xff] }
 0xe9c   :  { %6288 = vmatpush1.bf16.msra.mxu0 %v7498_v37  ;;  %v7546_v37 = vcombine.low %v5549_v11, %v5553_v53  ;;  %v7547_v55 = vcombine.high %v5549_v11, %v5553_v53 }
 0xe9d   :  { %6289 = vmatprep.subr.bf16.mxu0 %v7507_v58  ;;  %v10068_v58 = vld [vmem:[#allocation17 + $0x30] sm:$0xff] }
 0xe9e   :  { %6215 = vmatpush1.bf16.msra.mxu1 %v7496_v59  ;;  %v10070_v59 = vld [vmem:[#allocation17 + $0x18] sm:$0xff]  ;;  %v7429_v60 = vcombine.high %v10066_v56, %v10068_v58 }
 0xe9f   :  { %6216 = vmatprep.subr.bf16.mxu1 %v7505_v63  ;;  %v7428_v63 = vcombine.low %v10066_v56, %v10068_v58  ;;  %v7431_v2 = vcombine.high %v10070_v59, %v10074_v61 }
 0xea0   :  { %6290 = vmatpush1.bf16.msra.mxu0 %v7506_v0  ;;  %v7430_v0 = vcombine.low %v10070_v59, %v10074_v61 }
 0xea1   :  { %6291 = vmatprep.subr.bf16.mxu0 %v7515_v5  ;;  %v10084_v5 = vld [vmem:[#allocation17 + $0x70] sm:$0xff] }
 0xea2   :  { %6217 = vmatpush1.bf16.msra.mxu1 %v7504_v23  ;;  %v10086_v23 = vld [vmem:[#allocation17 + $0x58] sm:$0xff] }
 0xea3   :  { %6218 = vmatprep.subr.bf16.mxu1 %v7513_v10  ;;  %v10092_v10 = vld [vmem:[#allocation17 + $0xb0] sm:$0xff]  ;;  %v7439_v47 = vcombine.high %v10086_v23, %v10088_v8 }
 0xea4   :  { %6292 = vmatpush1.bf16.msra.mxu0 %v7514_v24  ;;  %v7445_v7 = vcombine.high %v10090_v9, %v10092_v10 }
 0xea5   :  { %6293 = vmatprep.subr.bf16.mxu0 %v7523_v13  ;;  %v7436_v13 = vcombine.low %v10082_v4, %v10084_v5 }
 0xea6   :  { %6219 = vmatpush1.bf16.msra.mxu1 %v7512_v14  ;;  %v7437_v14 = vcombine.high %v10082_v4, %v10084_v5  ;;  %v5466_v5 = vld [vmem:[#allocation17 + $0x130] sm:$0xff] }
 0xea7   :  { %6220 = vmatprep.subr.bf16.mxu1 %v7521_v18 }
 0xea8   :  { %6294 = vmatpush1.bf16.msra.mxu0 %v7522_v28 }
 0xea9   :  { %6295 = vmatprep.subr.bf16.mxu0 %v7531_v27 }
 0xeaa   :  { %6221 = vmatpush1.bf16.msra.mxu1 %v7520_v19  ;;  %v7438_v19 = vcombine.low %v10086_v23, %v10088_v8 }
 0xeab   :  { %6222 = vmatprep.subr.bf16.mxu1 %v7529_v46 }
 0xeac   :  { %6296 = vmatpush1.bf16.msra.mxu0 %v7530_v41 }
 0xead   :  { %6297 = vmatprep.subr.bf16.mxu0 %v7539_v48 }
 0xeae   :  { %6223 = vmatpush1.bf16.msra.mxu1 %v7528_v22 }
 0xeaf   :  { %6224 = vmatprep.subr.bf16.mxu1 %v7537_v39 }
 0xeb0   :  { %6298 = vmatpush1.bf16.msra.mxu0 %v7538_v45 }
 0xeb1   :  { %6299 = vmatprep.subr.bf16.mxu0 %v7547_v55 }
 0xeb2   :  { %6225 = vmatpush1.bf16.msra.mxu1 %v7536_v44 }
 0xeb3   :  { %6226 = vmatprep.subr.bf16.mxu1 %v7545_v52 }
 0xeb4   :  { %6300 = vmatpush1.bf16.msra.mxu0 %v7546_v37 }
 0xeb5   :  { %6415 = vmatprep.subr.bf16.mxu0 %v7431_v2 }
 0xeb6   :  { %6227 = vmatpush1.bf16.msra.mxu1 %v7544_v40 }
 0xeb7   :  { %6342 = vmatprep.subr.bf16.mxu1 %v7429_v60 }
 0xf4a   :  { %v5276_v24 = vpop.f32.mrb[76].mxu0 }
 0xf4b   :  { %v10095_v29 = vrot.slane %v5276_v24, %v9360_v3  ;;  %v5278_v12 = vpop.f32.mrb[77].mxu0 }
 0xf4c   :  { %v5363_v18 = vrot.slane %v5278_v12, %v9360_v3  ;;  %v5351_v28 = vpop.f32.mrb[60].mxu1 }
 0xf4d   :  { %v10109_v21 = vrot.slane %v5351_v28, %v9360_v3  ;;  %v5353_v46 = vpop.f32.mrb[61].mxu1  ;;  %v5364_v20 = vmul.f32 %v10095_v29, %v9978_v16  ;;  %v5366_v22 = vmul.f32 %v10095_v29, %v9982_v17  ;;  %v5368_v41 = vmul.f32 %v10095_v29, %v9998_v33 }
 0xf4e   :  { %v10118_v27 = vrot.slane %v5353_v46, %v9360_v3  ;;  %v5365_v31 = vmul.f32 %v5363_v18, %v9980_v15  ;;  %v5367_v34 = vmul.f32 %v5363_v18, %v9990_v38  ;;  %v5369_v35 = vmul.f32 %v5363_v18, %v10003_v26 }
 0xf4f   :  { %v5388_v39 = vsub.f32 %v5364_v20, %v10109_v21  ;;  %v5390_v42 = vsub.f32 %v5366_v22, %v10109_v21  ;;  %v5371_v16 = vmul.f32 %v5363_v18, %v10013_v43  ;;  %v5370_v17 = vmul.f32 %v10095_v29, %v10008_v36 }
 0xf50   :  { %v5389_v33 = vsub.f32 %v5365_v31, %v10118_v27  ;;  %v5391_v3 = vsub.f32 %v5367_v34, %v10118_v27  ;;  %v5393_v44 = vsub.f32 %v5369_v35, %v10118_v27  ;;  %v5392_v15 = vsub.f32 %v5368_v41, %v10109_v21 }
 0xf51   :  { %v5404_v38 = vmax.f32 %v5388_v39, 0.0  ;;  %v5406_v45 = vmax.f32 %v5390_v42, 0.0  ;;  %v5395_v26 = vsub.f32 %v5371_v16, %v10118_v27  ;;  %v5394_v48 = vsub.f32 %v5370_v17, %v10109_v21 }
 0xf52   :  { %v5405_v49 = vmax.f32 %v5389_v33, 0.0  ;;  %v5407_v32 = vmax.f32 %v5391_v3, 0.0  ;;  %v5409_v43 = vmax.f32 %v5393_v44, 0.0  ;;  %v5408_v11 = vmax.f32 %v5392_v15, 0.0  ;;  %v5467_v44 = vld [vmem:[#allocation17 + $0x138] sm:$0xff]  ;;  %v5474_v15 = vld [vmem:[#allocation17 + $0x170] sm:$0xff] }
 0xf53   :  { %v10134_v40 = vpack.c.bf16 %v5406_v45, %v5404_v38  ;;  %v5411_v36 = vmax.f32 %v5395_v26, 0.0  ;;  %v5410_v52 = vmax.f32 %v5394_v48, 0.0  ;;  %v5373_v53 = vmul.f32 %v5363_v18, %v10023_v51  ;;  %v5447_v51 = vld [vmem:[#allocation17 + $0x98] sm:$0xff] }
 0xf54   :  { %v10137_v37 = vpack.c.bf16 %v5407_v32, %v5405_v49  ;;  %v5375_v55 = vmul.f32 %v5363_v18, %v10033_v57  ;;  %v5372_v60 = vmul.f32 %v10095_v29, %v10018_v50  ;;  %v5374_v2 = vmul.f32 %v10095_v29, %v10028_v54  ;;  %v5451_v57 = vld [vmem:[#allocation17 + $0xb8] sm:$0xff]  ;;  %v5478_v49 = vld [vmem:[#allocation17 + $0x190] sm:$0xff] }
 0xf55   :  { %v10144_v24 = vpack.c.bf16 %v5411_v36, %v5409_v43  ;;  %v10146_v12 = vpack.c.bf16 %v5410_v52, %v5408_v11  ;;  %v5397_v28 = vsub.f32 %v5373_v53, %v10118_v27  ;;  %v5377_v46 = vmul.f32 %v5363_v18, %v10043_v1  ;;  %v5471_v38 = vld [vmem:[#allocation17 + $0x158] sm:$0xff]  ;;  %v5482_v11 = vld [vmem:[#allocation17 + $0x1b0] sm:$0xff] }
 0xf56   :  { %6228 = vmatprep.mubr.bf16.mxu1 %v10137_v37  ;;  %6301 = vmatprep.mubr.bf16.mxu0 %v10137_v37  ;;  %v5399_v20 = vsub.f32 %v5375_v55, %v10118_v27  ;;  %v5396_v50 = vsub.f32 %v5372_v60, %v10109_v21  ;;  %v5398_v54 = vsub.f32 %v5374_v2, %v10109_v21  ;;  %v5475_v45 = vld [vmem:[#allocation17 + $0x178] sm:$0xff] }
 0xf57   :  { %6229 = vmatmul.mubr.bf16.vlgmr.msra.gmra.mrb[64].mxu1 %v10134_v40  ;;  %6302 = vmatmul.mubr.bf16.vlgmr.msra.gmra.mrb[80].mxu0 %v10134_v40  ;;  %v5413_v22 = vmax.f32 %v5397_v28, 0.0  ;;  %v5379_v41 = vmul.f32 %v5363_v18, %v10053_v6  ;;  %v5401_v1 = vsub.f32 %v5377_v46, %v10118_v27  ;;  %v5376_v31 = vmul.f32 %v10095_v29, %v10038_v62  ;;  %v5479_v36 = vld [vmem:[#allocation17 + $0x198] sm:$0xff]  ;;  %v5486_v28 = vld [vmem:[#allocation17 + $0x1d0] sm:$0xff] }
 0xf58   :  { %6343 = vmatpush1.bf16.msra.mxu1 %v7428_v63  ;;  %6416 = vmatpush1.bf16.msra.mxu0 %v7430_v0  ;;  %v5415_v34 = vmax.f32 %v5399_v20, 0.0  ;;  %v5412_v35 = vmax.f32 %v5396_v50, 0.0  ;;  %v5414_v39 = vmax.f32 %v5398_v54, 0.0  ;;  %v5378_v42 = vmul.f32 %v10095_v29, %v10048_v25  ;;  %v5454_v25 = vld [vmem:[#allocation17 + $0xd0] sm:$0xff]  ;;  %v5455_v0 = vld [vmem:[#allocation17 + $0xd8] sm:$0xff] }
 0xf59   :  { %6238 = vmatprep.mubr.bf16.mxu1 %v10144_v24  ;;  %6311 = vmatprep.mubr.bf16.mxu0 %v10144_v24  ;;  %v7447_v6 = vcombine.high %v5447_v51, %v5451_v57  ;;  %v5403_v62 = vsub.f32 %v5379_v41, %v10118_v27  ;;  %v5417_v18 = vmax.f32 %v5401_v1, 0.0  ;;  %v5400_v56 = vsub.f32 %v5376_v31, %v10109_v21  ;;  %v5458_v63 = vld [vmem:[#allocation17 + $0xf0] sm:$0xff]  ;;  %v5459_v29 = vld [vmem:[#allocation17 + $0xf8] sm:$0xff] }
 0xf5a   :  { %6344 = vmatprep.subr.bf16.mxu1 %v7437_v14  ;;  %6417 = vmatprep.subr.bf16.mxu0 %v7439_v47  ;;  %v10179_v58 = vpack.c.bf16 %v5415_v34, %v5413_v22  ;;  %v10181_v59 = vpack.c.bf16 %v5414_v39, %v5412_v35  ;;  %v5402_v61 = vsub.f32 %v5378_v42, %v10109_v21  ;;  %v5462_v21 = vld [vmem:[#allocation17 + $0x110] sm:$0xff]  ;;  %v5483_v52 = vld [vmem:[#allocation17 + $0x1b8] sm:$0xff] }
 0xf5b   :  { %v5419_v27 = vmax.f32 %v5403_v62, 0.0  ;;  %v5416_v16 = vmax.f32 %v5400_v56, 0.0  ;;  %v7444_v14 = vcombine.low %v10090_v9, %v10092_v10  ;;  %v7446_v47 = vcombine.low %v5447_v51, %v5451_v57  ;;  %v5490_v46 = vld [vmem:[#allocation17 + $0x1f0] sm:$0xff]  ;;  %v5487_v51 = vld [vmem:[#allocation17 + $0x1d8] sm:$0xff] }
 0xf5c   :  { %6345 = vmatpush1.bf16.msra.mxu1 %v7436_v13  ;;  %6418 = vmatpush1.bf16.msra.mxu0 %v7438_v19  ;;  %v5418_v17 = vmax.f32 %v5402_v61, 0.0  ;;  %v7453_v3 = vcombine.high %v5454_v25, %v5458_v63  ;;  %v7455_v4 = vcombine.high %v5455_v0, %v5459_v29  ;;  %v5463_v13 = vld [vmem:[#allocation17 + $0x118] sm:$0xff]  ;;  %v7452_v8 = vcombine.low %v5454_v25, %v5458_v63  ;;  %v5494_v54 = vld [vmem:[#allocation17 + $0x210] sm:$0xff] }
 0xf5d   :  { %6346 = vmatprep.subr.bf16.mxu1 %v7445_v7  ;;  %6419 = vmatprep.subr.bf16.mxu0 %v7447_v6  ;;  %v10195_v33 = vpack.c.bf16 %v5419_v27, %v5417_v18  ;;  %v7454_v9 = vcombine.low %v5455_v0, %v5459_v29  ;;  %v7461_v10 = vcombine.high %v5462_v21, %v5466_v5  ;;  %v5470_v7 = vld [vmem:[#allocation17 + $0x150] sm:$0xff]  ;;  %v5491_v57 = vld [vmem:[#allocation17 + $0x1f8] sm:$0xff] }
 0xf5e   :  { %v10197_v23 = vpack.c.bf16 %v5418_v17, %v5416_v16  ;;  %v7463_v19 = vcombine.high %v5463_v13, %v5467_v44  ;;  %v7460_v26 = vcombine.low %v5462_v21, %v5466_v5  ;;  %v7462_v48 = vcombine.low %v5463_v13, %v5467_v44  ;;  %v5498_v1 = vld [vmem:[#allocation17 + $0x230] sm:$0xff]  ;;  %v5495_v31 = vld [vmem:[#allocation17 + $0x218] sm:$0xff] }
 0xf5f   :  { %6239 = vmatmul.mubr.bf16.gmra.mrb[68].mxu1 %v10146_v12  ;;  %6312 = vmatmul.mubr.bf16.gmra.mrb[84].mxu0 %v10146_v12  ;;  %v7469_v32 = vcombine.high %v5470_v7, %v5474_v15  ;;  %v7471_v43 = vcombine.high %v5471_v38, %v5475_v45  ;;  %v7468_v53 = vcombine.low %v5470_v7, %v5474_v15  ;;  %v5499_v34 = vld [vmem:[#allocation17 + $0x238] sm:$0xff]  ;;  %v5502_v62 = vld [vmem:[#allocation17 + $0x250] sm:$0xff] }
 0xf60   :  { %6347 = vmatpush1.bf16.msra.mxu1 %v7444_v14  ;;  %6420 = vmatpush1.bf16.msra.mxu0 %v7446_v47  ;;  %v7470_v55 = vcombine.low %v5471_v38, %v5475_v45  ;;  %v7477_v60 = vcombine.high %v5478_v49, %v5482_v11  ;;  %v7479_v2 = vcombine.high %v5479_v36, %v5483_v52  ;;  %v5506_v18 = vld [vmem:[#allocation17 + $0x270] sm:$0xff]  ;;  %v5503_v56 = vld [vmem:[#allocation17 + $0x258] sm:$0xff] }
 0xf61   :  { %6248 = vmatprep.mubr.bf16.mxu1 %v10179_v58  ;;  %6321 = vmatprep.mubr.bf16.mxu0 %v10179_v58  ;;  %v7476_v20 = vcombine.low %v5478_v49, %v5482_v11  ;;  %v7478_v50 = vcombine.low %v5479_v36, %v5483_v52  ;;  %v7485_v22 = vcombine.high %v5486_v28, %v5490_v46  ;;  %v5507_v25 = vld [vmem:[#allocation17 + $0x278] sm:$0xff]  ;;  %v5510_v27 = vld [vmem:[#allocation17 + $0x290] sm:$0xff] }
 0xf62   :  { %6348 = vmatprep.subr.bf16.mxu1 %v7453_v3  ;;  %6421 = vmatprep.subr.bf16.mxu0 %v7455_v4  ;;  %v7487_v41 = vcombine.high %v5487_v51, %v5491_v57  ;;  %v7484_v35 = vcombine.low %v5486_v28, %v5490_v46  ;;  %v7486_v39 = vcombine.low %v5487_v51, %v5491_v57  ;;  %v5514_v16 = vld [vmem:[#allocation17 + $0x2b0] sm:$0xff]  ;;  %v5511_v14 = vld [vmem:[#allocation17 + $0x298] sm:$0xff] }
 0xf63   :  { %v7493_v42 = vcombine.high %v5494_v54, %v5498_v1  ;;  %v7495_v6 = vcombine.high %v5495_v31, %v5499_v34  ;;  %v7492_v61 = vcombine.low %v5494_v54, %v5498_v1  ;;  %v7494_v63 = vcombine.low %v5495_v31, %v5499_v34  ;;  %v5518_v4 = vld [vmem:[#allocation17 + $0x2d0] sm:$0xff]  ;;  %v5519_v13 = vld [vmem:[#allocation17 + $0x2d8] sm:$0xff] }
 0xf64   :  { %6349 = vmatpush1.bf16.msra.mxu1 %v7452_v8  ;;  %6422 = vmatpush1.bf16.msra.mxu0 %v7454_v9  ;;  %v7501_v0 = vcombine.high %v5502_v62, %v5506_v18  ;;  %v7503_v29 = vcombine.high %v5503_v56, %v5507_v25  ;;  %v7500_v47 = vcombine.low %v5502_v62, %v5506_v18  ;;  %v5522_v5 = vld [vmem:[#allocation17 + $0x2f0] sm:$0xff]  ;;  %v5523_v44 = vld [vmem:[#allocation17 + $0x2f8] sm:$0xff] }
 0xf65   :  { %6350 = vmatprep.subr.bf16.mxu1 %v7461_v10  ;;  %6423 = vmatprep.subr.bf16.mxu0 %v7463_v19  ;;  %v7502_v17 = vcombine.low %v5503_v56, %v5507_v25  ;;  %v7509_v21 = vcombine.high %v5510_v27, %v5514_v16  ;;  %v7508_v8 = vcombine.low %v5510_v27, %v5514_v16  ;;  %v5526_v7 = vld [vmem:[#allocation17 + $0x310] sm:$0xff]  ;;  %v5527_v38 = vld [vmem:[#allocation17 + $0x318] sm:$0xff] }
 0xf66   :  { %v7517_v10 = vcombine.high %v5518_v4, %v5522_v5  ;;  %v7519_v19 = vcombine.high %v5519_v13, %v5523_v44  ;;  %v5530_v15 = vld [vmem:[#allocation17 + $0x330] sm:$0xff]  ;;  %v5531_v45 = vld [vmem:[#allocation17 + $0x338] sm:$0xff] }
 0xf67   :  { %6249 = vmatmul.mubr.bf16.gmra.mrb[72].mxu1 %v10181_v59  ;;  %6322 = vmatmul.mubr.bf16.gmra.mrb[88].mxu0 %v10181_v59  ;;  %v7525_v49 = vcombine.high %v5526_v7, %v5530_v15  ;;  %v5538_v11 = vld [vmem:[#allocation17 + $0x370] sm:$0xff]  ;;  %v5535_v36 = vld [vmem:[#allocation17 + $0x358] sm:$0xff] }
 0xf68   :  { %6351 = vmatpush1.bf16.msra.mxu1 %v7460_v26  ;;  %6424 = vmatpush1.bf16.msra.mxu0 %v7462_v48  ;;  %v7516_v26 = vcombine.low %v5518_v4, %v5522_v5  ;;  %v7518_v48 = vcombine.low %v5519_v13, %v5523_v44  ;;  %v5539_v52 = vld [vmem:[#allocation17 + $0x378] sm:$0xff]  ;;  %v5542_v28 = vld [vmem:[#allocation17 + $0x390] sm:$0xff] }
 0xf69   :  { %6258 = vmatprep.mubr.bf16.mxu1 %v10195_v33  ;;  %6331 = vmatprep.mubr.bf16.mxu0 %v10195_v33  ;;  %v5546_v46 = vld [vmem:[#allocation17 + $0x3b0] sm:$0xff]  ;;  %v5543_v51 = vld [vmem:[#allocation17 + $0x398] sm:$0xff] }
 0xf6a   :  { %6352 = vmatprep.subr.bf16.mxu1 %v7469_v32  ;;  %6425 = vmatprep.subr.bf16.mxu0 %v7471_v43  ;;  %v7527_v32 = vcombine.high %v5527_v38, %v5531_v45  ;;  %v5534_v43 = vld [vmem:[#allocation17 + $0x350] sm:$0xff]  ;;  %v5547_v57 = vld [vmem:[#allocation17 + $0x3b8] sm:$0xff]  ;;  %v7541_v54 = vcombine.high %v5542_v28, %v5546_v46 }
 0xf6b   :  { %v5554_v1 = vld [vmem:[#allocation17 + $0x3f0] sm:$0xff]  ;;  %v5551_v31 = vld [vmem:[#allocation17 + $0x3d8] sm:$0xff] }
 0xf6c   :  { %6353 = vmatpush1.bf16.msra.mxu1 %v7468_v53  ;;  %6426 = vmatpush1.bf16.msra.mxu0 %v7470_v55  ;;  %v7524_v53 = vcombine.low %v5526_v7, %v5530_v15  ;;  %v7526_v55 = vcombine.low %v5527_v38, %v5531_v45  ;;  %v5555_v34 = vld [vmem:[#allocation17 + $0x3f8] sm:$0xff] }
 0xf6d   :  { %6354 = vmatprep.subr.bf16.mxu1 %v7477_v60  ;;  %6427 = vmatprep.subr.bf16.mxu0 %v7479_v2  ;;  %v7533_v60 = vcombine.high %v5534_v43, %v5538_v11  ;;  %v7535_v2 = vcombine.high %v5535_v36, %v5539_v52  ;;  %v7550_v18 = vcombine.low %v5551_v31, %v5555_v34 }
 0xf6f   :  { %6259 = vmatmul.mubr.bf16.gmra.mrb[76].mxu1 %v10197_v23  ;;  %6332 = vmatmul.mubr.bf16.gmra.mrb[92].mxu0 %v10197_v23 }
 0xf70   :  { %6355 = vmatpush1.bf16.msra.mxu1 %v7476_v20  ;;  %6428 = vmatpush1.bf16.msra.mxu0 %v7478_v50  ;;  %v7532_v20 = vcombine.low %v5534_v43, %v5538_v11  ;;  %v7534_v50 = vcombine.low %v5535_v36, %v5539_v52  ;;  %v6488_v52 = vld [vmem:[#allocation19] sm:$0xff] }
 0xf71   :  { %6374 = vmatprep.mubr.bf16.mxu1 %v10137_v37  ;;  %6447 = vmatprep.mubr.bf16.mxu0 %v10137_v37  ;;  %v5515_v37 = vld [vmem:[#allocation17 + $0x2b8] sm:$0xff] }
 0xf72   :  { %6356 = vmatprep.subr.bf16.mxu1 %v7485_v22  ;;  %6429 = vmatprep.subr.bf16.mxu0 %v7487_v41  ;;  %v7511_v3 = vcombine.high %v5511_v14, %v5515_v37  ;;  %v7510_v9 = vcombine.low %v5511_v14, %v5515_v37  ;;  %v7543_v22 = vcombine.high %v5543_v51, %v5547_v57  ;;  %v5550_v41 = vld [vmem:[#allocation17 + $0x3d0] sm:$0xff] }
 0xf73   :  { %v7548_v62 = vcombine.low %v5550_v41, %v5554_v1 }
 0xf74   :  { %6357 = vmatpush1.bf16.msra.mxu1 %v7484_v35  ;;  %6430 = vmatpush1.bf16.msra.mxu0 %v7486_v39  ;;  %v7540_v35 = vcombine.low %v5542_v28, %v5546_v46  ;;  %v7542_v39 = vcombine.low %v5543_v51, %v5547_v57  ;;  %v6493_v28 = vld [vmem:[#allocation19 + $0x28] sm:$0xff]  ;;  %v6494_v46 = vld [vmem:[#allocation19 + $0x30] sm:$0xff]  ;;  %v6495_v51 = vld [vmem:[#allocation19 + $0x38] sm:$0xff] }
 0xf75   :  { %6358 = vmatprep.subr.bf16.mxu1 %v7493_v42  ;;  %6431 = vmatprep.subr.bf16.mxu0 %v7495_v6  ;;  %v7549_v42 = vcombine.high %v5550_v41, %v5554_v1  ;;  %v7551_v6 = vcombine.high %v5551_v31, %v5555_v34 }
 0xf78   :  { %6359 = vmatpush1.bf16.msra.mxu1 %v7492_v61  ;;  %6432 = vmatpush1.bf16.msra.mxu0 %v7494_v63 }
 0xf79   :  { %6360 = vmatprep.subr.bf16.mxu1 %v7501_v0  ;;  %6433 = vmatprep.subr.bf16.mxu0 %v7503_v29 }
 0xf7c   :  { %6361 = vmatpush1.bf16.msra.mxu1 %v7500_v47  ;;  %6434 = vmatpush1.bf16.msra.mxu0 %v7502_v17 }
 0xf7d   :  { %6362 = vmatprep.subr.bf16.mxu1 %v7509_v21  ;;  %6435 = vmatprep.subr.bf16.mxu0 %v7511_v3 }
 0xf80   :  { %6363 = vmatpush1.bf16.msra.mxu1 %v7508_v8  ;;  %6436 = vmatpush1.bf16.msra.mxu0 %v7510_v9 }
 0xf81   :  { %6364 = vmatprep.subr.bf16.mxu1 %v7517_v10  ;;  %6437 = vmatprep.subr.bf16.mxu0 %v7519_v19 }
 0xf84   :  { %6365 = vmatpush1.bf16.msra.mxu1 %v7516_v26  ;;  %6438 = vmatpush1.bf16.msra.mxu0 %v7518_v48 }
 0xf85   :  { %6366 = vmatprep.subr.bf16.mxu1 %v7525_v49  ;;  %6439 = vmatprep.subr.bf16.mxu0 %v7527_v32 }
 0xf88   :  { %6367 = vmatpush1.bf16.msra.mxu1 %v7524_v53  ;;  %6440 = vmatpush1.bf16.msra.mxu0 %v7526_v55  ;;  %v6489_v53 = vld [vmem:[#allocation19 + $0x8] sm:$0xff]  ;;  %v6490_v55 = vld [vmem:[#allocation19 + $0x10] sm:$0xff] }
 0xf89   :  { %6368 = vmatprep.subr.bf16.mxu1 %v7533_v60  ;;  %6441 = vmatprep.subr.bf16.mxu0 %v7535_v2  ;;  %v6491_v60 = vld [vmem:[#allocation19 + $0x18] sm:$0xff]  ;;  %v6492_v2 = vld [vmem:[#allocation19 + $0x20] sm:$0xff] }
 0xf8c   :  { %6369 = vmatpush1.bf16.msra.mxu1 %v7532_v20  ;;  %6442 = vmatpush1.bf16.msra.mxu0 %v7534_v50 }
 0xf8d   :  { %6370 = vmatprep.subr.bf16.mxu1 %v7541_v54  ;;  %6443 = vmatprep.subr.bf16.mxu0 %v7543_v22 }
 0xf90   :  { %6371 = vmatpush1.bf16.msra.mxu1 %v7540_v35  ;;  %6444 = vmatpush1.bf16.msra.mxu0 %v7542_v39 }
 0xf91   :  { %6372 = vmatprep.subr.bf16.mxu1 %v7549_v42  ;;  %6445 = vmatprep.subr.bf16.mxu0 %v7551_v6 }
 0xf94   :  { %6373 = vmatpush1.bf16.msra.mxu1 %v7548_v62  ;;  %6446 = vmatpush1.bf16.msra.mxu0 %v7550_v18 }
 0xf97   :  { %6375 = vmatmul.mubr.bf16.vlgmr.msra.gmra.mrb[80].mxu1 %v10134_v40  ;;  %6448 = vmatmul.mubr.bf16.vlgmr.msra.gmra.mrb[96].mxu0 %v10134_v40 }
 0xf98   :  { %6384 = vmatprep.mubr.bf16.mxu1 %v10144_v24  ;;  %6457 = vmatprep.mubr.bf16.mxu0 %v10144_v24 }
 0xf9f   :  { %6385 = vmatmul.mubr.bf16.gmra.mrb[84].mxu1 %v10146_v12  ;;  %6458 = vmatmul.mubr.bf16.gmra.mrb[100].mxu0 %v10146_v12 }
 0xfa0   :  { %6394 = vmatprep.mubr.bf16.mxu1 %v10179_v58  ;;  %6467 = vmatprep.mubr.bf16.mxu0 %v10179_v58 }
 0xfa7   :  { %6395 = vmatmul.mubr.bf16.gmra.mrb[88].mxu1 %v10181_v59  ;;  %6468 = vmatmul.mubr.bf16.gmra.mrb[104].mxu0 %v10181_v59 }
 0xfa8   :  { %6404 = vmatprep.mubr.bf16.mxu1 %v10195_v33  ;;  %6477 = vmatprep.mubr.bf16.mxu0 %v10195_v33 }
 0xfaf   :  { %6405 = vmatmul.mubr.bf16.gmra.mrb[92].mxu1 %v10197_v23  ;;  %6478 = vmatmul.mubr.bf16.gmra.mrb[108].mxu0 %v10197_v23 }
 0xfb0   :  { %6584 = vmatprep.mubr.f32.mxu1 %v8727_v30  ;;  %6745 = vmatprep.mubr.f32.mxu0 %v8727_v30 }
0x102a   :  { %v6230_v40 = vpop.f32.mrb[64].mxu1  ;;  %v10227_v24 = vpop.f32.mrb[80].mxu0 }
0x102b   :  { %v6232_v12 = vpop.f32.mrb[65].mxu1  ;;  %v10229_v58 = vpop.f32.mrb[81].mxu0 }
0x102c   :  { %v6234_v56 = vpop.f32.mrb[66].mxu1  ;;  %v10231_v59 = vpop.f32.mrb[82].mxu0 }
0x102d   :  { %v8274_v25 = vpack.c.bf16 %v6234_v56, %v6230_v40  ;;  %v6236_v61 = vpop.f32.mrb[67].mxu1  ;;  %v10233_v33 = vpop.f32.mrb[83].mxu0 }
0x102e   :  { %v8272_v63 = vpack.c.bf16 %v6236_v61, %v6232_v12 }
0x1030   :  { %8273 = vmatprep.subr.bf16.mxu1 %v8272_v63 }
0x1031   :  { %8275 = vmatpush1.bf16.msra.mxu1 %v8274_v25 }
0x1032   :  { %v6240_v23 = vpop.f32.mrb[68].mxu1  ;;  %v10235_v0 = vpop.f32.mrb[84].mxu0 }
0x1033   :  { %v6242_v29 = vpop.f32.mrb[69].mxu1  ;;  %v10237_v27 = vpop.f32.mrb[85].mxu0 }
0x1034   :  { %v6244_v16 = vpop.f32.mrb[70].mxu1  ;;  %v10239_v14 = vpop.f32.mrb[86].mxu0 }
0x1035   :  { %v8278_v37 = vpack.c.bf16 %v6244_v16, %v6240_v23  ;;  %v6246_v47 = vpop.f32.mrb[71].mxu1  ;;  %v10241_v17 = vpop.f32.mrb[87].mxu0 }
0x1036   :  { %v8276_v21 = vpack.c.bf16 %v6246_v47, %v6242_v29 }
0x1038   :  { %8277 = vmatprep.subr.bf16.mxu1 %v8276_v21 }
0x1039   :  { %8279 = vmatpush1.bf16.msra.mxu1 %v8278_v37 }
0x103a   :  { %v6250_v3 = vpop.f32.mrb[72].mxu1  ;;  %v10243_v4 = vpop.f32.mrb[88].mxu0 }
0x103b   :  { %v6252_v5 = vpop.f32.mrb[73].mxu1  ;;  %v10245_v13 = vpop.f32.mrb[89].mxu0 }
0x103c   :  { %v6254_v44 = vpop.f32.mrb[74].mxu1  ;;  %v10247_v8 = vpop.f32.mrb[90].mxu0 }
0x103d   :  { %v8282_v9 = vpack.c.bf16 %v6254_v44, %v6250_v3  ;;  %v6256_v10 = vpop.f32.mrb[75].mxu1  ;;  %v10249_v19 = vpop.f32.mrb[91].mxu0 }
0x103e   :  { %v8280_v7 = vpack.c.bf16 %v6256_v10, %v6252_v5 }
0x1040   :  { %8281 = vmatprep.subr.bf16.mxu1 %v8280_v7 }
0x1041   :  { %8283 = vmatpush1.bf16.msra.mxu1 %v8282_v9 }
0x1042   :  { %v6260_v15 = vpop.f32.mrb[76].mxu1  ;;  %v10251_v38 = vpop.f32.mrb[92].mxu0 }
0x1043   :  { %v6262_v45 = vpop.f32.mrb[77].mxu1  ;;  %v10253_v26 = vpop.f32.mrb[93].mxu0 }
0x1044   :  { %v6264_v48 = vpop.f32.mrb[78].mxu1  ;;  %v10255_v49 = vpop.f32.mrb[94].mxu0 }
0x1045   :  { %v8286_v32 = vpack.c.bf16 %v6264_v48, %v6260_v15  ;;  %v6266_v43 = vpop.f32.mrb[79].mxu1  ;;  %v10257_v11 = vpop.f32.mrb[95].mxu0 }
0x1046   :  { %v8284_v36 = vpack.c.bf16 %v6266_v43, %v6262_v45 }
0x1048   :  { %8285 = vmatprep.subr.bf16.mxu1 %v8284_v36 }
0x1049   :  { %8287 = vmatpush1.bf16.msra.mxu1 %v8286_v32 }
0x104c   :  { %7552 = vmatmul.mubr.msk.f32.vlgmr.msra.gmra.mrb[62].mxu1 %vm804_vm2, %v6488_v52 }
0x104d   :  { %6590 = vmatprep.mubr.f32.mxu1 %v8727_v30 }
0x1050   :  { %7553 = vmatmul.mubr.msk.f32.gmra.mrb[96].mxu1 %vm804_vm2, %v6489_v53  ;;  %v6649_v53 = vld [vmem:[#allocation20] sm:$0xff] }
0x1051   :  { %6596 = vmatprep.mubr.f32.mxu1 %v8727_v30 }
0x1054   :  { %7554 = vmatmul.mubr.msk.f32.gmra.mrb[98].mxu1 %vm804_vm2, %v6490_v55  ;;  %v6650_v55 = vld [vmem:[#allocation20 + $0x8] sm:$0xff] }
0x1055   :  { %6602 = vmatprep.mubr.f32.mxu1 %v8727_v30 }
0x1058   :  { %7555 = vmatmul.mubr.msk.f32.gmra.mrb[100].mxu1 %vm804_vm2, %v6491_v60  ;;  %v6651_v60 = vld [vmem:[#allocation20 + $0x10] sm:$0xff] }
0x1059   :  { %6608 = vmatprep.mubr.f32.mxu1 %v8727_v30 }
0x105c   :  { %7556 = vmatmul.mubr.msk.f32.gmra.mrb[102].mxu1 %vm804_vm2, %v6492_v2  ;;  %v6652_v2 = vld [vmem:[#allocation20 + $0x18] sm:$0xff] }
0x105d   :  { %6614 = vmatprep.mubr.f32.mxu1 %v8727_v30 }
0x1060   :  { %7557 = vmatmul.mubr.msk.f32.gmra.mrb[104].mxu1 %vm804_vm2, %v6493_v28  ;;  %v6653_v28 = vld [vmem:[#allocation20 + $0x20] sm:$0xff] }
0x1061   :  { %6620 = vmatprep.mubr.f32.mxu1 %v8727_v30 }
0x1064   :  { %7558 = vmatmul.mubr.msk.f32.gmra.mrb[106].mxu1 %vm804_vm2, %v6494_v46  ;;  %v6654_v46 = vld [vmem:[#allocation20 + $0x28] sm:$0xff] }
0x1065   :  { %6626 = vmatprep.mubr.f32.mxu1 %v8727_v30 }
0x1068   :  { %7559 = vmatmul.mubr.msk.f32.gmra.mrb[108].mxu1 %vm804_vm2, %v6495_v51  ;;  %v6655_v51 = vld [vmem:[#allocation20 + $0x30] sm:$0xff] }
0x106a   :  { %v10274_v57 = vpop.f32.mrb[80].mxu1  ;;  %v6449_v20 = vpop.f32.mrb[96].mxu0 }
0x106b   :  { %v10276_v50 = vpop.f32.mrb[81].mxu1  ;;  %v6451_v54 = vpop.f32.mrb[97].mxu0 }
0x106c   :  { %v10278_v22 = vpop.f32.mrb[82].mxu1  ;;  %v6453_v41 = vpop.f32.mrb[98].mxu0 }
0x106d   :  { %v8290_v1 = vpack.c.bf16 %v6453_v41, %v6449_v20  ;;  %v10280_v31 = vpop.f32.mrb[83].mxu1  ;;  %v6455_v34 = vpop.f32.mrb[99].mxu0  ;;  %v6656_v20 = vld [vmem:[#allocation20 + $0x38] sm:$0xff]  ;;  %v6875_v41 = vld [vmem:[%s10510_s19 + $0x88] sm:$0xff] }
0x106e   :  { %v8288_v35 = vpack.c.bf16 %v6455_v34, %v6451_v54  ;;  %v6874_v54 = vld [vmem:[%s10510_s19 + $0x80] sm:$0xff] }
0x106f   :  { %v8304_v34 = vpack.c.bf16 %v6875_v41, %v6874_v54  ;;  %v6868_v54 = vld [vmem:[%s10510_s19 + $0x50] sm:$0xff] }
0x1070   :  { %8289 = vmatprep.subr.bf16.mxu0 %v8288_v35  ;;  %v6876_v35 = vld [vmem:[%s10510_s19 + $0x90] sm:$0xff] }
0x1071   :  { %8291 = vmatpush1.bf16.msra.mxu0 %v8290_v1  ;;  %v6858_v1 = vld [vmem:[%s10510_s19] sm:$0xff]  ;;  %8305 = vmatprep.subr.bf16.mxu1 %v8304_v34 }
0x1072   :  { %v10282_v39 = vpop.f32.mrb[84].mxu1  ;;  %v6459_v42 = vpop.f32.mrb[100].mxu0 }
0x1073   :  { %v10284_v6 = vpop.f32.mrb[85].mxu1  ;;  %v6461_v62 = vpop.f32.mrb[101].mxu0 }
0x1074   :  { %v10286_v18 = vpop.f32.mrb[86].mxu1  ;;  %v6463_v40 = vpop.f32.mrb[102].mxu0 }
0x1075   :  { %v8294_v12 = vpack.c.bf16 %v6463_v40, %v6459_v42  ;;  %v10288_v56 = vpop.f32.mrb[87].mxu1  ;;  %v6465_v25 = vpop.f32.mrb[103].mxu0  ;;  %v6877_v42 = vld [vmem:[%s10510_s19 + $0x98] sm:$0xff] }
0x1076   :  { %v8292_v61 = vpack.c.bf16 %v6465_v25, %v6461_v62  ;;  %v8308_v40 = vpack.c.bf16 %v6877_v42, %v6876_v35  ;;  %v6861_v25 = vld [vmem:[%s10510_s19 + $0x18] sm:$0xff]  ;;  %v6887_v35 = vld [vmem:[%s10510_s19 + $0xe8] sm:$0xff]  ;;  %v6870_v42 = vld [vmem:[%s10510_s19 + $0x60] sm:$0xff] }
0x1078   :  { %8293 = vmatprep.subr.bf16.mxu0 %v8292_v61  ;;  %v6878_v61 = vld [vmem:[%s10510_s19 + $0xa0] sm:$0xff] }
0x1079   :  { %8295 = vmatpush1.bf16.msra.mxu0 %v8294_v12  ;;  %v6860_v12 = vld [vmem:[%s10510_s19 + $0x10] sm:$0xff] }
0x107a   :  { %v10290_v63 = vpop.f32.mrb[88].mxu1  ;;  %v6469_v23 = vpop.f32.mrb[104].mxu0 }
0x107b   :  { %v10292_v29 = vpop.f32.mrb[89].mxu1  ;;  %v6471_v16 = vpop.f32.mrb[105].mxu0 }
0x107c   :  { %v10294_v37 = vpop.f32.mrb[90].mxu1  ;;  %v6473_v47 = vpop.f32.mrb[106].mxu0 }
0x107d   :  { %v8298_v21 = vpack.c.bf16 %v6473_v47, %v6469_v23  ;;  %v10296_v3 = vpop.f32.mrb[91].mxu1  ;;  %v6475_v5 = vpop.f32.mrb[107].mxu0  ;;  %v6879_v23 = vld [vmem:[%s10510_s19 + $0xa8] sm:$0xff] }
0x107e   :  { %v8296_v44 = vpack.c.bf16 %v6475_v5, %v6471_v16  ;;  %v8310_v16 = vpack.c.bf16 %v6861_v25, %v6860_v12  ;;  %v8312_v47 = vpack.c.bf16 %v6879_v23, %v6878_v61  ;;  %v6863_v5 = vld [vmem:[%s10510_s19 + $0x28] sm:$0xff]  ;;  %v6888_v25 = vld [vmem:[%s10510_s19 + $0xf0] sm:$0xff]  ;;  %v6889_v61 = vld [vmem:[%s10510_s19 + $0xf8] sm:$0xff] }
0x107f   :  { %v6872_v23 = vld [vmem:[%s10510_s19 + $0x70] sm:$0xff] }
0x1080   :  { %8297 = vmatprep.subr.bf16.mxu0 %v8296_v44  ;;  %v6880_v44 = vld [vmem:[%s10510_s19 + $0xb0] sm:$0xff] }
0x1081   :  { %8299 = vmatpush1.bf16.msra.mxu0 %v8298_v21  ;;  %v6862_v21 = vld [vmem:[%s10510_s19 + $0x20] sm:$0xff] }
0x1082   :  { %v10298_v9 = vpop.f32.mrb[92].mxu1  ;;  %v6479_v10 = vpop.f32.mrb[108].mxu0 }
0x1083   :  { %v10300_v7 = vpop.f32.mrb[93].mxu1  ;;  %v6481_v15 = vpop.f32.mrb[109].mxu0 }
0x1084   :  { %v10302_v45 = vpop.f32.mrb[94].mxu1  ;;  %v6483_v48 = vpop.f32.mrb[110].mxu0 }
0x1085   :  { %v8302_v32 = vpack.c.bf16 %v6483_v48, %v6479_v10  ;;  %v10304_v43 = vpop.f32.mrb[95].mxu1  ;;  %v6485_v36 = vpop.f32.mrb[111].mxu0  ;;  %v6881_v10 = vld [vmem:[%s10510_s19 + $0xb8] sm:$0xff] }
0x1086   :  { %v8300_v52 = vpack.c.bf16 %v6485_v36, %v6481_v15  ;;  %v8314_v15 = vpack.c.bf16 %v6863_v5, %v6862_v21  ;;  %v8316_v48 = vpack.c.bf16 %v6881_v10, %v6880_v44  ;;  %v6865_v36 = vld [vmem:[%s10510_s19 + $0x38] sm:$0xff] }
0x1088   :  { %8301 = vmatprep.subr.bf16.mxu0 %v8300_v52 }
0x1089   :  { %8303 = vmatpush1.bf16.msra.mxu0 %v8302_v32  ;;  %v6864_v32 = vld [vmem:[%s10510_s19 + $0x30] sm:$0xff] }
0x108a   :  { %v8318_v52 = vpack.c.bf16 %v6865_v36, %v6864_v32 }
0x108c   :  { %7560 = vmatmul.mubr.msk.f32.vlgmr.msra.gmra.mrb[78].mxu0 %vm804_vm2, %v6649_v53  ;;  %v6882_v53 = vld [vmem:[%s10510_s19 + $0xc0] sm:$0xff] }
0x108d   :  { %6751 = vmatprep.mubr.f32.mxu0 %v8727_v30 }
0x1090   :  { %7561 = vmatmul.mubr.msk.f32.gmra.mrb[112].mxu0 %vm804_vm2, %v6650_v55  ;;  %v6883_v55 = vld [vmem:[%s10510_s19 + $0xc8] sm:$0xff] }
0x1091   :  { %6757 = vmatprep.mubr.f32.mxu0 %v8727_v30 }
0x1094   :  { %7562 = vmatmul.mubr.msk.f32.gmra.mrb[114].mxu0 %vm804_vm2, %v6651_v60  ;;  %v6866_v60 = vld [vmem:[%s10510_s19 + $0x40] sm:$0xff] }
0x1095   :  { %6763 = vmatprep.mubr.f32.mxu0 %v8727_v30 }
0x1098   :  { %7563 = vmatmul.mubr.msk.f32.gmra.mrb[116].mxu0 %vm804_vm2, %v6652_v2  ;;  %v8320_v2 = vpack.c.bf16 %v6883_v55, %v6882_v53 }
0x1099   :  { %6769 = vmatprep.mubr.f32.mxu0 %v8727_v30 }
0x109c   :  { %7564 = vmatmul.mubr.msk.f32.gmra.mrb[118].mxu0 %vm804_vm2, %v6653_v28  ;;  %v6867_v28 = vld [vmem:[%s10510_s19 + $0x48] sm:$0xff] }
0x109d   :  { %6775 = vmatprep.mubr.f32.mxu0 %v8727_v30 }
0x10a0   :  { %7565 = vmatmul.mubr.msk.f32.gmra.mrb[120].mxu0 %vm804_vm2, %v6654_v46  ;;  %v8322_v46 = vpack.c.bf16 %v6867_v28, %v6866_v60 }
0x10a1   :  { %6781 = vmatprep.mubr.f32.mxu0 %v8727_v30 }
0x10a4   :  { %7566 = vmatmul.mubr.msk.f32.gmra.mrb[122].mxu0 %vm804_vm2, %v6655_v51  ;;  %v6884_v51 = vld [vmem:[%s10510_s19 + $0xd0] sm:$0xff] }
0x10a5   :  { %6787 = vmatprep.mubr.f32.mxu0 %v8727_v30  ;;  %v6859_v30 = vld [vmem:[%s10510_s19 + $0x8] sm:$0xff] }
0x10a6   :  { %v8306_v62 = vpack.c.bf16 %v6859_v30, %v6858_v1  ;;  %v6869_v1 = vld [vmem:[%s10510_s19 + $0x58] sm:$0xff]  ;;  %v6886_v30 = vld [vmem:[%s10510_s19 + $0xe0] sm:$0xff] }
0x10a7   :  { %v8326_v34 = vpack.c.bf16 %v6869_v1, %v6868_v54 }
0x10a8   :  { %7567 = vmatmul.mubr.msk.f32.gmra.mrb[124].mxu0 %vm804_vm2, %v6656_v20  ;;  %8307 = vmatpush3.bf16.msra.mxu1 %v8306_v62  ;;  %v6885_v20 = vld [vmem:[%s10510_s19 + $0xd8] sm:$0xff]  ;;  %v8328_v62 = vpack.c.bf16 %v6887_v35, %v6886_v30 }
0x10a9   :  { %8309 = vmatprep.subr.bf16.mxu1 %v8308_v40  ;;  %v8324_v41 = vpack.c.bf16 %v6885_v20, %v6884_v51  ;;  %v6871_v40 = vld [vmem:[%s10510_s19 + $0x68] sm:$0xff] }
0x10aa   :  { %v8330_v12 = vpack.c.bf16 %v6871_v40, %v6870_v42 }
0x10ac   :  { %8311 = vmatpush3.bf16.msra.mxu1 %v8310_v16  ;;  %v8332_v16 = vpack.c.bf16 %v6889_v61, %v6888_v25 }
0x10ad   :  { %8313 = vmatprep.subr.bf16.mxu1 %v8312_v47  ;;  %v6873_v47 = vld [vmem:[%s10510_s19 + $0x78] sm:$0xff] }
0x10ae   :  { %v8334_v21 = vpack.c.bf16 %v6873_v47, %v6872_v23 }
0x10b0   :  { %8315 = vmatpush3.bf16.msra.mxu1 %v8314_v15 }
0x10b1   :  { %8317 = vmatprep.subr.bf16.mxu1 %v8316_v48 }
0x10b4   :  { %8319 = vmatpush3.bf16.msra.mxu1 %v8318_v52 }
0x10b5   :  { %8321 = vmatprep.subr.bf16.mxu1 %v8320_v2 }
0x10b8   :  { %8323 = vmatpush3.bf16.msra.mxu1 %v8322_v46 }
0x10b9   :  { %8325 = vmatprep.subr.bf16.mxu1 %v8324_v41 }
0x10bc   :  { %8327 = vmatpush3.bf16.msra.mxu1 %v8326_v34 }
0x10bd   :  { %8329 = vmatprep.subr.bf16.mxu1 %v8328_v62 }
0x10c0   :  { %8331 = vmatpush3.bf16.msra.mxu1 %v8330_v12 }
0x10c1   :  { %8333 = vmatprep.subr.bf16.mxu1 %v8332_v16 }
0x10c4   :  { %8335 = vmatpush3.bf16.msra.mxu1 %v8334_v21 }
0x111f   :  { %v6586_v5 = vpop.f32.mrb[62].mxu1 }
0x1120   :  { %v6633_v44 = vadd.f32 %v6586_v5, %v10227_v24  ;;  %v6588_v10 = vpop.f32.mrb[63].mxu1 }
0x1121   :  { %v6634_v15 = vadd.f32 %v6588_v10, %v10229_v58 }
0x1122   :  { %8365 = vtanh.f32 %v6633_v44 }
0x1123   :  { %v6592_v48 = vpop.f32.mrb[96].mxu1  ;;  %8367 = vtanh.f32 %v6634_v15 }
0x1124   :  { %v6635_v32 = vadd.f32 %v6592_v48, %v10231_v59  ;;  %v6594_v36 = vpop.f32.mrb[97].mxu1 }
0x1125   :  { %v6636_v52 = vadd.f32 %v6594_v36, %v10233_v33 }
0x1127   :  { %v6598_v53 = vpop.f32.mrb[98].mxu1 }
0x1128   :  { %v6637_v55 = vadd.f32 %v6598_v53, %v10235_v0  ;;  %v6600_v60 = vpop.f32.mrb[99].mxu1 }
0x1129   :  { %v6638_v2 = vadd.f32 %v6600_v60, %v10237_v27 }
0x112b   :  { %v6604_v28 = vpop.f32.mrb[100].mxu1 }
0x112c   :  { %v6639_v46 = vadd.f32 %v6604_v28, %v10239_v14  ;;  %v6606_v51 = vpop.f32.mrb[101].mxu1  ;;  %v8366_v25 = vpop.eup %8365 }
0x112d   :  { %v6640_v24 = vadd.f32 %v6606_v51, %v10241_v17  ;;  %v8368_v61 = vpop.eup %8367 }
0x112f   :  { %v6610_v20 = vpop.f32.mrb[102].mxu1 }
0x1130   :  { %v6641_v58 = vadd.f32 %v6610_v20, %v10243_v4  ;;  %v6612_v54 = vpop.f32.mrb[103].mxu1 }
0x1131   :  { %v6642_v59 = vadd.f32 %v6612_v54, %v10245_v13 }
0x1133   :  { %v6616_v41 = vpop.f32.mrb[104].mxu1 }
0x1134   :  { %v10428_v33 = vadd.f32 %v6616_v41, %v10247_v8  ;;  %v6618_v0 = vpop.f32.mrb[105].mxu1 }
0x1135   :  { %v10431_v1 = vadd.f32 %v6618_v0, %v10249_v19 }
0x1137   :  { %v6622_v27 = vpop.f32.mrb[106].mxu1 }
0x1138   :  { %v10434_v14 = vadd.f32 %v6622_v27, %v10251_v38  ;;  %v6624_v34 = vpop.f32.mrb[107].mxu1 }
0x1139   :  { %v10437_v17 = vadd.f32 %v6624_v34, %v10253_v26 }
0x113b   :  { %v6628_v4 = vpop.f32.mrb[108].mxu1 }
0x113c   :  { %v10440_v30 = vadd.f32 %v6628_v4, %v10255_v49  ;;  %v6630_v13 = vpop.f32.mrb[109].mxu1 }
0x113d   :  { %v10443_v8 = vadd.f32 %v6630_v13, %v10257_v11 }
0x115f   :  { %v6747_v35 = vpop.f32.mrb[78].mxu0 }
0x1160   :  { %v6794_v19 = vadd.f32 %v6747_v35, %v10274_v57  ;;  %v6749_v42 = vpop.f32.mrb[79].mxu0 }
0x1161   :  { %v6795_v38 = vadd.f32 %v6749_v42, %v10276_v50 }
0x1162   :  { %8369 = vtanh.f32 %v6794_v19 }
0x1163   :  { %8371 = vtanh.f32 %v6795_v38  ;;  %v6753_v26 = vpop.f32.mrb[112].mxu0 }
0x1164   :  { %8373 = vtanh.f32 %v6635_v32  ;;  %v6796_v62 = vadd.f32 %v6753_v26, %v10278_v22  ;;  %v6755_v49 = vpop.f32.mrb[113].mxu0 }
0x1165   :  { %8375 = vtanh.f32 %v6636_v52  ;;  %v6797_v40 = vadd.f32 %v6755_v49, %v10280_v31 }
0x1166   :  { %8377 = vtanh.f32 %v6796_v62 }
0x1167   :  { %8379 = vtanh.f32 %v6797_v40  ;;  %v6759_v11 = vpop.f32.mrb[114].mxu0 }
0x1168   :  { %8381 = vtanh.f32 %v6637_v55  ;;  %v6798_v57 = vadd.f32 %v6759_v11, %v10282_v39  ;;  %v6761_v12 = vpop.f32.mrb[115].mxu0 }
0x1169   :  { %8383 = vtanh.f32 %v6638_v2  ;;  %v6799_v50 = vadd.f32 %v6761_v12, %v10284_v6 }
0x116a   :  { %8385 = vtanh.f32 %v6798_v57 }
0x116b   :  { %8387 = vtanh.f32 %v6799_v50  ;;  %v6765_v23 = vpop.f32.mrb[116].mxu0 }
0x116c   :  { %v8370_v22 = vpop.eup %8369  ;;  %8389 = vtanh.f32 %v6639_v46  ;;  %v6800_v16 = vadd.f32 %v6765_v23, %v10286_v18  ;;  %v6767_v31 = vpop.f32.mrb[117].mxu0 }
0x116d   :  { %v8372_v47 = vpop.eup %8371  ;;  %8391 = vtanh.f32 %v6640_v24  ;;  %v6801_v21 = vadd.f32 %v6767_v31, %v10288_v56  ;;  %v6842_v5 = vadd.f32 %v8370_v22, %v8366_v25 }
0x116e   :  { %v8374_v39 = vpop.eup %8373  ;;  %8393 = vtanh.f32 %v6800_v16  ;;  %v6843_v44 = vadd.f32 %v8372_v47, %v8368_v61 }
0x116f   :  { %v8376_v10 = vpop.eup %8375  ;;  %8395 = vtanh.f32 %v6801_v21  ;;  %v6771_v6 = vpop.f32.mrb[118].mxu0 }
0x1170   :  { %v8378_v15 = vpop.eup %8377  ;;  %8397 = vtanh.f32 %v6641_v58  ;;  %v6802_v48 = vadd.f32 %v6771_v6, %v10290_v63  ;;  %v6773_v32 = vpop.f32.mrb[119].mxu0  ;;  %6954 = vmatprep.mubr.f32.mxu1 %v6843_v44 }
0x1171   :  { %v8380_v36 = vpop.eup %8379  ;;  %8399 = vtanh.f32 %v6642_v59  ;;  %v6803_v18 = vadd.f32 %v6773_v32, %v10292_v29  ;;  %6955 = vmatmul.mubr.f32.vlgmr.msra.gmra.mrb[110].mxu1 %v6842_v5  ;;  %v6844_v52 = vadd.f32 %v8378_v15, %v8374_v39 }
0x1172   :  { %v8382_v56 = vpop.eup %8381  ;;  %8401 = vtanh.f32 %v6802_v48  ;;  %v6845_v53 = vadd.f32 %v8380_v36, %v8376_v10 }
0x1173   :  { %v8384_v55 = vpop.eup %8383  ;;  %8403 = vtanh.f32 %v6803_v18  ;;  %v6777_v60 = vpop.f32.mrb[120].mxu0 }
0x1174   :  { %v8386_v2 = vpop.eup %8385  ;;  %8405 = vtanh.f32 %v10428_v33  ;;  %v6804_v28 = vadd.f32 %v6777_v60, %v10294_v37  ;;  %v6779_v63 = vpop.f32.mrb[121].mxu0  ;;  %6959 = vmatprep.mubr.f32.mxu1 %v6845_v53 }
0x1175   :  { %v8388_v46 = vpop.eup %8387  ;;  %8407 = vtanh.f32 %v10431_v1  ;;  %v6805_v29 = vadd.f32 %v6779_v63, %v10296_v3  ;;  %6960 = vmatmul.mubr.f32.gmra.mrb[112].mxu1 %v6844_v52  ;;  %v6846_v51 = vadd.f32 %v8386_v2, %v8382_v56 }
0x1176   :  { %v8390_v24 = vpop.eup %8389  ;;  %8409 = vtanh.f32 %v6804_v28  ;;  %v6847_v20 = vadd.f32 %v8388_v46, %v8384_v55 }
0x1177   :  { %v8392_v58 = vpop.eup %8391  ;;  %8411 = vtanh.f32 %v6805_v29  ;;  %v6783_v54 = vpop.f32.mrb[122].mxu0 }
0x1178   :  { %v8394_v59 = vpop.eup %8393  ;;  %8413 = vtanh.f32 %v10434_v14  ;;  %v6806_v37 = vadd.f32 %v6783_v54, %v10298_v9  ;;  %v6785_v41 = vpop.f32.mrb[123].mxu0  ;;  %6964 = vmatprep.mubr.f32.mxu1 %v6847_v20 }
0x1179   :  { %v8396_v33 = vpop.eup %8395  ;;  %8415 = vtanh.f32 %v10437_v17  ;;  %v6807_v3 = vadd.f32 %v6785_v41, %v10300_v7  ;;  %6965 = vmatmul.mubr.f32.gmra.mrb[114].mxu1 %v6846_v51  ;;  %v6848_v0 = vadd.f32 %v8394_v59, %v8390_v24 }
0x117a   :  { %v8398_v1 = vpop.eup %8397  ;;  %8417 = vtanh.f32 %v6806_v37  ;;  %v6849_v27 = vadd.f32 %v8396_v33, %v8392_v58 }
0x117b   :  { %v8400_v34 = vpop.eup %8399  ;;  %8419 = vtanh.f32 %v6807_v3  ;;  %v6789_v4 = vpop.f32.mrb[124].mxu0 }
0x117c   :  { %v8402_v13 = vpop.eup %8401  ;;  %8421 = vtanh.f32 %v10440_v30  ;;  %v6808_v9 = vadd.f32 %v6789_v4, %v10302_v45  ;;  %v6791_v14 = vpop.f32.mrb[125].mxu0  ;;  %6969 = vmatprep.mubr.f32.mxu1 %v6849_v27 }
0x117d   :  { %v8404_v35 = vpop.eup %8403  ;;  %8423 = vtanh.f32 %v10443_v8  ;;  %v6809_v7 = vadd.f32 %v6791_v14, %v10304_v43  ;;  %6970 = vmatmul.mubr.f32.gmra.mrb[116].mxu1 %v6848_v0  ;;  %v6850_v17 = vadd.f32 %v8402_v13, %v8398_v1 }
0x117e   :  { %v8406_v19 = vpop.eup %8405  ;;  %8425 = vtanh.f32 %v6808_v9  ;;  %v6851_v42 = vadd.f32 %v8404_v35, %v8400_v34 }
0x117f   :  { %v8408_v38 = vpop.eup %8407  ;;  %8427 = vtanh.f32 %v6809_v7 }
0x1180   :  { %v8410_v26 = vpop.eup %8409  ;;  %6974 = vmatprep.mubr.f32.mxu1 %v6851_v42 }
0x1181   :  { %v8412_v62 = vpop.eup %8411  ;;  %6975 = vmatmul.mubr.f32.gmra.mrb[118].mxu1 %v6850_v17  ;;  %v6852_v30 = vadd.f32 %v8410_v26, %v8406_v19 }
0x1182   :  { %v8414_v45 = vpop.eup %8413  ;;  %v6853_v49 = vadd.f32 %v8412_v62, %v8408_v38 }
0x1183   :  { %v8416_v40 = vpop.eup %8415 }
0x1184   :  { %v8418_v11 = vpop.eup %8417  ;;  %6979 = vmatprep.mubr.f32.mxu1 %v6853_v49 }
0x1185   :  { %v8420_v8 = vpop.eup %8419  ;;  %6980 = vmatmul.mubr.f32.gmra.mrb[120].mxu1 %v6852_v30  ;;  %v6854_v43 = vadd.f32 %v8418_v11, %v8414_v45 }
0x1186   :  { %v8422_v57 = vpop.eup %8421  ;;  %v6855_v12 = vadd.f32 %v8420_v8, %v8416_v40 }
0x1187   :  { %v8424_v50 = vpop.eup %8423 }
0x1188   :  { %v8426_v25 = vpop.eup %8425  ;;  %6984 = vmatprep.mubr.f32.mxu1 %v6855_v12 }
0x1189   :  { %v8428_v61 = vpop.eup %8427  ;;  %6985 = vmatmul.mubr.f32.gmra.mrb[122].mxu1 %v6854_v43  ;;  %v6856_v23 = vadd.f32 %v8426_v25, %v8422_v57 }
0x118a   :  { %v6857_v22 = vadd.f32 %v8428_v61, %v8424_v50 }
0x118c   :  { %6989 = vmatprep.mubr.f32.mxu1 %v6857_v22 }
0x118d   :  { %6990 = vmatmul.mubr.f32.gmra.mrb[124].mxu1 %v6856_v23 }
0x1244   :  { %v7880_v16 = vpop.f32.mrb[110].mxu1 }
0x1245   :  { %v7881_v31 = vpop.f32.mrb[111].mxu1 }
0x1246   :  { %v7882_v47 = vadd.f32 %v7881_v31, %v7880_v16 }
0x1248   :  { %6995 = vst [vmem:[%s10534_s8] sm:$0xff] %v7882_v47  ;;  %v7883_v21 = vpop.f32.mrb[112].mxu1 }
0x1249   :  { %v7884_v5 = vpop.f32.mrb[113].mxu1 }
0x124a   :  { %v7885_v39 = vadd.f32 %v7884_v5, %v7883_v21 }
0x124c   :  { %6996 = vst [vmem:[%s10534_s8 + $0x8] sm:$0xff] %v7885_v39  ;;  %v7886_v44 = vpop.f32.mrb[114].mxu1 }
0x124d   :  { %v7887_v10 = vpop.f32.mrb[115].mxu1 }
0x124e   :  { %v7888_v6 = vadd.f32 %v7887_v10, %v7886_v44 }
0x1250   :  { %6997 = vst [vmem:[%s10534_s8 + $0x10] sm:$0xff] %v7888_v6  ;;  %v7889_v15 = vpop.f32.mrb[116].mxu1 }
0x1251   :  { %v7890_v48 = vpop.f32.mrb[117].mxu1 }
0x1252   :  { %v7891_v32 = vadd.f32 %v7890_v48, %v7889_v15 }
0x1254   :  { %6998 = vst [vmem:[%s10534_s8 + $0x18] sm:$0xff] %v7891_v32  ;;  %v7892_v36 = vpop.f32.mrb[118].mxu1 }
0x1255   :  { %v7893_v18 = vpop.f32.mrb[119].mxu1 }
0x1256   :  { %v7894_v52 = vadd.f32 %v7893_v18, %v7892_v36 }
0x1258   :  { %6999 = vst [vmem:[%s10534_s8 + $0x20] sm:$0xff] %v7894_v52  ;;  %v7895_v56 = vpop.f32.mrb[120].mxu1 }
0x1259   :  { %v7896_v53 = vpop.f32.mrb[121].mxu1 }
0x125a   :  { %v7897_v55 = vadd.f32 %v7896_v53, %v7895_v56 }
0x125c   :  { %7000 = vst [vmem:[%s10534_s8 + $0x28] sm:$0xff] %v7897_v55  ;;  %v7898_v60 = vpop.f32.mrb[122].mxu1 }
0x125d   :  { %v7899_v2 = vpop.f32.mrb[123].mxu1 }
0x125e   :  { %v7900_v28 = vadd.f32 %v7899_v2, %v7898_v60 }
0x1260   :  { %7001 = vst [vmem:[%s10534_s8 + $0x30] sm:$0xff] %v7900_v28  ;;  %v7901_v63 = vpop.f32.mrb[124].mxu1 }
0x1261   :  { %v7902_v46 = vpop.f32.mrb[125].mxu1 }
0x1262   :  { %v7903_v29 = vadd.f32 %v7902_v46, %v7901_v63 }
0x1264   :  { %7002 = vst [vmem:[%s10534_s8 + $0x38] sm:$0xff] %v7903_v29 }
0x1265   :  { %7007 = vsyncpa [#allocation4], 1 }
0x1266   :  { %7008 = vsyncpa [#allocation6], 1 }
0x1267   :  { %7009 = vsyncpa [#allocation9], 1 }
0x1268   :  { %7010 = vsyncpa [#allocation12], 1 }
0x1269   :  { %7011 = vsyncpa [#allocation15], 1 }
0x126a   :  { %7012 = vsyncpa [#allocation18], 1 }
0x126b   :  { %7013 = vsyncpa [#allocation21], 1 }

</bundles_post_ra>
